<compile_context>
chip_gen: v7x
topology: tpu7x:2x2x1
jax: 0.10.0
libtpu: 0.0.40
codegen_flags: <defaults>
</compile_context>

<pallas_src>
import jax
import jax.numpy as jnp
from jax.experimental import pallas as pl
from jax.experimental.pallas import tpu as pltpu

HIDDEN = 1000       # hidden width from the module definition
HIDDEN_PAD = 1024   # 1000 padded to a multiple of the 128-lane vreg width


def _round_up(n, m):
    return ((n + m - 1) // m) * m


def _encoder_kernel(x_ref, w1_ref, b1_ref, w2_ref, b2_ref, w3_ref, b3_ref, o_ref):
    # Layer 1: cast activations to bf16 in-kernel (no wrapper pad/cast pass),
    # bf16 MXU matmul with f32 accumulation, bias-add + ReLU in f32.
    x = x_ref[...].astype(jnp.bfloat16)
    h = jnp.dot(x, w1_ref[...], preferred_element_type=jnp.float32)
    h = jnp.maximum(h + b1_ref[...], 0.0)              # Dropout(eval) == identity
    # Layer 2: Linear + Dropout(eval)==id + ReLU
    h = jnp.dot(h.astype(jnp.bfloat16), w2_ref[...], preferred_element_type=jnp.float32)
    h = jnp.maximum(h + b2_ref[...], 0.0)              # Dropout(eval) == identity
    # Layer 3: Linear (no activation)
    out = jnp.dot(h.astype(jnp.bfloat16), w3_ref[...], preferred_element_type=jnp.float32)
    o_ref[...] = (out + b3_ref[...]).astype(o_ref.dtype)


def prepare_params(params):
    """Pad only the hidden dims (1000 -> 1024) and cast weights to bf16 (done once).

    K (in_nodes) and N (latent_nodes) are kept unpadded; Mosaic handles the
    non-128 contraction / output dims internally.
    """
    w1, b1, w2, b2, w3, b3 = params
    in_nodes = w1.shape[0]
    latent_nodes = w3.shape[1]

    def pad2(a, shape, dtype):
        a = a if a.ndim == 2 else a.reshape(1, -1)
        out = jnp.zeros(shape, dtype)
        return out.at[: a.shape[0], : a.shape[1]].set(a.astype(dtype))

    return dict(
        w1=pad2(w1, (in_nodes, HIDDEN_PAD), jnp.bfloat16),     # K unpadded
        b1=pad2(b1, (1, HIDDEN_PAD), jnp.float32),
        w2=pad2(w2, (HIDDEN_PAD, HIDDEN_PAD), jnp.bfloat16),
        b2=pad2(b2, (1, HIDDEN_PAD), jnp.float32),
        w3=pad2(w3, (HIDDEN_PAD, latent_nodes), jnp.bfloat16),  # N unpadded
        b3=pad2(b3, (1, latent_nodes), jnp.float32),
        in_nodes=in_nodes, latent_nodes=latent_nodes,
    )


def encoder_forward(x, prepped, *, batch_tile=None):
    """Run the 3-layer MLP encoder as a single Pallas kernel, tiled over batch."""
    B, in_nodes = x.shape
    assert in_nodes == prepped["in_nodes"], (in_nodes, prepped["in_nodes"])
    latent_nodes = prepped["latent_nodes"]

    if batch_tile is None:
        # >=2 grid steps whenever B > 8 so both v7x TensorCores get a tile;
        # cap at 512 rows: fills the MXU M dim, keeps per-step overhead small
        # on v6e/v5e, and keeps VMEM use to a few MiB on every generation.
        half = _round_up(-(-B // 2), 8)
        batch_tile = min(512, max(8, half))
    tb = max(8, _round_up(batch_tile, 8))
    b_pad = _round_up(B, tb)
    grid = (b_pad // tb,)

    # Only the batch dim is (optionally) zero-padded; x stays f32 and is cast
    # to bf16 inside the kernel -- no separate wrapper pad+cast HBM pass.
    x_p = x if b_pad == B else jnp.pad(x, ((0, b_pad - B), (0, 0)))

    w1, b1, w2, b2, w3, b3 = (prepped[k] for k in ("w1", "b1", "w2", "b2", "w3", "b3"))

    # Constant-index operands: single-buffered (double-buffering them is pure
    # VMEM waste since their block never changes).
    const = lambda shape: pl.BlockSpec(shape, lambda i: (0, 0),
                                       pipeline_mode=pl.Buffered(1))

    flops = 2 * b_pad * (in_nodes * HIDDEN_PAD + HIDDEN_PAD * HIDDEN_PAD
                         + HIDDEN_PAD * latent_nodes)
    bytes_accessed = (x_p.size * x_p.dtype.itemsize          # f32 activations in
                      + (w1.size + w2.size + w3.size) * 2    # bf16 weights
                      + (b1.size + b2.size + b3.size) * 4    # f32 biases
                      + b_pad * latent_nodes * 4)            # f32 output

    # VMEM footprint: resident weights (single-buffered) + double-buffered
    # x/out tiles + f32 intermediate h; 2x margin, clamped to [16, 32] MiB.
    resident = ((w1.size + w2.size + w3.size) * 2
                + (b1.size + b2.size + b3.size) * 4
                + 2 * tb * in_nodes * x_p.dtype.itemsize
                + 2 * tb * latent_nodes * 4
                + 2 * tb * HIDDEN_PAD * 4)
    vmem_limit = int(min(32 << 20, max(16 << 20, 2 * resident)))

    out = pl.pallas_call(
        _encoder_kernel,
        out_shape=jax.ShapeDtypeStruct((b_pad, latent_nodes), jnp.float32),
        grid_spec=pltpu.PrefetchScalarGridSpec(
            num_scalar_prefetch=0,
            grid=grid,
            in_specs=[
                pl.BlockSpec((tb, in_nodes), lambda i: (i, 0)),  # x tile (double-buffered)
                const((in_nodes, HIDDEN_PAD)),                   # W1
                const((1, HIDDEN_PAD)),                          # b1
                const((HIDDEN_PAD, HIDDEN_PAD)),                 # W2
                const((1, HIDDEN_PAD)),                          # b2
                const((HIDDEN_PAD, latent_nodes)),               # W3
                const((1, latent_nodes)),                        # b3
            ],
            out_specs=pl.BlockSpec((tb, latent_nodes), lambda i: (i, 0)),
        ),
        compiler_params=pltpu.CompilerParams(
            dimension_semantics=("parallel",),
            vmem_limit_bytes=vmem_limit,
        ),
        cost_estimate=pl.CostEstimate(
            flops=flops, transcendentals=0, bytes_accessed=bytes_accessed),
    )(x_p, w1, b1, w2, b2, w3, b3)

    return out if b_pad == B else out[:B]


def init_params(key, in_nodes, latent_nodes, dtype=jnp.float32):
    """Deterministic synthetic parameter init (PyTorch-Linear-like uniform fan-in)."""
    ks = jax.random.split(key, 6)

    def lin(kw, kb, fan_in, fan_out):
        bound = 1.0 / jnp.sqrt(fan_in)
        w = jax.random.uniform(kw, (fan_in, fan_out), dtype, -bound, bound)
        b = jax.random.uniform(kb, (1, fan_out), dtype, -bound, bound)
        return w, b

    w1, b1 = lin(ks[0], ks[1], in_nodes, HIDDEN)
    w2, b2 = lin(ks[2], ks[3], HIDDEN, HIDDEN)
    w3, b3 = lin(ks[4], ks[5], HIDDEN, latent_nodes)
    return (w1, b1, w2, b2, w3, b3)


def encoder_ref_f32(x, params):
    """Pure-JAX f32 reference (eval-mode dropout == identity)."""
    w1, b1, w2, b2, w3, b3 = params
    h = jnp.maximum(x @ w1 + b1, 0.0)
    h = jnp.maximum(h @ w2 + b2, 0.0)
    return h @ w3 + b3


def encoder_ref_bf16(x, params):
    """Pure-JAX reference mirroring the kernel numerics: bf16 operands, f32 accumulate."""
    w1, b1, w2, b2, w3, b3 = params
    bf = jnp.bfloat16
    h = jnp.dot(x.astype(bf), w1.astype(bf), preferred_element_type=jnp.float32)
    h = jnp.maximum(h + b1, 0.0)
    h = jnp.dot(h.astype(bf), w2.astype(bf), preferred_element_type=jnp.float32)
    h = jnp.maximum(h + b2, 0.0)
    return jnp.dot(h.astype(bf), w3.astype(bf), preferred_element_type=jnp.float32) + b3


if __name__ == "__main__":
    key = jax.random.PRNGKey(0)
    k_x, k_p = jax.random.split(key)

    batch, in_nodes, latent_nodes = 8, 32, 16
    x = jax.random.normal(k_x, (batch, in_nodes), dtype=jnp.float32)
    params = init_params(k_p, in_nodes, latent_nodes)
    prepped = prepare_params(params)

    out = encoder_forward(x, prepped)
    out = jax.block_until_ready(out)
    assert out.shape == (batch, latent_nodes), out.shape

    # Exact-numerics check against a reference using the same bf16/f32 recipe.
    ref16 = encoder_ref_bf16(x, params)
    err16 = float(jnp.max(jnp.abs(out - ref16)))
    assert jnp.allclose(out, ref16, atol=2e-3, rtol=2e-3), err16

    # Sanity check against the pure-f32 reference (bf16 cast error tolerance).
    ref32 = encoder_ref_f32(x, params)
    err32 = float(jnp.max(jnp.abs(out - ref32)))
    assert jnp.allclose(out, ref32, atol=1e-1, rtol=1e-1), err32

    print("KERNEL_OK")
</pallas_src>

<mosaic_0001>
module attributes {stable_mosaic.version = 11 : i64} {
  func.func @_encoder_kernel(%arg0: i32, %arg1: memref<8x32xf32, #tpu.memory_space<vmem>>, %arg2: memref<32x1024xbf16, #tpu.memory_space<vmem>>, %arg3: memref<1x1024xf32, #tpu.memory_space<vmem>>, %arg4: memref<1024x1024xbf16, #tpu.memory_space<vmem>>, %arg5: memref<1x1024xf32, #tpu.memory_space<vmem>>, %arg6: memref<1024x16xbf16, #tpu.memory_space<vmem>>, %arg7: memref<1x16xf32, #tpu.memory_space<vmem>>, %arg8: memref<8x16xf32, #tpu.memory_space<vmem>>) attributes {dimension_semantics = [#tpu.dimension_semantics<parallel>], iteration_bounds = array<i64: 1>, scalar_prefetch = 0 : i64, scratch_operands = 0 : i64, tpu.core_type = #tpu.core_type<tc>, window_params = [{transform_indices = @transform_0, window_bounds = array<i64: 8, 32>}, {pipeline_mode = #tpu.pipeline_mode<synchronous>, transform_indices = @transform_1, window_bounds = array<i64: 32, 1024>}, {pipeline_mode = #tpu.pipeline_mode<synchronous>, transform_indices = @transform_2, window_bounds = array<i64: 1, 1024>}, {pipeline_mode = #tpu.pipeline_mode<synchronous>, transform_indices = @transform_3, window_bounds = array<i64: 1024, 1024>}, {pipeline_mode = #tpu.pipeline_mode<synchronous>, transform_indices = @transform_4, window_bounds = array<i64: 1, 1024>}, {pipeline_mode = #tpu.pipeline_mode<synchronous>, transform_indices = @transform_5, window_bounds = array<i64: 1024, 16>}, {pipeline_mode = #tpu.pipeline_mode<synchronous>, transform_indices = @transform_6, window_bounds = array<i64: 1, 16>}, {transform_indices = @transform_7, window_bounds = array<i64: 8, 16>}]} {
    %c0 = arith.constant 0 : index
    %c0_0 = arith.constant 0 : index
    %0 = vector.load %arg1[%c0, %c0_0] : memref<8x32xf32, #tpu.memory_space<vmem>>, vector<8x32xf32>
    %1 = arith.truncf %0 : vector<8x32xf32> to vector<8x32xbf16>
    %c0_1 = arith.constant 0 : index
    %c0_2 = arith.constant 0 : index
    %2 = vector.load %arg2[%c0_1, %c0_2] : memref<32x1024xbf16, #tpu.memory_space<vmem>>, vector<32x1024xbf16>
    %cst = arith.constant dense<0.000000e+00> : vector<8x1024xf32>
    %3 = tpu.matmul %1, %2, %cst {dimension_numbers = #tpu.dot_dimension_numbers<[1], [0], [0], [1], [0, 0, 1, 1], [], []>} : vector<8x32xbf16>, vector<32x1024xbf16>, vector<8x1024xf32> -> vector<8x1024xf32>
    %c0_3 = arith.constant 0 : index
    %c0_4 = arith.constant 0 : index
    %4 = vector.load %arg3[%c0_3, %c0_4] : memref<1x1024xf32, #tpu.memory_space<vmem>>, vector<1x1024xf32>
    %5 = vector.broadcast %4 : vector<1x1024xf32> to vector<8x1024xf32>
    %6 = arith.addf %3, %5 : vector<8x1024xf32>
    %cst_5 = arith.constant 0.000000e+00 : f32
    %7 = vector.broadcast %cst_5 : f32 to vector<8x1024xf32>
    %8 = arith.maximumf %6, %7 : vector<8x1024xf32>
    %9 = arith.truncf %8 : vector<8x1024xf32> to vector<8x1024xbf16>
    %c0_6 = arith.constant 0 : index
    %c0_7 = arith.constant 0 : index
    %10 = vector.load %arg4[%c0_6, %c0_7] : memref<1024x1024xbf16, #tpu.memory_space<vmem>>, vector<1024x1024xbf16>
    %cst_8 = arith.constant dense<0.000000e+00> : vector<8x1024xf32>
    %11 = tpu.matmul %9, %10, %cst_8 {dimension_numbers = #tpu.dot_dimension_numbers<[1], [0], [0], [1], [0, 0, 1, 1], [], []>} : vector<8x1024xbf16>, vector<1024x1024xbf16>, vector<8x1024xf32> -> vector<8x1024xf32>
    %c0_9 = arith.constant 0 : index
    %c0_10 = arith.constant 0 : index
    %12 = vector.load %arg5[%c0_9, %c0_10] : memref<1x1024xf32, #tpu.memory_space<vmem>>, vector<1x1024xf32>
    %13 = vector.broadcast %12 : vector<1x1024xf32> to vector<8x1024xf32>
    %14 = arith.addf %11, %13 : vector<8x1024xf32>
    %cst_11 = arith.constant 0.000000e+00 : f32
    %15 = vector.broadcast %cst_11 : f32 to vector<8x1024xf32>
    %16 = arith.maximumf %14, %15 : vector<8x1024xf32>
    %17 = arith.truncf %16 : vector<8x1024xf32> to vector<8x1024xbf16>
    %c0_12 = arith.constant 0 : index
    %c0_13 = arith.constant 0 : index
    %18 = vector.load %arg6[%c0_12, %c0_13] : memref<1024x16xbf16, #tpu.memory_space<vmem>>, vector<1024x16xbf16>
    %cst_14 = arith.constant dense<0.000000e+00> : vector<8x16xf32>
    %19 = tpu.matmul %17, %18, %cst_14 {dimension_numbers = #tpu.dot_dimension_numbers<[1], [0], [0], [1], [0, 0, 1, 1], [], []>} : vector<8x1024xbf16>, vector<1024x16xbf16>, vector<8x16xf32> -> vector<8x16xf32>
    %c0_15 = arith.constant 0 : index
    %c0_16 = arith.constant 0 : index
    %20 = vector.load %arg7[%c0_15, %c0_16] : memref<1x16xf32, #tpu.memory_space<vmem>>, vector<1x16xf32>
    %21 = vector.broadcast %20 : vector<1x16xf32> to vector<8x16xf32>
    %22 = arith.addf %19, %21 : vector<8x16xf32>
    %c0_17 = arith.constant 0 : index
    %c0_18 = arith.constant 0 : index
    %23 = vector.load %arg8[%c0_17, %c0_18] : memref<8x16xf32, #tpu.memory_space<vmem>>, vector<8x16xf32>
    tpu.vector_store %arg8[%c0_17, %c0_18], %22 {strides = array<i32>} : memref<8x16xf32, #tpu.memory_space<vmem>>, vector<8x16xf32>,
    return
  }
  func.func @transform_0(%arg0: i32) -> (i32, i32) {
    %c0_i32 = arith.constant 0 : i32
    %c0_i32_0 = arith.constant 0 : i32
    return %arg0, %c0_i32 : i32, i32
  }
  func.func @transform_1(%arg0: i32) -> (i32, i32) {
    %c0_i32 = arith.constant 0 : i32
    %c0_i32_0 = arith.constant 0 : i32
    %c0_i32_1 = arith.constant 0 : i32
    return %c0_i32, %c0_i32_0 : i32, i32
  }
  func.func @transform_2(%arg0: i32) -> (i32, i32) {
    %c0_i32 = arith.constant 0 : i32
    %c0_i32_0 = arith.constant 0 : i32
    %c0_i32_1 = arith.constant 0 : i32
    return %c0_i32, %c0_i32_0 : i32, i32
  }
  func.func @transform_3(%arg0: i32) -> (i32, i32) {
    %c0_i32 = arith.constant 0 : i32
    %c0_i32_0 = arith.constant 0 : i32
    %c0_i32_1 = arith.constant 0 : i32
    return %c0_i32, %c0_i32_0 : i32, i32
  }
  func.func @transform_4(%arg0: i32) -> (i32, i32) {
    %c0_i32 = arith.constant 0 : i32
    %c0_i32_0 = arith.constant 0 : i32
    %c0_i32_1 = arith.constant 0 : i32
    return %c0_i32, %c0_i32_0 : i32, i32
  }
  func.func @transform_5(%arg0: i32) -> (i32, i32) {
    %c0_i32 = arith.constant 0 : i32
    %c0_i32_0 = arith.constant 0 : i32
    %c0_i32_1 = arith.constant 0 : i32
    return %c0_i32, %c0_i32_0 : i32, i32
  }
  func.func @transform_6(%arg0: i32) -> (i32, i32) {
    %c0_i32 = arith.constant 0 : i32
    %c0_i32_0 = arith.constant 0 : i32
    %c0_i32_1 = arith.constant 0 : i32
    return %c0_i32, %c0_i32_0 : i32, i32
  }
  func.func @transform_7(%arg0: i32) -> (i32, i32) {
    %c0_i32 = arith.constant 0 : i32
    %c0_i32_0 = arith.constant 0 : i32
    return %arg0, %c0_i32 : i32, i32
  }
}

</mosaic_0001>

<bundles_post_ra>
// kernel: tpu_custom_call.1
= control target key start
LH: loop header
LB: loop body
LE: loop exit
PB: predicated region body
PF: predicated region fallthrough
CT: control target
= control target key end

     0   :  { %12 = vsyncpa [#allocation3], 0  ;;  %s6357_s0 = inlined_call_operand.hbm [shape: f32[8,32], index: 0, kind: input, shape index: {}]   ;;  %s6358_s1 = inlined_call_operand.hbm [shape: bf16[32,1024], index: 1, kind: input, shape index: {}]   ;;  %s6359_s2 = inlined_call_operand.hbm [shape: f32[1,1024], index: 2, kind: input, shape index: {}]   ;;  %s6360_s3 = inlined_call_operand.hbm [shape: bf16[1024,1024], index: 3, kind: input, shape index: {}]   ;;  %s6361_s4 = inlined_call_operand.hbm [shape: f32[1,1024], index: 4, kind: input, shape index: {}]   ;;  %s6362_s5 = inlined_call_operand.vmem [shape: bf16[1024,16], index: 5, kind: input, shape index: {}]   ;;  %s6363_s6 = inlined_call_operand.hbm [shape: f32[1,16], index: 6, kind: input, shape index: {}]   ;;  %s6364_s7 = inlined_call_operand.hbm [shape: f32[8,16], index: 7, kind: output, shape index: {}]  }
   0x1   :  { %13 = vsyncpa [#allocation6], 0 }
   0x2   :  { %14 = vsyncpa [#allocation9], 0 }
   0x3   :  { %15 = vsyncpa [#allocation12], 0 }
   0x4   :  { %16 = vsyncpa [#allocation4], 0  ;;  %s5891_s24 = smov [#allocation5]   ;;  %s5727_s28 = scalar_lea.hbm %s6358_s1, 2048 }
   0x5   :  { %s32_s25 = sshll.u32 %s5891_s24, 4  ;;  %p5728_p0 = scmp.ne.s32.totalorder %s6358_s1, %s5727_s28  ;;  %s33_s25 = int_to_ptr.vmem [resolvable:$true] %s32_s25 }
   0x6   :  { %p5731_p1 = scmp.lt.u32.totalorder %s5727_s28, %s6358_s1 }
   0x8   :  { %p5733_p2 = pnand %p5731_p1, %p5728_p0 }
   0xa   :  { %5736 = shalt.err (!%p5733_p2)
}
   0xb   :  { %s5737_s10 = scalar_lea.vmem %s33_s25, 2048  ;;  %p5742_p4 = scmp.lt.s32.totalorder %s33_s25, %s33_s25 }
   0xc   :  { %p5738_p3 = scmp.ne.s32.totalorder %s33_s25, %s5737_s10  ;;  %p5743_p5 = scmp.lt.s32.totalorder %s5737_s10, %s5737_s10 }
   0xe   :  { %p5744_p6 = por %p5743_p5, %p5742_p4 }
  0x10   :  { %p5745_p7 = pnand %p5744_p6, %p5738_p3 }
  0x12   :  { %5748 = shalt.err (!%p5745_p7)
}
  0x13   :  { %s5892_s11 = smov 512   ;;  %s5893_s12 = smov 32  }
  0x14   :  { %38 = dma.hbm_to_vmem [thread:$0]  %s6358_s1, 2048, %s33_s25, [#allocation6], %s5892_s11, %s5892_s11, %s5893_s12  }
  0x15   :  { %s5894_s15 = smov [#allocation8]   ;;  %s5895_s17 = smov [#allocation2]  }
  0x16   :  { %s54_s16 = sshll.u32 %s5894_s15, 4  ;;  %s23_s18 = sshll.u32 %s5895_s17, 4  ;;  %s55_s16 = int_to_ptr.vmem [resolvable:$true] %s54_s16  ;;  %s24_s18 = int_to_ptr.vmem [resolvable:$true] %s23_s18 }
  0x17   :  { %s5749_s21 = scalar_lea.hbm %s6360_s3, 65536 }
  0x18   :  { %p5750_p8 = scmp.ne.s32.totalorder %s6360_s3, %s5749_s21  ;;  %p5753_p9 = scmp.lt.u32.totalorder %s5749_s21, %s6360_s3 }
  0x1a   :  { %p5755_p10 = pnand %p5753_p9, %p5750_p8 }
  0x1c   :  { %5758 = shalt.err (!%p5755_p10)
}
  0x1d   :  { %s5759_s1 = scalar_lea.vmem %s55_s16, 65536  ;;  %p5764_p12 = scmp.lt.s32.totalorder %s55_s16, %s55_s16 }
  0x1e   :  { %p5760_p11 = scmp.ne.s32.totalorder %s55_s16, %s5759_s1  ;;  %p5765_p13 = scmp.lt.s32.totalorder %s5759_s1, %s5759_s1 }
  0x20   :  { %p5766_p0 = por %p5765_p13, %p5764_p12 }
  0x22   :  { %p5767_p1 = pnand %p5766_p0, %p5760_p11 }
  0x24   :  { %5770 = shalt.err (!%p5767_p1)
}
  0x25   :  { %60 = dma.hbm_to_vmem [thread:$0]  %s6360_s3, 65536, %s55_s16, [#allocation9], %s5892_s11, %s5892_s11, %s5893_s12  }
  0x26   :  { %s5771_s30 = scalar_lea.hbm %s6357_s0, 128 }
  0x27   :  { %p5772_p2 = scmp.ne.s32.totalorder %s6357_s0, %s5771_s30  ;;  %p5775_p3 = scmp.lt.u32.totalorder %s5771_s30, %s6357_s0 }
  0x29   :  { %p5777_p4 = pnand %p5775_p3, %p5772_p2 }
  0x2b   :  { %5780 = shalt.err (!%p5777_p4)
}
  0x2c   :  { %s5781_s14 = scalar_lea.vmem %s24_s18, 128  ;;  %p5786_p6 = scmp.lt.s32.totalorder %s24_s18, %s24_s18 }
  0x2d   :  { %p5782_p5 = scmp.ne.s32.totalorder %s24_s18, %s5781_s14  ;;  %p5787_p7 = scmp.lt.s32.totalorder %s5781_s14, %s5781_s14 }
  0x2f   :  { %p5788_p8 = por %p5787_p7, %p5786_p6 }
  0x31   :  { %p5789_p9 = pnand %p5788_p8, %p5782_p5 }
  0x33   :  { %5792 = shalt.err (!%p5789_p9)
}
  0x34   :  { %26 = dma.hbm_to_vmem [thread:$0]  %s6357_s0, 128, %s24_s18, [#allocation3]  }
  0x35   :  { %s5896_s12 = smov [#allocation7]   ;;  %s5897_s16 = smov [#allocation10]  }
  0x36   :  { %s45_s15 = sshll.u32 %s5896_s12, 4  ;;  %s67_s17 = sshll.u32 %s5897_s16, 4  ;;  %s46_s15 = int_to_ptr.vmem [resolvable:$true] %s45_s15  ;;  %s68_s17 = int_to_ptr.vmem [resolvable:$true] %s67_s17 }
  0x37   :  { %s5793_s21 = scalar_lea.hbm %s6359_s2, 128 }
  0x38   :  { %p5794_p10 = scmp.ne.s32.totalorder %s6359_s2, %s5793_s21  ;;  %p5797_p11 = scmp.lt.u32.totalorder %s5793_s21, %s6359_s2 }
  0x3a   :  { %p5799_p12 = pnand %p5797_p11, %p5794_p10 }
  0x3c   :  { %5802 = shalt.err (!%p5799_p12)
}
  0x3d   :  { %s5803_s0 = scalar_lea.vmem %s46_s15, 128  ;;  %p5808_p0 = scmp.lt.s32.totalorder %s46_s15, %s46_s15 }
  0x3e   :  { %p5804_p13 = scmp.ne.s32.totalorder %s46_s15, %s5803_s0  ;;  %p5809_p1 = scmp.lt.s32.totalorder %s5803_s0, %s5803_s0 }
  0x40   :  { %p5810_p2 = por %p5809_p1, %p5808_p0 }
  0x42   :  { %p5811_p3 = pnand %p5810_p2, %p5804_p13 }
  0x44   :  { %5814 = shalt.err (!%p5811_p3)
}
  0x45   :  { %48 = dma.hbm_to_vmem [thread:$0]  %s6359_s2, 128, %s46_s15, [#allocation6]  }
  0x46   :  { %s5815_s28 = scalar_lea.hbm %s6361_s4, 128 }
  0x47   :  { %p5816_p4 = scmp.ne.s32.totalorder %s6361_s4, %s5815_s28  ;;  %p5819_p5 = scmp.lt.u32.totalorder %s5815_s28, %s6361_s4 }
  0x49   :  { %p5821_p6 = pnand %p5819_p5, %p5816_p4 }
  0x4b   :  { %5824 = shalt.err (!%p5821_p6)
}
  0x4c   :  { %s5825_s10 = scalar_lea.vmem %s68_s17, 128  ;;  %p5830_p8 = scmp.lt.s32.totalorder %s68_s17, %s68_s17 }
  0x4d   :  { %p5826_p7 = scmp.ne.s32.totalorder %s68_s17, %s5825_s10  ;;  %p5831_p9 = scmp.lt.s32.totalorder %s5825_s10, %s5825_s10 }
  0x4f   :  { %p5832_p10 = por %p5831_p9, %p5830_p8 }
  0x51   :  { %p5833_p11 = pnand %p5832_p10, %p5826_p7 }
  0x53   :  { %5836 = shalt.err (!%p5833_p11)
}
  0x54   :  { %70 = dma.hbm_to_vmem [thread:$0]  %s6361_s4, 128, %s68_s17, [#allocation9]  }
  0x55   :  { %s5898_s14 = smov [#allocation11]   ;;  %s5837_s15 = scalar_lea.hbm %s6363_s6, 16 }
  0x56   :  { %s79_s3 = sshll.u32 %s5898_s14, 4  ;;  %p5838_p12 = scmp.ne.s32.totalorder %s6363_s6, %s5837_s15  ;;  %s80_s3 = int_to_ptr.vmem [resolvable:$true] %s79_s3 }
  0x57   :  { %p5841_p13 = scmp.lt.u32.totalorder %s5837_s15, %s6363_s6 }
  0x59   :  { %p5843_p0 = pnand %p5841_p13, %p5838_p12 }
  0x5b   :  { %5846 = shalt.err (!%p5843_p0)
}
  0x5c   :  { %s5847_s22 = scalar_lea.vmem %s80_s3, 16  ;;  %s5851_s4 = scalar_lea.vmem %s80_s3, 32 }
  0x5d   :  { %p5848_p1 = scmp.ne.s32.totalorder %s80_s3, %s5847_s22  ;;  %p5852_p2 = scmp.lt.s32.totalorder %s80_s3, %s80_s3 }
  0x5e   :  { %p5853_p3 = scmp.lt.s32.totalorder %s5851_s4, %s5847_s22 }
  0x60   :  { %p5854_p4 = por %p5853_p3, %p5852_p2 }
  0x62   :  { %p5855_p5 = pnand %p5854_p4, %p5848_p1 }
  0x64   :  { %5858 = shalt.err (!%p5855_p5)
}
  0x65   :  { %82 = dma.hbm_to_vmem [thread:$0]  %s6363_s6, 16, %s80_s3, [#allocation12]  }
  0x66   :  { %5881 = dma.done.wait [#allocation3], 128  }
  0x67   :  { %5882 = vsyncadd [#allocation3], 4294967168 }
  0x68   :  { %5883 = dma.done.wait [#allocation6], 2176  }
  0x69   :  { %5884 = vsyncadd [#allocation6], 4294965120 }
  0x6a   :  { %5885 = dma.done.wait [#allocation9], 65664  }
  0x6b   :  { %5886 = vsyncadd [#allocation9], 4294901632 }
  0x6c   :  { %5887 = dma.done.wait [#allocation12], 16  }
  0x6d   :  { %5888 = vsyncadd [#allocation12], 4294967280  ;;  %v5899_v0 = vmov 0   ;;  %v104_v1 = vld [vmem:[#allocation5] sm:$0xff]  ;;  %v105_v7 = vld [vmem:[#allocation5 + $0x8] sm:$0xff]  ;;  %vm242_vm0 = vcmask 261120  }
  0x6e   :  { %278 = vmatprep.mubr.bf16.mxu0 %v5899_v0  ;;  %319 = vmatprep.mubr.bf16.mxu1 %v5899_v0  ;;  %v108_v2 = vld [vmem:[#allocation5 + $0x20] sm:$0xff]  ;;  %v109_v9 = vld [vmem:[#allocation5 + $0x28] sm:$0xff]  ;;  %v106_v15 = vld [vmem:[#allocation5 + $0x10] sm:$0xff]  ;;  %vm4891_vm1 = vcmask 130048  }
  0x6f   :  { %v112_v3 = vld [vmem:[#allocation5 + $0x40] sm:$0xff]  ;;  %v4912_v4 = vcombine.high %v104_v1, %v108_v2  ;;  %v4911_v5 = vcombine.low %v104_v1, %v108_v2  ;;  %v113_v10 = vld [vmem:[#allocation5 + $0x48] sm:$0xff]  ;;  %v4914_v12 = vcombine.high %v105_v7, %v109_v9  ;;  %v4913_v13 = vcombine.low %v105_v7, %v109_v9  ;;  %v110_v16 = vld [vmem:[#allocation5 + $0x30] sm:$0xff] }
  0x70   :  { %v116_v6 = vld [vmem:[#allocation5 + $0x60] sm:$0xff]  ;;  %v117_v11 = vld [vmem:[#allocation5 + $0x68] sm:$0xff]  ;;  %v102_v18 = vld [vmem:[#allocation2] sm:$0xff]  ;;  %v4916_v21 = vcombine.high %v106_v15, %v110_v16  ;;  %v4915_v27 = vcombine.low %v106_v15, %v110_v16 }
  0x71   :  { %v4920_v8 = vcombine.high %v112_v3, %v116_v6  ;;  %246 = vmatprep.subr.bf16.mxu0 %v4912_v4  ;;  %v4922_v14 = vcombine.high %v113_v10, %v117_v11  ;;  %v4919_v17 = vcombine.low %v112_v3, %v116_v6  ;;  %v107_v19 = vld [vmem:[#allocation5 + $0x18] sm:$0xff]  ;;  %287 = vmatprep.subr.bf16.mxu1 %v4914_v12  ;;  %v114_v23 = vld [vmem:[#allocation5 + $0x50] sm:$0xff]  ;;  %v426_v32 = vld [vmem:[#allocation8] sm:$0xff] }
  0x72   :  { %247 = vmatpush1.bf16.msra.mxu0 %v4911_v5  ;;  %v111_v20 = vld [vmem:[#allocation5 + $0x38] sm:$0xff]  ;;  %288 = vmatpush1.bf16.msra.mxu1 %v4913_v13  ;;  %v4921_v22 = vcombine.low %v113_v10, %v117_v11  ;;  %v118_v24 = vld [vmem:[#allocation5 + $0x70] sm:$0xff]  ;;  %v103_v25 = vpack.c.bf16 %v102_v18, %v102_v18  ;;  %v430_v33 = vld [vmem:[#allocation8 + $0x20] sm:$0xff] }
  0x73   :  { %248 = vmatprep.subr.bf16.mxu0 %v4920_v8  ;;  %289 = vmatprep.subr.bf16.mxu1 %v4922_v14  ;;  %v4918_v26 = vcombine.high %v107_v19, %v111_v20  ;;  %v115_v28 = vld [vmem:[#allocation5 + $0x58] sm:$0xff]  ;;  %v4924_v30 = vcombine.high %v114_v23, %v118_v24  ;;  %v4917_v31 = vcombine.low %v107_v19, %v111_v20  ;;  %v427_v36 = vld [vmem:[#allocation8 + $0x8] sm:$0xff]  ;;  %v434_v40 = vld [vmem:[#allocation8 + $0x40] sm:$0xff] }
  0x74   :  { %v119_v29 = vld [vmem:[#allocation5 + $0x78] sm:$0xff]  ;;  %v4923_v35 = vcombine.low %v114_v23, %v118_v24  ;;  %v431_v37 = vld [vmem:[#allocation8 + $0x28] sm:$0xff]  ;;  %v4932_v38 = vcombine.high %v426_v32, %v430_v33  ;;  %v438_v41 = vld [vmem:[#allocation8 + $0x60] sm:$0xff]  ;;  %v4931_v43 = vcombine.low %v426_v32, %v430_v33 }
  0x75   :  { %v4926_v34 = vcombine.high %v115_v28, %v119_v29  ;;  %v4925_v39 = vcombine.low %v115_v28, %v119_v29  ;;  %v4934_v42 = vcombine.high %v427_v36, %v431_v37  ;;  %v435_v44 = vld [vmem:[#allocation8 + $0x48] sm:$0xff]  ;;  %v4940_v46 = vcombine.high %v434_v40, %v438_v41  ;;  %v442_v48 = vld [vmem:[#allocation8 + $0x80] sm:$0xff] }
  0x76   :  { %249 = vmatpush1.bf16.msra.mxu0 %v4919_v17  ;;  %290 = vmatpush1.bf16.msra.mxu1 %v4921_v22  ;;  %v439_v45 = vld [vmem:[#allocation8 + $0x68] sm:$0xff]  ;;  %v4933_v47 = vcombine.low %v427_v36, %v431_v37  ;;  %v446_v49 = vld [vmem:[#allocation8 + $0xa0] sm:$0xff]  ;;  %v4939_v51 = vcombine.low %v434_v40, %v438_v41 }
  0x77   :  { %328 = vmatprep.subr.bf16.mxu0 %v4916_v21  ;;  %369 = vmatprep.subr.bf16.mxu1 %v4918_v26  ;;  %v4942_v50 = vcombine.high %v435_v44, %v439_v45  ;;  %v443_v52 = vld [vmem:[#allocation8 + $0x88] sm:$0xff]  ;;  %v4948_v54 = vcombine.high %v442_v48, %v446_v49  ;;  %v4941_v55 = vcombine.low %v435_v44, %v439_v45  ;;  %v450_v56 = vld [vmem:[#allocation8 + $0xc0] sm:$0xff] }
  0x78   :  { %v447_v53 = vld [vmem:[#allocation8 + $0xa8] sm:$0xff]  ;;  %v454_v57 = vld [vmem:[#allocation8 + $0xe0] sm:$0xff]  ;;  %v4947_v61 = vcombine.low %v442_v48, %v446_v49 }
  0x79   :  { %4927 = vmatmul.mubr.msk.bf16.vlgmr.msra.gmra.mrb[0].mxu0 %vm242_vm0, %v103_v25  ;;  %4928 = vmatmul.mubr.msk.bf16.vlgmr.msra.gmra.mrb[0].mxu1 %vm242_vm0, %v103_v25  ;;  %v4950_v58 = vcombine.high %v443_v52, %v447_v53  ;;  %v451_v59 = vld [vmem:[#allocation8 + $0xc8] sm:$0xff]  ;;  %v458_v62 = vld [vmem:[#allocation8 + $0x100] sm:$0xff]  ;;  %v4949_v1 = vcombine.low %v443_v52, %v447_v53  ;;  %v4955_v5 = vcombine.low %v450_v56, %v454_v57 }
  0x7a   :  { %329 = vmatpush1.bf16.msra.mxu0 %v4915_v27  ;;  %360 = vmatprep.mubr.bf16.mxu0 %v5899_v0  ;;  %v455_v60 = vld [vmem:[#allocation8 + $0xe8] sm:$0xff]  ;;  %v462_v63 = vld [vmem:[#allocation8 + $0x120] sm:$0xff] }
  0x7b   :  { %330 = vmatprep.subr.bf16.mxu0 %v4924_v30  ;;  %370 = vmatpush1.bf16.msra.mxu1 %v4917_v31  ;;  %v459_v2 = vld [vmem:[#allocation8 + $0x108] sm:$0xff]  ;;  %v4958_v4 = vcombine.high %v451_v59, %v455_v60  ;;  %v466_v6 = vld [vmem:[#allocation8 + $0x140] sm:$0xff]  ;;  %v4964_v8 = vcombine.high %v458_v62, %v462_v63  ;;  %v4957_v9 = vcombine.low %v451_v59, %v455_v60 }
  0x7c   :  { %401 = vmatprep.mubr.bf16.mxu1 %v5899_v0  ;;  %371 = vmatprep.subr.bf16.mxu1 %v4926_v34  ;;  %v4956_v0 = vcombine.high %v450_v56, %v454_v57  ;;  %v463_v3 = vld [vmem:[#allocation8 + $0x128] sm:$0xff]  ;;  %v470_v7 = vld [vmem:[#allocation8 + $0x160] sm:$0xff]  ;;  %v4963_v13 = vcombine.low %v458_v62, %v462_v63 }
  0x7d   :  { %v467_v10 = vld [vmem:[#allocation8 + $0x148] sm:$0xff]  ;;  %v4966_v12 = vcombine.high %v459_v2, %v463_v3  ;;  %v474_v14 = vld [vmem:[#allocation8 + $0x180] sm:$0xff]  ;;  %v4972_v16 = vcombine.high %v466_v6, %v470_v7  ;;  %v4965_v17 = vcombine.low %v459_v2, %v463_v3  ;;  %v4971_v21 = vcombine.low %v466_v6, %v470_v7 }
  0x7e   :  { %331 = vmatpush1.bf16.msra.mxu0 %v4923_v35  ;;  %v471_v11 = vld [vmem:[#allocation8 + $0x168] sm:$0xff]  ;;  %v478_v15 = vld [vmem:[#allocation8 + $0x1a0] sm:$0xff] }
  0x7f   :  { %3540 = vmatprep.subr.bf16.mxu0 %v4932_v38  ;;  %372 = vmatpush1.bf16.msra.mxu1 %v4925_v39  ;;  %v475_v18 = vld [vmem:[#allocation8 + $0x188] sm:$0xff]  ;;  %v4974_v20 = vcombine.high %v467_v10, %v471_v11  ;;  %v482_v22 = vld [vmem:[#allocation8 + $0x1c0] sm:$0xff]  ;;  %v4980_v24 = vcombine.high %v474_v14, %v478_v15  ;;  %v4979_v29 = vcombine.low %v474_v14, %v478_v15 }
  0x80   :  { %3704 = vmatprep.subr.bf16.mxu1 %v4934_v42  ;;  %v479_v19 = vld [vmem:[#allocation8 + $0x1a8] sm:$0xff]  ;;  %v486_v23 = vld [vmem:[#allocation8 + $0x1e0] sm:$0xff] }
  0x81   :  { %4929 = vmatmul.mubr.msk.bf16.vlgmr.msra.gmra.mrb[4].mxu0 %vm242_vm0, %v103_v25  ;;  %v483_v26 = vld [vmem:[#allocation8 + $0x1c8] sm:$0xff]  ;;  %v4982_v28 = vcombine.high %v475_v18, %v479_v19  ;;  %v490_v30 = vld [vmem:[#allocation8 + $0x200] sm:$0xff]  ;;  %v4988_v32 = vcombine.high %v482_v22, %v486_v23  ;;  %v4981_v33 = vcombine.low %v475_v18, %v479_v19  ;;  %v4987_v37 = vcombine.low %v482_v22, %v486_v23 }
  0x82   :  { %3541 = vmatpush1.bf16.msra.mxu0 %v4931_v43  ;;  %4930 = vmatmul.mubr.msk.bf16.vlgmr.msra.gmra.mrb[4].mxu1 %vm242_vm0, %v103_v25  ;;  %v4973_v25 = vcombine.low %v467_v10, %v471_v11  ;;  %v487_v27 = vld [vmem:[#allocation8 + $0x1e8] sm:$0xff]  ;;  %v494_v31 = vld [vmem:[#allocation8 + $0x220] sm:$0xff] }
  0x83   :  { %3542 = vmatprep.subr.bf16.mxu0 %v4940_v46  ;;  %3705 = vmatpush1.bf16.msra.mxu1 %v4933_v47  ;;  %v491_v34 = vld [vmem:[#allocation8 + $0x208] sm:$0xff]  ;;  %v4990_v36 = vcombine.high %v483_v26, %v487_v27  ;;  %v498_v38 = vld [vmem:[#allocation8 + $0x240] sm:$0xff]  ;;  %v4996_v40 = vcombine.high %v490_v30, %v494_v31  ;;  %v4989_v41 = vcombine.low %v483_v26, %v487_v27 }
  0x84   :  { %3706 = vmatprep.subr.bf16.mxu1 %v4942_v50  ;;  %v495_v35 = vld [vmem:[#allocation8 + $0x228] sm:$0xff]  ;;  %v502_v39 = vld [vmem:[#allocation8 + $0x260] sm:$0xff]  ;;  %v4995_v45 = vcombine.low %v490_v30, %v494_v31 }
  0x85   :  { %v499_v42 = vld [vmem:[#allocation8 + $0x248] sm:$0xff]  ;;  %v4998_v44 = vcombine.high %v491_v34, %v495_v35  ;;  %v506_v46 = vld [vmem:[#allocation8 + $0x280] sm:$0xff]  ;;  %v5004_v48 = vcombine.high %v498_v38, %v502_v39  ;;  %v4997_v49 = vcombine.low %v491_v34, %v495_v35  ;;  %v5003_v53 = vcombine.low %v498_v38, %v502_v39 }
  0x86   :  { %3543 = vmatpush1.bf16.msra.mxu0 %v4939_v51  ;;  %v503_v43 = vld [vmem:[#allocation8 + $0x268] sm:$0xff]  ;;  %v510_v47 = vld [vmem:[#allocation8 + $0x2a0] sm:$0xff] }
  0x87   :  { %3544 = vmatprep.subr.bf16.mxu0 %v4948_v54  ;;  %3707 = vmatpush1.bf16.msra.mxu1 %v4941_v55  ;;  %v507_v50 = vld [vmem:[#allocation8 + $0x288] sm:$0xff]  ;;  %v5006_v52 = vcombine.high %v499_v42, %v503_v43  ;;  %v514_v54 = vld [vmem:[#allocation8 + $0x2c0] sm:$0xff]  ;;  %v5012_v56 = vcombine.high %v506_v46, %v510_v47  ;;  %v5005_v57 = vcombine.low %v499_v42, %v503_v43  ;;  %v122_v43 = vlaneseq }
  0x88   :  { %3708 = vmatprep.subr.bf16.mxu1 %v4950_v58  ;;  %v511_v51 = vld [vmem:[#allocation8 + $0x2a8] sm:$0xff]  ;;  %v518_v55 = vld [vmem:[#allocation8 + $0x2e0] sm:$0xff] }
  0x89   :  { %v515_v58 = vld [vmem:[#allocation8 + $0x2c8] sm:$0xff]  ;;  %v5014_v60 = vcombine.high %v507_v50, %v511_v51  ;;  %v522_v62 = vld [vmem:[#allocation8 + $0x300] sm:$0xff] }
  0x8a   :  { %3545 = vmatpush1.bf16.msra.mxu0 %v4947_v61  ;;  %v519_v59 = vld [vmem:[#allocation8 + $0x2e8] sm:$0xff]  ;;  %v5011_v61 = vcombine.low %v506_v46, %v510_v47  ;;  %v526_v63 = vld [vmem:[#allocation8 + $0x320] sm:$0xff]  ;;  %v6020_v46 = vld [vmem:[#allocation7] sm:$0xff] }
  0x8b   :  { %3546 = vmatprep.subr.bf16.mxu0 %v4956_v0  ;;  %3709 = vmatpush1.bf16.msra.mxu1 %v4949_v1  ;;  %v5020_v0 = vcombine.high %v514_v54, %v518_v55  ;;  %v5013_v1 = vcombine.low %v507_v50, %v511_v51  ;;  %v523_v2 = vld [vmem:[#allocation8 + $0x308] sm:$0xff]  ;;  %v530_v6 = vld [vmem:[#allocation8 + $0x340] sm:$0xff] }
  0x8c   :  { %3710 = vmatprep.subr.bf16.mxu1 %v4958_v4  ;;  %v527_v3 = vld [vmem:[#allocation8 + $0x328] sm:$0xff]  ;;  %v5022_v4 = vcombine.high %v515_v58, %v519_v59  ;;  %v534_v7 = vld [vmem:[#allocation8 + $0x360] sm:$0xff] }
  0x8d   :  { %v531_v10 = vld [vmem:[#allocation8 + $0x348] sm:$0xff]  ;;  %v5036_v14 = vcombine.high %v530_v6, %v534_v7  ;;  %v5029_v15 = vcombine.low %v523_v2, %v527_v3  ;;  %v538_v19 = vld [vmem:[#allocation8 + $0x380] sm:$0xff] }
  0x8e   :  { %3547 = vmatpush1.bf16.msra.mxu0 %v4955_v5  ;;  %v5019_v5 = vcombine.low %v514_v54, %v518_v55  ;;  %v535_v11 = vld [vmem:[#allocation8 + $0x368] sm:$0xff]  ;;  %v546_v27 = vld [vmem:[#allocation8 + $0x3c0] sm:$0xff] }
  0x8f   :  { %3548 = vmatprep.subr.bf16.mxu0 %v4964_v8  ;;  %3711 = vmatpush1.bf16.msra.mxu1 %v4957_v9  ;;  %v5028_v8 = vcombine.high %v522_v62, %v526_v63  ;;  %v5021_v9 = vcombine.low %v515_v58, %v519_v59  ;;  %v5037_v18 = vcombine.low %v531_v10, %v535_v11  ;;  %v543_v23 = vld [vmem:[#allocation8 + $0x3a8] sm:$0xff]  ;;  %v554_v35 = vld [vmem:[#allocation8 + $0x400] sm:$0xff] }
  0x90   :  { %3712 = vmatprep.subr.bf16.mxu1 %v4966_v12  ;;  %v5030_v12 = vcombine.high %v523_v2, %v527_v3  ;;  %v551_v31 = vld [vmem:[#allocation8 + $0x3e8] sm:$0xff] }
  0x91   :  { %v559_v39 = vld [vmem:[#allocation8 + $0x428] sm:$0xff] }
  0x92   :  { %3549 = vmatpush1.bf16.msra.mxu0 %v4963_v13  ;;  %v5027_v13 = vcombine.low %v522_v62, %v526_v63  ;;  %v566_v63 = vld [vmem:[#allocation8 + $0x460] sm:$0xff] }
  0x93   :  { %3550 = vmatprep.subr.bf16.mxu0 %v4972_v16  ;;  %3713 = vmatpush1.bf16.msra.mxu1 %v4965_v17  ;;  %v5038_v16 = vcombine.high %v531_v10, %v535_v11  ;;  %v5035_v17 = vcombine.low %v530_v6, %v534_v7  ;;  %v570_v10 = vld [vmem:[#allocation8 + $0x480] sm:$0xff] }
  0x94   :  { %3714 = vmatprep.subr.bf16.mxu1 %v4974_v20  ;;  %v542_v20 = vld [vmem:[#allocation8 + $0x3a0] sm:$0xff] }
  0x95   :  { %v5044_v22 = vcombine.high %v538_v19, %v542_v20  ;;  %v574_v11 = vld [vmem:[#allocation8 + $0x4a0] sm:$0xff] }
  0x96   :  { %3551 = vmatpush1.bf16.msra.mxu0 %v4971_v21  ;;  %v539_v21 = vld [vmem:[#allocation8 + $0x388] sm:$0xff] }
  0x97   :  { %3552 = vmatprep.subr.bf16.mxu0 %v4980_v24  ;;  %3715 = vmatpush1.bf16.msra.mxu1 %v4973_v25  ;;  %v5043_v24 = vcombine.low %v538_v19, %v542_v20  ;;  %v5045_v25 = vcombine.low %v539_v21, %v543_v23  ;;  %v5046_v26 = vcombine.high %v539_v21, %v543_v23 }
  0x98   :  { %3716 = vmatprep.subr.bf16.mxu1 %v4982_v28  ;;  %v550_v28 = vld [vmem:[#allocation8 + $0x3e0] sm:$0xff]  ;;  %v5076_v20 = vcombine.high %v570_v10, %v574_v11 }
  0x99   :  { %v5052_v30 = vcombine.high %v546_v27, %v550_v28 }
  0x9a   :  { %3553 = vmatpush1.bf16.msra.mxu0 %v4979_v29  ;;  %v547_v29 = vld [vmem:[#allocation8 + $0x3c8] sm:$0xff] }
  0x9b   :  { %3554 = vmatprep.subr.bf16.mxu0 %v4988_v32  ;;  %3717 = vmatpush1.bf16.msra.mxu1 %v4981_v33  ;;  %v5051_v32 = vcombine.low %v546_v27, %v550_v28  ;;  %v5053_v33 = vcombine.low %v547_v29, %v551_v31  ;;  %v5054_v34 = vcombine.high %v547_v29, %v551_v31  ;;  %v586_v31 = vld [vmem:[#allocation8 + $0x500] sm:$0xff] }
  0x9c   :  { %3718 = vmatprep.subr.bf16.mxu1 %v4990_v36  ;;  %v558_v36 = vld [vmem:[#allocation8 + $0x420] sm:$0xff]  ;;  %v5075_v27 = vcombine.low %v570_v10, %v574_v11 }
  0x9d   :  { %v5060_v38 = vcombine.high %v554_v35, %v558_v36  ;;  %v618_v11 = vld [vmem:[#allocation8 + $0x600] sm:$0xff] }
  0x9e   :  { %3555 = vmatpush1.bf16.msra.mxu0 %v4987_v37  ;;  %v555_v37 = vld [vmem:[#allocation8 + $0x408] sm:$0xff] }
  0x9f   :  { %3556 = vmatprep.subr.bf16.mxu0 %v4996_v40  ;;  %3719 = vmatpush1.bf16.msra.mxu1 %v4989_v41  ;;  %v5059_v40 = vcombine.low %v554_v35, %v558_v36  ;;  %v5061_v41 = vcombine.low %v555_v37, %v559_v39  ;;  %v5062_v42 = vcombine.high %v555_v37, %v559_v39  ;;  %v594_v39 = vld [vmem:[#allocation8 + $0x540] sm:$0xff] }
  0xa0   :  { %3720 = vmatprep.subr.bf16.mxu1 %v4998_v44  ;;  %v6017_v44 = vshrl.u32 %v122_v43, 7 }
  0xa2   :  { %3557 = vmatpush1.bf16.msra.mxu0 %v4995_v45  ;;  %v124_v45 = vsub.s32 0, %v6017_v44  ;;  %v128_v47 = vsub.s32 1, %v6017_v44 }
  0xa3   :  { %3558 = vmatprep.subr.bf16.mxu0 %v5004_v48  ;;  %3721 = vmatpush1.bf16.msra.mxu1 %v4997_v49  ;;  %v136_v48 = vsub.s32 3, %v6017_v44 }
  0xa4   :  { %3722 = vmatprep.subr.bf16.mxu1 %v5006_v52  ;;  %v125_v49 = vrot.slane %v6020_v46, %v124_v45  ;;  %v129_v50 = vrot.slane %v6020_v46, %v128_v47 }
  0xa5   :  { %v137_v52 = vrot.slane %v6020_v46, %v136_v48 }
  0xa6   :  { %3559 = vmatpush1.bf16.msra.mxu0 %v5003_v53 }
  0xa7   :  { %3560 = vmatprep.subr.bf16.mxu0 %v5012_v56  ;;  %3723 = vmatpush1.bf16.msra.mxu1 %v5005_v57 }
  0xa8   :  { %3724 = vmatprep.subr.bf16.mxu1 %v5014_v60  ;;  %v562_v60 = vld [vmem:[#allocation8 + $0x440] sm:$0xff] }
  0xaa   :  { %3561 = vmatpush1.bf16.msra.mxu0 %v5011_v61 }
  0xab   :  { %3562 = vmatprep.subr.bf16.mxu0 %v5020_v0  ;;  %3725 = vmatpush1.bf16.msra.mxu1 %v5013_v1  ;;  %v563_v0 = vld [vmem:[#allocation8 + $0x448] sm:$0xff] }
  0xac   :  { %3726 = vmatprep.subr.bf16.mxu1 %v5022_v4  ;;  %v567_v1 = vld [vmem:[#allocation8 + $0x468] sm:$0xff] }
  0xae   :  { %3563 = vmatpush1.bf16.msra.mxu0 %v5019_v5 }
  0xaf   :  { %3564 = vmatprep.subr.bf16.mxu0 %v5028_v8  ;;  %3727 = vmatpush1.bf16.msra.mxu1 %v5021_v9  ;;  %v5068_v8 = vcombine.high %v562_v60, %v566_v63  ;;  %v5070_v9 = vcombine.high %v563_v0, %v567_v1 }
  0xb0   :  { %3728 = vmatprep.subr.bf16.mxu1 %v5030_v12  ;;  %v571_v12 = vld [vmem:[#allocation8 + $0x488] sm:$0xff] }
  0xb2   :  { %3565 = vmatpush1.bf16.msra.mxu0 %v5027_v13  ;;  %v575_v13 = vld [vmem:[#allocation8 + $0x4a8] sm:$0xff] }
  0xb3   :  { %3566 = vmatprep.subr.bf16.mxu0 %v5036_v14  ;;  %3729 = vmatpush1.bf16.msra.mxu1 %v5029_v15  ;;  %v5078_v21 = vcombine.high %v571_v12, %v575_v13  ;;  %v5077_v28 = vcombine.low %v571_v12, %v575_v13  ;;  %v622_v12 = vld [vmem:[#allocation8 + $0x620] sm:$0xff]  ;;  %v619_v13 = vld [vmem:[#allocation8 + $0x608] sm:$0xff] }
  0xb4   :  { %3730 = vmatprep.subr.bf16.mxu1 %v5038_v16 }
  0xb6   :  { %3567 = vmatpush1.bf16.msra.mxu0 %v5035_v17  ;;  %v5067_v17 = vcombine.low %v562_v60, %v566_v63 }
  0xb7   :  { %3731 = vmatpush1.bf16.msra.mxu1 %v5037_v18  ;;  %3568 = vmatprep.subr.bf16.mxu0 %v5044_v22  ;;  %v5069_v18 = vcombine.low %v563_v0, %v567_v1  ;;  %v578_v22 = vld [vmem:[#allocation8 + $0x4c0] sm:$0xff]  ;;  %v611_v1 = vld [vmem:[#allocation8 + $0x5c8] sm:$0xff] }
  0xb8   :  { %3732 = vmatprep.subr.bf16.mxu1 %v5046_v26  ;;  %v583_v26 = vld [vmem:[#allocation8 + $0x4e8] sm:$0xff]  ;;  %v614_v0 = vld [vmem:[#allocation8 + $0x5e0] sm:$0xff] }
  0xba   :  { %3569 = vmatpush1.bf16.msra.mxu0 %v5043_v24  ;;  %v582_v24 = vld [vmem:[#allocation8 + $0x4e0] sm:$0xff] }
  0xbb   :  { %3733 = vmatpush1.bf16.msra.mxu1 %v5045_v25  ;;  %3570 = vmatprep.subr.bf16.mxu0 %v5052_v30  ;;  %v579_v25 = vld [vmem:[#allocation8 + $0x4c8] sm:$0xff]  ;;  %v5084_v29 = vcombine.high %v578_v22, %v582_v24  ;;  %v5083_v35 = vcombine.low %v578_v22, %v582_v24  ;;  %v626_v22 = vld [vmem:[#allocation8 + $0x640] sm:$0xff] }
  0xbc   :  { %3734 = vmatprep.subr.bf16.mxu1 %v5054_v34  ;;  %v5086_v30 = vcombine.high %v579_v25, %v583_v26  ;;  %v591_v34 = vld [vmem:[#allocation8 + $0x528] sm:$0xff]  ;;  %v5085_v36 = vcombine.low %v579_v25, %v583_v26  ;;  %v5123_v26 = vcombine.low %v618_v11, %v622_v12 }
  0xbd   :  { %v627_v24 = vld [vmem:[#allocation8 + $0x648] sm:$0xff] }
  0xbe   :  { %3571 = vmatpush1.bf16.msra.mxu0 %v5051_v32  ;;  %v590_v32 = vld [vmem:[#allocation8 + $0x520] sm:$0xff]  ;;  %v631_v25 = vld [vmem:[#allocation8 + $0x668] sm:$0xff] }
  0xbf   :  { %3735 = vmatpush1.bf16.msra.mxu1 %v5053_v33  ;;  %3581 = vmatprep.subr.bf16.mxu0 %v5060_v38  ;;  %v587_v33 = vld [vmem:[#allocation8 + $0x508] sm:$0xff]  ;;  %v5092_v37 = vcombine.high %v586_v31, %v590_v32  ;;  %v5091_v43 = vcombine.low %v586_v31, %v590_v32  ;;  %v638_v31 = vld [vmem:[#allocation8 + $0x6a0] sm:$0xff] }
  0xc0   :  { %3745 = vmatprep.subr.bf16.mxu1 %v5062_v42  ;;  %v5094_v38 = vcombine.high %v587_v33, %v591_v34  ;;  %v599_v42 = vld [vmem:[#allocation8 + $0x568] sm:$0xff] }
  0xc1   :  { %v635_v32 = vld [vmem:[#allocation8 + $0x688] sm:$0xff] }
 0x14c   :  { %v280_v51 = vpop.f32.mrb[0].mxu0  ;;  %v6033_v57 = vpop.f32.mrb[0].mxu1 }
 0x14d   :  { %v281_v53 = vadd.f32 %v280_v51, %v125_v49  ;;  %v282_v54 = vpop.f32.mrb[1].mxu0  ;;  %v323_v61 = vpop.f32.mrb[1].mxu1  ;;  %v5093_v49 = vcombine.low %v587_v33, %v591_v34  ;;  %v639_v33 = vld [vmem:[#allocation8 + $0x6a8] sm:$0xff] }
 0x14e   :  { %v283_v55 = vadd.f32 %v282_v54, %v129_v50  ;;  %v284_v56 = vpop.f32.mrb[2].mxu0  ;;  %v324_v2 = vadd.f32 %v323_v61, %v137_v52  ;;  %v325_v3 = vpop.f32.mrb[2].mxu1  ;;  %v602_v52 = vld [vmem:[#allocation8 + $0x580] sm:$0xff]  ;;  %v603_v54 = vld [vmem:[#allocation8 + $0x588] sm:$0xff] }
 0x14f   :  { %v410_v58 = vmax.f32 %v281_v53, 0.0  ;;  %v285_v59 = vpop.f32.mrb[3].mxu0  ;;  %v326_v4 = vpop.f32.mrb[3].mxu1  ;;  %v606_v53 = vld [vmem:[#allocation8 + $0x5a0] sm:$0xff] }
 0x150   :  { %v411_v62 = vmax.f32 %v283_v55, 0.0  ;;  %v413_v6 = vmax.f32 %v324_v2, 0.0  ;;  %v607_v55 = vld [vmem:[#allocation8 + $0x5a8] sm:$0xff]  ;;  %v5108_v60 = vcombine.high %v602_v52, %v606_v53 }
 0x151   :  { %v6037_v7 = vpack.c.bf16 %v410_v58, %v410_v58  ;;  %v5110_v61 = vcombine.high %v603_v54, %v607_v55  ;;  %v615_v2 = vld [vmem:[#allocation8 + $0x5e8] sm:$0xff] }
 0x152   :  { %v6035_v5 = vpack.c.bf16 %v411_v62, %v411_v62  ;;  %v6041_v14 = vpack.c.bf16 %v413_v6, %v413_v6  ;;  %v610_v62 = vld [vmem:[#allocation8 + $0x5c0] sm:$0xff]  ;;  %v5107_v6 = vcombine.low %v602_v52, %v606_v53  ;;  %v5118_v10 = vcombine.high %v611_v1, %v615_v2  ;;  %v651_v53 = vld [vmem:[#allocation8 + $0x708] sm:$0xff] }
 0x153   :  { %v654_v52 = vld [vmem:[#allocation8 + $0x720] sm:$0xff] }
 0x154   :  { %3572 = vmatprep.mubr.bf16.mxu0 %v6035_v5  ;;  %3736 = vmatprep.mubr.bf16.mxu1 %v6035_v5  ;;  %v6043_v15 = vpop.f32.mrb[4].mxu0 }
 0x155   :  { %3573 = vmatmul.mubr.bf16.vlgmr.msra.gmra.mrb[8].mxu0 %v6037_v7  ;;  %3737 = vmatmul.mubr.bf16.vlgmr.msra.gmra.mrb[8].mxu1 %v6037_v7  ;;  %v6047_v16 = vpop.f32.mrb[5].mxu0  ;;  %v6051_v59 = vpop.f32.mrb[4].mxu1 }
 0x156   :  { %3582 = vmatpush1.bf16.msra.mxu0 %v5059_v40  ;;  %3746 = vmatpush1.bf16.msra.mxu1 %v5061_v41  ;;  %v366_v19 = vpop.f32.mrb[6].mxu0  ;;  %v598_v40 = vld [vmem:[#allocation8 + $0x560] sm:$0xff]  ;;  %v595_v41 = vld [vmem:[#allocation8 + $0x548] sm:$0xff]  ;;  %v6053_v63 = vpop.f32.mrb[5].mxu1 }
 0x157   :  { %3583 = vmatprep.subr.bf16.mxu0 %v5068_v8  ;;  %3747 = vmatprep.subr.bf16.mxu1 %v5070_v9  ;;  %v367_v23 = vpop.f32.mrb[7].mxu0  ;;  %v5100_v50 = vcombine.high %v594_v39, %v598_v40  ;;  %v5102_v51 = vcombine.high %v595_v41, %v599_v42  ;;  %v5099_v56 = vcombine.low %v594_v39, %v598_v40  ;;  %v407_v3 = vpop.f32.mrb[6].mxu1  ;;  %v646_v39 = vld [vmem:[#allocation8 + $0x6e0] sm:$0xff]  ;;  %v643_v40 = vld [vmem:[#allocation8 + $0x6c8] sm:$0xff] }
 0x158   :  { %3613 = vmatprep.mubr.bf16.mxu0 %v6041_v14  ;;  %3777 = vmatprep.mubr.bf16.mxu1 %v6041_v14  ;;  %v5101_v58 = vcombine.low %v595_v41, %v599_v42  ;;  %v408_v4 = vpop.f32.mrb[7].mxu1  ;;  %v5109_v8 = vcombine.low %v603_v54, %v607_v55  ;;  %v5116_v9 = vcombine.high %v610_v62, %v614_v0  ;;  %v630_v23 = vld [vmem:[#allocation8 + $0x660] sm:$0xff]  ;;  %v647_v41 = vld [vmem:[#allocation8 + $0x6e8] sm:$0xff] }
 0x159   :  { %v5117_v19 = vcombine.low %v611_v1, %v615_v2  ;;  %v5131_v34 = vcombine.low %v626_v22, %v630_v23  ;;  %v655_v54 = vld [vmem:[#allocation8 + $0x728] sm:$0xff]  ;;  %v132_v2 = vsub.s32 2, %v6017_v44 }
 0x15a   :  { %3584 = vmatpush1.bf16.msra.mxu0 %v5067_v17  ;;  %3748 = vmatpush1.bf16.msra.mxu1 %v5069_v18  ;;  %v623_v17 = vld [vmem:[#allocation8 + $0x628] sm:$0xff]  ;;  %v5115_v18 = vcombine.low %v610_v62, %v614_v0  ;;  %v662_v62 = vld [vmem:[#allocation8 + $0x760] sm:$0xff]  ;;  %v5157_v4 = vcombine.low %v651_v53, %v655_v54 }
 0x15b   :  { %3585 = vmatprep.subr.bf16.mxu0 %v5076_v20  ;;  %3749 = vmatprep.subr.bf16.mxu1 %v5078_v21  ;;  %v5124_v20 = vcombine.high %v618_v11, %v622_v12  ;;  %v5126_v21 = vcombine.high %v619_v13, %v623_v17  ;;  %v659_v0 = vld [vmem:[#allocation8 + $0x748] sm:$0xff] }
 0x15c   :  { %v663_v1 = vld [vmem:[#allocation8 + $0x768] sm:$0xff] }
 0x15d   :  { %v667_v11 = vld [vmem:[#allocation8 + $0x788] sm:$0xff] }
 0x15e   :  { %3586 = vmatpush1.bf16.msra.mxu0 %v5075_v27  ;;  %3750 = vmatpush1.bf16.msra.mxu1 %v5077_v28  ;;  %v5125_v27 = vcombine.low %v619_v13, %v623_v17  ;;  %v5132_v28 = vcombine.high %v626_v22, %v630_v23  ;;  %v671_v12 = vld [vmem:[#allocation8 + $0x7a8] sm:$0xff]  ;;  %v144_v13 = vsub.s32 5, %v6017_v44  ;;  %v133_v17 = vrot.slane %v6020_v46, %v132_v2  ;;  %v674_v22 = vld [vmem:[#allocation8 + $0x7c0] sm:$0xff] }
 0x15f   :  { %3587 = vmatprep.subr.bf16.mxu0 %v5084_v29  ;;  %3751 = vmatprep.subr.bf16.mxu1 %v5086_v30  ;;  %v5134_v29 = vcombine.high %v627_v24, %v631_v25  ;;  %v634_v30 = vld [vmem:[#allocation8 + $0x680] sm:$0xff] }
 0x160   :  { %v5139_v42 = vcombine.low %v634_v30, %v638_v31  ;;  %v678_v23 = vld [vmem:[#allocation8 + $0x7e0] sm:$0xff] }
 0x162   :  { %3588 = vmatpush1.bf16.msra.mxu0 %v5083_v35  ;;  %3752 = vmatpush1.bf16.msra.mxu1 %v5085_v36  ;;  %v5133_v35 = vcombine.low %v627_v24, %v631_v25  ;;  %v5140_v36 = vcombine.high %v634_v30, %v638_v31  ;;  %v675_v24 = vld [vmem:[#allocation8 + $0x7c8] sm:$0xff]  ;;  %v5180_v30 = vcombine.high %v674_v22, %v678_v23 }
 0x163   :  { %3589 = vmatprep.subr.bf16.mxu0 %v5092_v37  ;;  %3753 = vmatprep.subr.bf16.mxu1 %v5094_v38  ;;  %v5142_v37 = vcombine.high %v635_v32, %v639_v33  ;;  %v642_v38 = vld [vmem:[#allocation8 + $0x6c0] sm:$0xff]  ;;  %v679_v25 = vld [vmem:[#allocation8 + $0x7e8] sm:$0xff] }
 0x164   :  { %v5147_v55 = vcombine.low %v642_v38, %v646_v39  ;;  %v5182_v31 = vcombine.high %v675_v24, %v679_v25 }
 0x166   :  { %3590 = vmatpush1.bf16.msra.mxu0 %v5091_v43  ;;  %3754 = vmatpush1.bf16.msra.mxu1 %v5093_v49  ;;  %v5141_v43 = vcombine.low %v635_v32, %v639_v33  ;;  %v5148_v49 = vcombine.high %v642_v38, %v646_v39  ;;  %v682_v32 = vld [vmem:[#allocation8 + $0x800] sm:$0xff]  ;;  %v5179_v38 = vcombine.low %v674_v22, %v678_v23 }
 0x167   :  { %3591 = vmatprep.subr.bf16.mxu0 %v5100_v50  ;;  %3755 = vmatprep.subr.bf16.mxu1 %v5102_v51  ;;  %v5150_v50 = vcombine.high %v643_v40, %v647_v41  ;;  %v650_v51 = vld [vmem:[#allocation8 + $0x700] sm:$0xff]  ;;  %v5181_v39 = vcombine.low %v675_v24, %v679_v25 }
 0x168   :  { %v5155_v3 = vcombine.low %v650_v51, %v654_v52  ;;  %v686_v33 = vld [vmem:[#allocation8 + $0x820] sm:$0xff] }
 0x16a   :  { %3592 = vmatpush1.bf16.msra.mxu0 %v5099_v56  ;;  %3756 = vmatpush1.bf16.msra.mxu1 %v5101_v58  ;;  %v5149_v56 = vcombine.low %v643_v40, %v647_v41  ;;  %v5156_v58 = vcombine.high %v650_v51, %v654_v52  ;;  %v690_v41 = vld [vmem:[#allocation8 + $0x840] sm:$0xff]  ;;  %v5187_v52 = vcombine.low %v682_v32, %v686_v33 }
 0x16b   :  { %3593 = vmatprep.subr.bf16.mxu0 %v5108_v60  ;;  %3757 = vmatprep.subr.bf16.mxu1 %v5110_v61  ;;  %v5158_v60 = vcombine.high %v651_v53, %v655_v54  ;;  %v658_v61 = vld [vmem:[#allocation8 + $0x740] sm:$0xff] }
 0x16e   :  { %3594 = vmatpush1.bf16.msra.mxu0 %v5107_v6  ;;  %3758 = vmatpush1.bf16.msra.mxu1 %v5109_v8  ;;  %v5164_v6 = vcombine.high %v658_v61, %v662_v62  ;;  %v5166_v8 = vcombine.high %v659_v0, %v663_v1 }
 0x16f   :  { %3595 = vmatprep.subr.bf16.mxu0 %v5116_v9  ;;  %3759 = vmatprep.subr.bf16.mxu1 %v5118_v10  ;;  %v666_v9 = vld [vmem:[#allocation8 + $0x780] sm:$0xff] }
 0x170   :  { %v670_v10 = vld [vmem:[#allocation8 + $0x7a0] sm:$0xff] }
 0x172   :  { %3596 = vmatpush1.bf16.msra.mxu0 %v5115_v18  ;;  %3760 = vmatpush1.bf16.msra.mxu1 %v5117_v19  ;;  %v5163_v18 = vcombine.low %v658_v61, %v662_v62  ;;  %v5165_v19 = vcombine.low %v659_v0, %v663_v1 }
 0x173   :  { %3597 = vmatprep.subr.bf16.mxu0 %v5124_v20  ;;  %3761 = vmatprep.subr.bf16.mxu1 %v5126_v21  ;;  %v5172_v20 = vcombine.high %v666_v9, %v670_v10  ;;  %v5174_v21 = vcombine.high %v667_v11, %v671_v12 }
 0x176   :  { %3598 = vmatpush1.bf16.msra.mxu0 %v5123_v26  ;;  %3762 = vmatpush1.bf16.msra.mxu1 %v5125_v27  ;;  %v145_v26 = vrot.slane %v6020_v46, %v144_v13  ;;  %v322_v27 = vadd.f32 %v6033_v57, %v133_v17  ;;  %v5188_v57 = vcombine.high %v682_v32, %v686_v33 }
 0x177   :  { %3599 = vmatprep.subr.bf16.mxu0 %v5132_v28  ;;  %3763 = vmatprep.subr.bf16.mxu1 %v5134_v29  ;;  %v5171_v28 = vcombine.low %v666_v9, %v670_v10  ;;  %v5173_v29 = vcombine.low %v667_v11, %v671_v12  ;;  %v711_v9 = vld [vmem:[#allocation8 + $0x8e8] sm:$0xff] }
 0x17a   :  { %3600 = vmatpush1.bf16.msra.mxu0 %v5131_v34  ;;  %3764 = vmatpush1.bf16.msra.mxu1 %v5133_v35  ;;  %v683_v34 = vld [vmem:[#allocation8 + $0x808] sm:$0xff] }
 0x17b   :  { %3601 = vmatprep.subr.bf16.mxu0 %v5140_v36  ;;  %3765 = vmatprep.subr.bf16.mxu1 %v5142_v37  ;;  %v687_v35 = vld [vmem:[#allocation8 + $0x828] sm:$0xff]  ;;  %v365_v36 = vadd.f32 %v6047_v16, %v145_v26  ;;  %v412_v37 = vmax.f32 %v322_v27, 0.0  ;;  %v722_v26 = vld [vmem:[#allocation8 + $0x940] sm:$0xff] }
 0x17c   :  { %v5190_v40 = vcombine.high %v683_v34, %v687_v35  ;;  %v5189_v16 = vcombine.low %v683_v34, %v687_v35  ;;  %v726_v27 = vld [vmem:[#allocation8 + $0x960] sm:$0xff] }
 0x17d   :  { %v6065_v51 = vpack.c.bf16 %v412_v37, %v412_v37  ;;  %v5228_v32 = vcombine.high %v722_v26, %v726_v27  ;;  %v730_v34 = vld [vmem:[#allocation8 + $0x980] sm:$0xff]  ;;  %v735_v37 = vld [vmem:[#allocation8 + $0x9a8] sm:$0xff] }
 0x17e   :  { %3602 = vmatpush1.bf16.msra.mxu0 %v5139_v42  ;;  %3766 = vmatpush1.bf16.msra.mxu1 %v5141_v43  ;;  %v694_v42 = vld [vmem:[#allocation8 + $0x860] sm:$0xff]  ;;  %v691_v43 = vld [vmem:[#allocation8 + $0x848] sm:$0xff] }
 0x17f   :  { %3603 = vmatprep.subr.bf16.mxu0 %v5148_v49  ;;  %3767 = vmatprep.subr.bf16.mxu1 %v5150_v50  ;;  %v695_v49 = vld [vmem:[#allocation8 + $0x868] sm:$0xff]  ;;  %v415_v50 = vmax.f32 %v365_v36, 0.0  ;;  %v5196_v53 = vcombine.high %v690_v41, %v694_v42  ;;  %v5195_v62 = vcombine.low %v690_v41, %v694_v42  ;;  %v734_v35 = vld [vmem:[#allocation8 + $0x9a0] sm:$0xff] }
 0x180   :  { %v5198_v54 = vcombine.high %v691_v43, %v695_v49  ;;  %v5197_v0 = vcombine.low %v691_v43, %v695_v49  ;;  %v731_v36 = vld [vmem:[#allocation8 + $0x988] sm:$0xff]  ;;  %v738_v41 = vld [vmem:[#allocation8 + $0x9c0] sm:$0xff] }
 0x181   :  { %v6067_v61 = vpack.c.bf16 %v415_v50, %v415_v50  ;;  %v742_v42 = vld [vmem:[#allocation8 + $0x9e0] sm:$0xff]  ;;  %v739_v43 = vld [vmem:[#allocation8 + $0x9c8] sm:$0xff]  ;;  %v5235_v50 = vcombine.low %v730_v34, %v734_v35 }
 0x182   :  { %3604 = vmatpush1.bf16.msra.mxu0 %v5147_v55  ;;  %3768 = vmatpush1.bf16.msra.mxu1 %v5149_v56  ;;  %v698_v55 = vld [vmem:[#allocation8 + $0x880] sm:$0xff]  ;;  %v743_v49 = vld [vmem:[#allocation8 + $0x9e8] sm:$0xff] }
 0x183   :  { %3605 = vmatprep.subr.bf16.mxu0 %v5156_v58  ;;  %3769 = vmatprep.subr.bf16.mxu1 %v5158_v60  ;;  %v702_v56 = vld [vmem:[#allocation8 + $0x8a0] sm:$0xff]  ;;  %v699_v58 = vld [vmem:[#allocation8 + $0x888] sm:$0xff] }
 0x184   :  { %v703_v60 = vld [vmem:[#allocation8 + $0x8a8] sm:$0xff]  ;;  %v5204_v1 = vcombine.high %v698_v55, %v702_v56  ;;  %v5203_v10 = vcombine.low %v698_v55, %v702_v56  ;;  %v750_v55 = vld [vmem:[#allocation8 + $0xa20] sm:$0xff] }
 0x185   :  { %v5205_v11 = vcombine.low %v699_v58, %v703_v60  ;;  %v747_v56 = vld [vmem:[#allocation8 + $0xa08] sm:$0xff] }
 0x186   :  { %3606 = vmatpush1.bf16.msra.mxu0 %v5155_v3  ;;  %3770 = vmatpush1.bf16.msra.mxu1 %v5157_v4  ;;  %v5206_v3 = vcombine.high %v699_v58, %v703_v60  ;;  %v706_v4 = vld [vmem:[#allocation8 + $0x8c0] sm:$0xff]  ;;  %v751_v58 = vld [vmem:[#allocation8 + $0xa28] sm:$0xff]  ;;  %v5243_v60 = vcombine.low %v738_v41, %v742_v42 }
 0x187   :  { %3607 = vmatprep.subr.bf16.mxu0 %v5164_v6  ;;  %3771 = vmatprep.subr.bf16.mxu1 %v5166_v8  ;;  %v710_v6 = vld [vmem:[#allocation8 + $0x8e0] sm:$0xff]  ;;  %v707_v8 = vld [vmem:[#allocation8 + $0x8c8] sm:$0xff] }
 0x188   :  { %v5212_v12 = vcombine.high %v706_v4, %v710_v6  ;;  %v5214_v17 = vcombine.high %v707_v8, %v711_v9  ;;  %v5211_v22 = vcombine.low %v706_v4, %v710_v6  ;;  %v5213_v23 = vcombine.low %v707_v8, %v711_v9  ;;  %v758_v4 = vld [vmem:[#allocation8 + $0xa60] sm:$0xff]  ;;  %v755_v6 = vld [vmem:[#allocation8 + $0xa48] sm:$0xff] }
 0x189   :  { %v759_v8 = vld [vmem:[#allocation8 + $0xa68] sm:$0xff] }
 0x18a   :  { %3608 = vmatpush1.bf16.msra.mxu0 %v5163_v18  ;;  %3772 = vmatpush1.bf16.msra.mxu1 %v5165_v19  ;;  %v714_v18 = vld [vmem:[#allocation8 + $0x900] sm:$0xff] }
 0x18b   :  { %3609 = vmatprep.subr.bf16.mxu0 %v5172_v20  ;;  %3773 = vmatprep.subr.bf16.mxu1 %v5174_v21  ;;  %v718_v19 = vld [vmem:[#allocation8 + $0x920] sm:$0xff]  ;;  %v715_v20 = vld [vmem:[#allocation8 + $0x908] sm:$0xff] }
 0x18c   :  { %v719_v21 = vld [vmem:[#allocation8 + $0x928] sm:$0xff]  ;;  %v5220_v24 = vcombine.high %v714_v18, %v718_v19 }
 0x18d   :  { %v5222_v25 = vcombine.high %v715_v20, %v719_v21 }
 0x18e   :  { %3610 = vmatpush1.bf16.msra.mxu0 %v5171_v28  ;;  %3774 = vmatpush1.bf16.msra.mxu1 %v5173_v29  ;;  %v723_v28 = vld [vmem:[#allocation8 + $0x948] sm:$0xff] }
 0x18f   :  { %3611 = vmatprep.subr.bf16.mxu0 %v5180_v30  ;;  %3775 = vmatprep.subr.bf16.mxu1 %v5182_v31  ;;  %v727_v29 = vld [vmem:[#allocation8 + $0x968] sm:$0xff]  ;;  %v5219_v30 = vcombine.low %v714_v18, %v718_v19  ;;  %v5221_v31 = vcombine.low %v715_v20, %v719_v21  ;;  %v766_v18 = vld [vmem:[#allocation8 + $0xaa0] sm:$0xff] }
 0x190   :  { %v5230_v33 = vcombine.high %v723_v28, %v727_v29  ;;  %v763_v19 = vld [vmem:[#allocation8 + $0xa88] sm:$0xff] }
 0x191   :  { %v767_v20 = vld [vmem:[#allocation8 + $0xaa8] sm:$0xff] }
 0x192   :  { %3612 = vmatpush1.bf16.msra.mxu0 %v5179_v38  ;;  %3776 = vmatpush1.bf16.msra.mxu1 %v5181_v39  ;;  %v5227_v38 = vcombine.low %v722_v26, %v726_v27  ;;  %v5229_v39 = vcombine.low %v723_v28, %v727_v29  ;;  %v774_v26 = vld [vmem:[#allocation8 + $0xae0] sm:$0xff]  ;;  %v771_v27 = vld [vmem:[#allocation8 + $0xac8] sm:$0xff] }
 0x193   :  { %3622 = vmatprep.subr.bf16.mxu0 %v5188_v57  ;;  %3786 = vmatprep.subr.bf16.mxu1 %v5190_v40  ;;  %v5236_v57 = vcombine.high %v730_v34, %v734_v35  ;;  %v5238_v40 = vcombine.high %v731_v36, %v735_v37  ;;  %v775_v28 = vld [vmem:[#allocation8 + $0xae8] sm:$0xff]  ;;  %v782_v34 = vld [vmem:[#allocation8 + $0xb20] sm:$0xff] }
 0x194   :  { %v779_v35 = vld [vmem:[#allocation8 + $0xb08] sm:$0xff] }
 0x195   :  { %3614 = vmatmul.mubr.bf16.vlgmr.msra.gmra.mrb[8].mxu0 %v6065_v51  ;;  %3778 = vmatmul.mubr.bf16.vlgmr.msra.gmra.mrb[8].mxu1 %v6065_v51 }
 0x196   :  { %3623 = vmatpush1.bf16.msra.mxu0 %v5187_v52  ;;  %3787 = vmatpush1.bf16.msra.mxu1 %v5189_v16  ;;  %v5237_v52 = vcombine.low %v731_v36, %v735_v37  ;;  %v5244_v16 = vcombine.high %v738_v41, %v742_v42  ;;  %v783_v36 = vld [vmem:[#allocation8 + $0xb28] sm:$0xff]  ;;  %v790_v41 = vld [vmem:[#allocation8 + $0xb60] sm:$0xff] }
 0x197   :  { %3624 = vmatprep.subr.bf16.mxu0 %v5196_v53  ;;  %3788 = vmatprep.subr.bf16.mxu1 %v5198_v54  ;;  %v5246_v53 = vcombine.high %v739_v43, %v743_v49  ;;  %v746_v54 = vld [vmem:[#allocation8 + $0xa00] sm:$0xff]  ;;  %v787_v42 = vld [vmem:[#allocation8 + $0xb48] sm:$0xff] }
 0x198   :  { %3654 = vmatprep.mubr.bf16.mxu0 %v6067_v61  ;;  %3818 = vmatprep.mubr.bf16.mxu1 %v6067_v61  ;;  %v5251_v9 = vcombine.low %v746_v54, %v750_v55 }
 0x19a   :  { %3625 = vmatpush1.bf16.msra.mxu0 %v5195_v62  ;;  %3789 = vmatpush1.bf16.msra.mxu1 %v5197_v0  ;;  %v5245_v62 = vcombine.low %v739_v43, %v743_v49  ;;  %v5252_v0 = vcombine.high %v746_v54, %v750_v55  ;;  %v791_v43 = vld [vmem:[#allocation8 + $0xb68] sm:$0xff]  ;;  %v140_v49 = vsub.s32 4, %v6017_v44  ;;  %v794_v54 = vld [vmem:[#allocation8 + $0xb80] sm:$0xff] }
 0x19b   :  { %3626 = vmatprep.subr.bf16.mxu0 %v5204_v1  ;;  %3790 = vmatprep.subr.bf16.mxu1 %v5206_v3  ;;  %v5254_v1 = vcombine.high %v747_v56, %v751_v58  ;;  %v754_v3 = vld [vmem:[#allocation8 + $0xa40] sm:$0xff] }
 0x19c   :  { %v5259_v21 = vcombine.low %v754_v3, %v758_v4  ;;  %v798_v55 = vld [vmem:[#allocation8 + $0xba0] sm:$0xff] }
 0x19e   :  { %3627 = vmatpush1.bf16.msra.mxu0 %v5203_v10  ;;  %3791 = vmatpush1.bf16.msra.mxu1 %v5205_v11  ;;  %v5253_v10 = vcombine.low %v747_v56, %v751_v58  ;;  %v5260_v11 = vcombine.high %v754_v3, %v758_v4  ;;  %v795_v56 = vld [vmem:[#allocation8 + $0xb88] sm:$0xff]  ;;  %v5300_v3 = vcombine.high %v794_v54, %v798_v55 }
 0x19f   :  { %3628 = vmatprep.subr.bf16.mxu0 %v5212_v12  ;;  %3792 = vmatprep.subr.bf16.mxu1 %v5214_v17  ;;  %v5262_v12 = vcombine.high %v755_v6, %v759_v8  ;;  %v762_v17 = vld [vmem:[#allocation8 + $0xa80] sm:$0xff]  ;;  %v799_v58 = vld [vmem:[#allocation8 + $0xba8] sm:$0xff] }
 0x1a0   :  { %v5267_v29 = vcombine.low %v762_v17, %v766_v18  ;;  %v5302_v4 = vcombine.high %v795_v56, %v799_v58 }
 0x1a2   :  { %3629 = vmatpush1.bf16.msra.mxu0 %v5211_v22  ;;  %3793 = vmatpush1.bf16.msra.mxu1 %v5213_v23  ;;  %v5261_v22 = vcombine.low %v755_v6, %v759_v8  ;;  %v5268_v23 = vcombine.high %v762_v17, %v766_v18  ;;  %v802_v6 = vld [vmem:[#allocation8 + $0xbc0] sm:$0xff]  ;;  %v5299_v17 = vcombine.low %v794_v54, %v798_v55  ;;  %v835_v54 = vld [vmem:[#allocation8 + $0xcc8] sm:$0xff] }
 0x1a3   :  { %3630 = vmatprep.subr.bf16.mxu0 %v5220_v24  ;;  %3794 = vmatprep.subr.bf16.mxu1 %v5222_v25  ;;  %v5270_v24 = vcombine.high %v763_v19, %v767_v20  ;;  %v770_v25 = vld [vmem:[#allocation8 + $0xac0] sm:$0xff]  ;;  %v5301_v18 = vcombine.low %v795_v56, %v799_v58  ;;  %v839_v55 = vld [vmem:[#allocation8 + $0xce8] sm:$0xff] }
 0x1a4   :  { %v5275_v37 = vcombine.low %v770_v25, %v774_v26  ;;  %v806_v8 = vld [vmem:[#allocation8 + $0xbe0] sm:$0xff] }
 0x1a6   :  { %3631 = vmatpush1.bf16.msra.mxu0 %v5219_v30  ;;  %3795 = vmatpush1.bf16.msra.mxu1 %v5221_v31  ;;  %v5269_v30 = vcombine.low %v763_v19, %v767_v20  ;;  %v5276_v31 = vcombine.high %v770_v25, %v774_v26  ;;  %v5308_v19 = vcombine.high %v802_v6, %v806_v8 }
 0x1a7   :  { %3632 = vmatprep.subr.bf16.mxu0 %v5228_v32  ;;  %3796 = vmatprep.subr.bf16.mxu1 %v5230_v33  ;;  %v5278_v32 = vcombine.high %v771_v27, %v775_v28  ;;  %v778_v33 = vld [vmem:[#allocation8 + $0xb00] sm:$0xff] }
 0x1aa   :  { %3633 = vmatpush1.bf16.msra.mxu0 %v5227_v38  ;;  %3797 = vmatpush1.bf16.msra.mxu1 %v5229_v39  ;;  %v5277_v38 = vcombine.low %v771_v27, %v775_v28  ;;  %v5284_v39 = vcombine.high %v778_v33, %v782_v34 }
 0x1ab   :  { %3634 = vmatprep.subr.bf16.mxu0 %v5236_v57  ;;  %3798 = vmatprep.subr.bf16.mxu1 %v5238_v40  ;;  %v5286_v57 = vcombine.high %v779_v35, %v783_v36  ;;  %v786_v40 = vld [vmem:[#allocation8 + $0xb40] sm:$0xff] }
 0x1ae   :  { %3635 = vmatpush1.bf16.msra.mxu0 %v5235_v50  ;;  %3799 = vmatpush1.bf16.msra.mxu1 %v5237_v52  ;;  %v5283_v50 = vcombine.low %v778_v33, %v782_v34  ;;  %v5285_v52 = vcombine.low %v779_v35, %v783_v36 }
 0x1af   :  { %3636 = vmatprep.subr.bf16.mxu0 %v5244_v16  ;;  %3800 = vmatprep.subr.bf16.mxu1 %v5246_v53  ;;  %v5292_v16 = vcombine.high %v786_v40, %v790_v41  ;;  %v5294_v53 = vcombine.high %v787_v42, %v791_v43 }
 0x1b2   :  { %3637 = vmatpush1.bf16.msra.mxu0 %v5243_v60  ;;  %3801 = vmatpush1.bf16.msra.mxu1 %v5245_v62  ;;  %v152_v60 = vsub.s32 7, %v6017_v44  ;;  %v141_v62 = vrot.slane %v6020_v46, %v140_v49 }
 0x1b3   :  { %3638 = vmatprep.subr.bf16.mxu0 %v5252_v0  ;;  %3802 = vmatprep.subr.bf16.mxu1 %v5254_v1  ;;  %v5291_v0 = vcombine.low %v786_v40, %v790_v41  ;;  %v5293_v1 = vcombine.low %v787_v42, %v791_v43  ;;  %v831_v40 = vld [vmem:[#allocation8 + $0xca8] sm:$0xff] }
 0x1b6   :  { %3639 = vmatpush1.bf16.msra.mxu0 %v5251_v9  ;;  %3803 = vmatpush1.bf16.msra.mxu1 %v5253_v10  ;;  %v803_v9 = vld [vmem:[#allocation8 + $0xbc8] sm:$0xff] }
 0x1b7   :  { %3640 = vmatprep.subr.bf16.mxu0 %v5260_v11  ;;  %3804 = vmatprep.subr.bf16.mxu1 %v5262_v12  ;;  %v807_v10 = vld [vmem:[#allocation8 + $0xbe8] sm:$0xff]  ;;  %v153_v11 = vrot.slane %v6020_v46, %v152_v60  ;;  %v363_v12 = vadd.f32 %v6043_v15, %v141_v62  ;;  %v5307_v46 = vcombine.low %v802_v6, %v806_v8 }
 0x1b8   :  { %v5310_v20 = vcombine.high %v803_v9, %v807_v10  ;;  %v5309_v27 = vcombine.low %v803_v9, %v807_v10  ;;  %v847_v6 = vld [vmem:[#allocation8 + $0xd28] sm:$0xff]  ;;  %v5341_v9 = vcombine.low %v835_v54, %v839_v55 }
 0x1b9   :  { %v406_v25 = vadd.f32 %v6053_v63, %v153_v11  ;;  %v414_v26 = vmax.f32 %v363_v12, 0.0  ;;  %v850_v12 = vld [vmem:[#allocation8 + $0xd40] sm:$0xff] }
 0x1ba   :  { %3641 = vmatpush1.bf16.msra.mxu0 %v5259_v21  ;;  %3805 = vmatpush1.bf16.msra.mxu1 %v5261_v22  ;;  %v810_v21 = vld [vmem:[#allocation8 + $0xc00] sm:$0xff] }
 0x1bb   :  { %3642 = vmatprep.subr.bf16.mxu0 %v5268_v23  ;;  %3806 = vmatprep.subr.bf16.mxu1 %v5270_v24  ;;  %v814_v22 = vld [vmem:[#allocation8 + $0xc20] sm:$0xff]  ;;  %v811_v23 = vld [vmem:[#allocation8 + $0xc08] sm:$0xff]  ;;  %v417_v33 = vmax.f32 %v406_v25, 0.0  ;;  %v6083_v34 = vpack.c.bf16 %v414_v26, %v414_v26 }
 0x1bc   :  { %v815_v24 = vld [vmem:[#allocation8 + $0xc28] sm:$0xff]  ;;  %v5316_v15 = vcombine.high %v810_v21, %v814_v22  ;;  %v5315_v35 = vcombine.low %v810_v21, %v814_v22  ;;  %v862_v25 = vld [vmem:[#allocation8 + $0xda0] sm:$0xff] }
 0x1bd   :  { %v5318_v28 = vcombine.high %v811_v23, %v815_v24  ;;  %v5317_v63 = vcombine.low %v811_v23, %v815_v24  ;;  %v6085_v41 = vpack.c.bf16 %v417_v33, %v417_v33  ;;  %v858_v24 = vld [vmem:[#allocation8 + $0xd80] sm:$0xff]  ;;  %v859_v26 = vld [vmem:[#allocation8 + $0xd88] sm:$0xff] }
 0x1be   :  { %3643 = vmatpush1.bf16.msra.mxu0 %v5267_v29  ;;  %3807 = vmatpush1.bf16.msra.mxu1 %v5269_v30  ;;  %v818_v29 = vld [vmem:[#allocation8 + $0xc40] sm:$0xff]  ;;  %v871_v33 = vld [vmem:[#allocation8 + $0xde8] sm:$0xff] }
 0x1bf   :  { %3644 = vmatprep.subr.bf16.mxu0 %v5276_v31  ;;  %3808 = vmatprep.subr.bf16.mxu1 %v5278_v32  ;;  %v822_v30 = vld [vmem:[#allocation8 + $0xc60] sm:$0xff]  ;;  %v819_v31 = vld [vmem:[#allocation8 + $0xc48] sm:$0xff] }
 0x1c0   :  { %v823_v32 = vld [vmem:[#allocation8 + $0xc68] sm:$0xff]  ;;  %v5324_v36 = vcombine.high %v818_v29, %v822_v30  ;;  %v5323_v42 = vcombine.low %v818_v29, %v822_v30  ;;  %v866_v30 = vld [vmem:[#allocation8 + $0xdc0] sm:$0xff] }
 0x1c1   :  { %v5325_v43 = vcombine.low %v819_v31, %v823_v32 }
 0x1c2   :  { %3645 = vmatpush1.bf16.msra.mxu0 %v5275_v37  ;;  %3809 = vmatpush1.bf16.msra.mxu1 %v5277_v38  ;;  %v5326_v37 = vcombine.high %v819_v31, %v823_v32  ;;  %v826_v38 = vld [vmem:[#allocation8 + $0xc80] sm:$0xff]  ;;  %v867_v32 = vld [vmem:[#allocation8 + $0xdc8] sm:$0xff] }
 0x1c3   :  { %3646 = vmatprep.subr.bf16.mxu0 %v5284_v39  ;;  %3810 = vmatprep.subr.bf16.mxu1 %v5286_v57  ;;  %v830_v39 = vld [vmem:[#allocation8 + $0xca0] sm:$0xff]  ;;  %v827_v57 = vld [vmem:[#allocation8 + $0xc88] sm:$0xff] }
 0x1c4   :  { %v5331_v56 = vcombine.low %v826_v38, %v830_v39  ;;  %v5333_v58 = vcombine.low %v827_v57, %v831_v40  ;;  %v870_v31 = vld [vmem:[#allocation8 + $0xde0] sm:$0xff] }
 0x1c6   :  { %3647 = vmatpush1.bf16.msra.mxu0 %v5283_v50  ;;  %3811 = vmatpush1.bf16.msra.mxu1 %v5285_v52  ;;  %v5332_v50 = vcombine.high %v826_v38, %v830_v39  ;;  %v5334_v52 = vcombine.high %v827_v57, %v831_v40  ;;  %v874_v38 = vld [vmem:[#allocation8 + $0xe00] sm:$0xff]  ;;  %v875_v57 = vld [vmem:[#allocation8 + $0xe08] sm:$0xff] }
 0x1c7   :  { %3648 = vmatprep.subr.bf16.mxu0 %v5292_v16  ;;  %3812 = vmatprep.subr.bf16.mxu1 %v5294_v53  ;;  %v834_v16 = vld [vmem:[#allocation8 + $0xcc0] sm:$0xff]  ;;  %v879_v40 = vld [vmem:[#allocation8 + $0xe28] sm:$0xff] }
 0x1c8   :  { %v838_v53 = vld [vmem:[#allocation8 + $0xce0] sm:$0xff] }
 0x1c9   :  { %v5340_v62 = vcombine.high %v834_v16, %v838_v53  ;;  %v5339_v8 = vcombine.low %v834_v16, %v838_v53  ;;  %v878_v39 = vld [vmem:[#allocation8 + $0xe20] sm:$0xff] }
 0x1ca   :  { %3649 = vmatpush1.bf16.msra.mxu0 %v5291_v0  ;;  %3813 = vmatpush1.bf16.msra.mxu1 %v5293_v1  ;;  %v5342_v0 = vcombine.high %v835_v54, %v839_v55  ;;  %v842_v1 = vld [vmem:[#allocation8 + $0xd00] sm:$0xff]  ;;  %v883_v54 = vld [vmem:[#allocation8 + $0xe48] sm:$0xff] }
 0x1cb   :  { %3650 = vmatprep.subr.bf16.mxu0 %v5300_v3  ;;  %3814 = vmatprep.subr.bf16.mxu1 %v5302_v4  ;;  %v846_v3 = vld [vmem:[#allocation8 + $0xd20] sm:$0xff]  ;;  %v843_v4 = vld [vmem:[#allocation8 + $0xd08] sm:$0xff] }
 0x1cc   :  { %v5348_v10 = vcombine.high %v842_v1, %v846_v3  ;;  %v5350_v11 = vcombine.high %v843_v4, %v847_v6  ;;  %v5349_v21 = vcombine.low %v843_v4, %v847_v6  ;;  %v882_v16 = vld [vmem:[#allocation8 + $0xe40] sm:$0xff]  ;;  %v887_v55 = vld [vmem:[#allocation8 + $0xe68] sm:$0xff] }
 0x1cd   :  { %v886_v53 = vld [vmem:[#allocation8 + $0xe60] sm:$0xff]  ;;  %v891_v4 = vld [vmem:[#allocation8 + $0xe88] sm:$0xff] }
 0x1ce   :  { %3651 = vmatpush1.bf16.msra.mxu0 %v5299_v17  ;;  %3815 = vmatpush1.bf16.msra.mxu1 %v5301_v18  ;;  %v854_v17 = vld [vmem:[#allocation8 + $0xd60] sm:$0xff]  ;;  %v851_v18 = vld [vmem:[#allocation8 + $0xd48] sm:$0xff] }
 0x1cf   :  { %3652 = vmatprep.subr.bf16.mxu0 %v5308_v19  ;;  %3816 = vmatprep.subr.bf16.mxu1 %v5310_v20  ;;  %v855_v19 = vld [vmem:[#allocation8 + $0xd68] sm:$0xff]  ;;  %v5347_v20 = vcombine.low %v842_v1, %v846_v3  ;;  %v5356_v22 = vcombine.high %v850_v12, %v854_v17  ;;  %v890_v1 = vld [vmem:[#allocation8 + $0xe80] sm:$0xff] }
 0x1d0   :  { %v5358_v23 = vcombine.high %v851_v18, %v855_v19  ;;  %v894_v3 = vld [vmem:[#allocation8 + $0xea0] sm:$0xff]  ;;  %v895_v6 = vld [vmem:[#allocation8 + $0xea8] sm:$0xff] }
 0x1d2   :  { %3653 = vmatpush1.bf16.msra.mxu0 %v5307_v46  ;;  %3817 = vmatpush1.bf16.msra.mxu1 %v5309_v27  ;;  %v863_v46 = vld [vmem:[#allocation8 + $0xda8] sm:$0xff]  ;;  %v5355_v27 = vcombine.low %v850_v12, %v854_v17  ;;  %v898_v12 = vld [vmem:[#allocation8 + $0xec0] sm:$0xff] }
 0x1d3   :  { %3663 = vmatprep.subr.bf16.mxu0 %v5316_v15  ;;  %3827 = vmatprep.subr.bf16.mxu1 %v5318_v28  ;;  %v5357_v15 = vcombine.low %v851_v18, %v855_v19  ;;  %v5364_v28 = vcombine.high %v858_v24, %v862_v25  ;;  %v5366_v29 = vcombine.high %v859_v26, %v863_v46  ;;  %v902_v17 = vld [vmem:[#allocation8 + $0xee0] sm:$0xff]  ;;  %v899_v18 = vld [vmem:[#allocation8 + $0xec8] sm:$0xff] }
 0x1d4   :  { %v903_v19 = vld [vmem:[#allocation8 + $0xee8] sm:$0xff] }
 0x1d5   :  { %3655 = vmatmul.mubr.bf16.vlgmr.msra.gmra.mrb[8].mxu0 %v6083_v34  ;;  %3819 = vmatmul.mubr.bf16.vlgmr.msra.gmra.mrb[8].mxu1 %v6083_v34 }
 0x1d6   :  { %3664 = vmatpush1.bf16.msra.mxu0 %v5315_v35  ;;  %3828 = vmatpush1.bf16.msra.mxu1 %v5317_v63  ;;  %v5363_v35 = vcombine.low %v858_v24, %v862_v25  ;;  %v5365_v63 = vcombine.low %v859_v26, %v863_v46  ;;  %v906_v24 = vld [vmem:[#allocation8 + $0xf00] sm:$0xff]  ;;  %v907_v26 = vld [vmem:[#allocation8 + $0xf08] sm:$0xff] }
 0x1d7   :  { %3665 = vmatprep.subr.bf16.mxu0 %v5324_v36  ;;  %3829 = vmatprep.subr.bf16.mxu1 %v5326_v37  ;;  %v5372_v36 = vcombine.high %v866_v30, %v870_v31  ;;  %v5374_v37 = vcombine.high %v867_v32, %v871_v33  ;;  %v910_v25 = vld [vmem:[#allocation8 + $0xf20] sm:$0xff]  ;;  %v911_v46 = vld [vmem:[#allocation8 + $0xf28] sm:$0xff] }
 0x1d8   :  { %3695 = vmatprep.mubr.bf16.mxu0 %v6085_v41  ;;  %3859 = vmatprep.mubr.bf16.mxu1 %v6085_v41 }
 0x1da   :  { %3666 = vmatpush1.bf16.msra.mxu0 %v5323_v42  ;;  %3830 = vmatpush1.bf16.msra.mxu1 %v5325_v43  ;;  %v5371_v42 = vcombine.low %v866_v30, %v870_v31  ;;  %v5373_v43 = vcombine.low %v867_v32, %v871_v33  ;;  %v914_v30 = vld [vmem:[#allocation8 + $0xf40] sm:$0xff]  ;;  %v915_v32 = vld [vmem:[#allocation8 + $0xf48] sm:$0xff] }
 0x1db   :  { %3667 = vmatprep.subr.bf16.mxu0 %v5332_v50  ;;  %3831 = vmatprep.subr.bf16.mxu1 %v5334_v52  ;;  %v5380_v50 = vcombine.high %v874_v38, %v878_v39  ;;  %v5382_v52 = vcombine.high %v875_v57, %v879_v40  ;;  %v918_v31 = vld [vmem:[#allocation8 + $0xf60] sm:$0xff]  ;;  %v919_v33 = vld [vmem:[#allocation8 + $0xf68] sm:$0xff] }
 0x1de   :  { %3668 = vmatpush1.bf16.msra.mxu0 %v5331_v56  ;;  %3832 = vmatpush1.bf16.msra.mxu1 %v5333_v58  ;;  %v5379_v56 = vcombine.low %v874_v38, %v878_v39  ;;  %v5381_v58 = vcombine.low %v875_v57, %v879_v40  ;;  %v5422_v38 = vcombine.high %v915_v32, %v919_v33  ;;  %v922_v39 = vld [vmem:[#allocation8 + $0xf80] sm:$0xff]  ;;  %v923_v40 = vld [vmem:[#allocation8 + $0xf88] sm:$0xff] }
 0x1df   :  { %3669 = vmatprep.subr.bf16.mxu0 %v5340_v62  ;;  %3833 = vmatprep.subr.bf16.mxu1 %v5342_v0  ;;  %v5388_v62 = vcombine.high %v882_v16, %v886_v53  ;;  %v5390_v0 = vcombine.high %v883_v54, %v887_v55  ;;  %v926_v57 = vld [vmem:[#allocation8 + $0xfa0] sm:$0xff] }
 0x1e2   :  { %3670 = vmatpush1.bf16.msra.mxu0 %v5339_v8  ;;  %3834 = vmatpush1.bf16.msra.mxu1 %v5341_v9  ;;  %v5387_v8 = vcombine.low %v882_v16, %v886_v53  ;;  %v5389_v9 = vcombine.low %v883_v54, %v887_v55  ;;  %v5428_v53 = vcombine.high %v922_v39, %v926_v57  ;;  %v930_v55 = vld [vmem:[#allocation8 + $0xfc0] sm:$0xff] }
 0x1e3   :  { %3671 = vmatprep.subr.bf16.mxu0 %v5348_v10  ;;  %3835 = vmatprep.subr.bf16.mxu1 %v5350_v11  ;;  %v5396_v10 = vcombine.high %v890_v1, %v894_v3  ;;  %v5398_v11 = vcombine.high %v891_v4, %v895_v6 }
 0x1e6   :  { %3672 = vmatpush1.bf16.msra.mxu0 %v5347_v20  ;;  %3836 = vmatpush1.bf16.msra.mxu1 %v5349_v21  ;;  %v5395_v20 = vcombine.low %v890_v1, %v894_v3  ;;  %v5397_v21 = vcombine.low %v891_v4, %v895_v6 }
 0x1e7   :  { %3673 = vmatprep.subr.bf16.mxu0 %v5356_v22  ;;  %3837 = vmatprep.subr.bf16.mxu1 %v5358_v23  ;;  %v5404_v22 = vcombine.high %v898_v12, %v902_v17  ;;  %v5406_v23 = vcombine.high %v899_v18, %v903_v19 }
 0x1ea   :  { %3674 = vmatpush1.bf16.msra.mxu0 %v5355_v27  ;;  %3838 = vmatpush1.bf16.msra.mxu1 %v5357_v15  ;;  %v5403_v27 = vcombine.low %v898_v12, %v902_v17  ;;  %v5405_v15 = vcombine.low %v899_v18, %v903_v19 }
 0x1eb   :  { %3675 = vmatprep.subr.bf16.mxu0 %v5364_v28  ;;  %3839 = vmatprep.subr.bf16.mxu1 %v5366_v29  ;;  %v5412_v28 = vcombine.high %v906_v24, %v910_v25  ;;  %v5414_v29 = vcombine.high %v907_v26, %v911_v46 }
 0x1ee   :  { %3676 = vmatpush1.bf16.msra.mxu0 %v5363_v35  ;;  %3840 = vmatpush1.bf16.msra.mxu1 %v5365_v63  ;;  %v5411_v35 = vcombine.low %v906_v24, %v910_v25  ;;  %v5413_v63 = vcombine.low %v907_v26, %v911_v46 }
 0x1ef   :  { %3677 = vmatprep.subr.bf16.mxu0 %v5372_v36  ;;  %3841 = vmatprep.subr.bf16.mxu1 %v5374_v37  ;;  %v148_v36 = vsub.s32 6, %v6017_v44  ;;  %v5420_v37 = vcombine.high %v914_v30, %v918_v31 }
 0x1f2   :  { %3678 = vmatpush1.bf16.msra.mxu0 %v5371_v42  ;;  %3842 = vmatpush1.bf16.msra.mxu1 %v5373_v43  ;;  %v927_v42 = vld [vmem:[#allocation8 + $0xfa8] sm:$0xff]  ;;  %v5419_v43 = vcombine.low %v914_v30, %v918_v31  ;;  %v449_v30 = vld [vmem:[#allocation8 + $0xb8] sm:$0xff] }
 0x1f3   :  { %3679 = vmatprep.subr.bf16.mxu0 %v5380_v50  ;;  %3843 = vmatprep.subr.bf16.mxu1 %v5382_v52  ;;  %v5421_v50 = vcombine.low %v915_v32, %v919_v33  ;;  %v5726_v52 = vld [vmem:[#allocation7] sm:$0xff]  ;;  %v5430_v54 = vcombine.high %v923_v40, %v927_v42  ;;  %v5429_v1 = vcombine.low %v923_v40, %v927_v42 }
 0x1f4   :  { %v149_v16 = vrot.slane %v5726_v52, %v148_v36  ;;  %v464_v52 = vld [vmem:[#allocation8 + $0x130] sm:$0xff] }
 0x1f6   :  { %3680 = vmatpush1.bf16.msra.mxu0 %v5379_v56  ;;  %3844 = vmatpush1.bf16.msra.mxu1 %v5381_v58  ;;  %v934_v56 = vld [vmem:[#allocation8 + $0xfe0] sm:$0xff]  ;;  %v931_v58 = vld [vmem:[#allocation8 + $0xfc8] sm:$0xff]  ;;  %v404_v3 = vadd.f32 %v6051_v59, %v149_v16  ;;  %v437_v59 = vld [vmem:[#allocation8 + $0x58] sm:$0xff] }
 0x1f7   :  { %3681 = vmatprep.subr.bf16.mxu0 %v5388_v62  ;;  %3845 = vmatprep.subr.bf16.mxu1 %v5390_v0  ;;  %v935_v62 = vld [vmem:[#allocation8 + $0xfe8] sm:$0xff]  ;;  %v5427_v0 = vcombine.low %v922_v39, %v926_v57  ;;  %v5436_v4 = vcombine.high %v930_v55, %v934_v56  ;;  %v5435_v12 = vcombine.low %v930_v55, %v934_v56  ;;  %v457_v39 = vld [vmem:[#allocation8 + $0xf8] sm:$0xff] }
 0x1f8   :  { %v5438_v6 = vcombine.high %v931_v58, %v935_v62  ;;  %v5437_v17 = vcombine.low %v931_v58, %v935_v62  ;;  %v416_v18 = vmax.f32 %v404_v3, 0.0  ;;  %v465_v16 = vld [vmem:[#allocation8 + $0x138] sm:$0xff]  ;;  %v468_v58 = vld [vmem:[#allocation8 + $0x150] sm:$0xff] }
 0x1f9   :  { %v472_v62 = vld [vmem:[#allocation8 + $0x170] sm:$0xff] }
 0x1fa   :  { %3682 = vmatpush1.bf16.msra.mxu0 %v5387_v8  ;;  %3846 = vmatpush1.bf16.msra.mxu1 %v5389_v9  ;;  %v428_v8 = vld [vmem:[#allocation8 + $0x10] sm:$0xff]  ;;  %v6095_v25 = vpack.c.bf16 %v416_v18, %v416_v18 }
 0x1fb   :  { %3683 = vmatprep.subr.bf16.mxu0 %v5396_v10  ;;  %3847 = vmatprep.subr.bf16.mxu1 %v5398_v11  ;;  %v432_v9 = vld [vmem:[#allocation8 + $0x30] sm:$0xff]  ;;  %v429_v10 = vld [vmem:[#allocation8 + $0x18] sm:$0xff] }
 0x1fc   :  { %v433_v11 = vld [vmem:[#allocation8 + $0x38] sm:$0xff]  ;;  %v4936_v19 = vcombine.high %v428_v8, %v432_v9  ;;  %v4935_v24 = vcombine.low %v428_v8, %v432_v9  ;;  %v476_v9 = vld [vmem:[#allocation8 + $0x190] sm:$0xff] }
 0x1fd   :  { %v4937_v26 = vcombine.low %v429_v10, %v433_v11 }
 0x1fe   :  { %3684 = vmatpush1.bf16.msra.mxu0 %v5395_v20  ;;  %3848 = vmatpush1.bf16.msra.mxu1 %v5397_v21  ;;  %v4938_v20 = vcombine.high %v429_v10, %v433_v11  ;;  %v436_v21 = vld [vmem:[#allocation8 + $0x50] sm:$0xff]  ;;  %v477_v11 = vld [vmem:[#allocation8 + $0x198] sm:$0xff] }
 0x1ff   :  { %3685 = vmatprep.subr.bf16.mxu0 %v5404_v22  ;;  %3849 = vmatprep.subr.bf16.mxu1 %v5406_v23  ;;  %v440_v22 = vld [vmem:[#allocation8 + $0x70] sm:$0xff]  ;;  %v441_v23 = vld [vmem:[#allocation8 + $0x78] sm:$0xff] }
 0x200   :  { %v4944_v46 = vcombine.high %v436_v21, %v440_v22  ;;  %v4943_v31 = vcombine.low %v436_v21, %v440_v22  ;;  %v4945_v32 = vcombine.low %v437_v59, %v441_v23  ;;  %v480_v10 = vld [vmem:[#allocation8 + $0x1b0] sm:$0xff] }
 0x201   :  { %v484_v21 = vld [vmem:[#allocation8 + $0x1d0] sm:$0xff] }
 0x202   :  { %3686 = vmatpush1.bf16.msra.mxu0 %v5403_v27  ;;  %3850 = vmatpush1.bf16.msra.mxu1 %v5405_v15  ;;  %v4946_v27 = vcombine.high %v437_v59, %v441_v23  ;;  %v444_v15 = vld [vmem:[#allocation8 + $0x90] sm:$0xff]  ;;  %v485_v59 = vld [vmem:[#allocation8 + $0x1d8] sm:$0xff] }
 0x203   :  { %3687 = vmatprep.subr.bf16.mxu0 %v5412_v28  ;;  %3851 = vmatprep.subr.bf16.mxu1 %v5414_v29  ;;  %v448_v28 = vld [vmem:[#allocation8 + $0xb0] sm:$0xff]  ;;  %v445_v29 = vld [vmem:[#allocation8 + $0x98] sm:$0xff] }
 0x204   :  { %v4952_v33 = vcombine.high %v444_v15, %v448_v28  ;;  %v4951_v57 = vcombine.low %v444_v15, %v448_v28  ;;  %v4953_v40 = vcombine.low %v445_v29, %v449_v30  ;;  %v488_v22 = vld [vmem:[#allocation8 + $0x1f0] sm:$0xff]  ;;  %v489_v23 = vld [vmem:[#allocation8 + $0x1f8] sm:$0xff] }
 0x205   :  { %v492_v15 = vld [vmem:[#allocation8 + $0x210] sm:$0xff] }
 0x206   :  { %3688 = vmatpush1.bf16.msra.mxu0 %v5411_v35  ;;  %3852 = vmatpush1.bf16.msra.mxu1 %v5413_v63  ;;  %v4954_v35 = vcombine.high %v445_v29, %v449_v30  ;;  %v452_v63 = vld [vmem:[#allocation8 + $0xd0] sm:$0xff]  ;;  %v493_v29 = vld [vmem:[#allocation8 + $0x218] sm:$0xff] }
 0x207   :  { %3689 = vmatprep.subr.bf16.mxu0 %v5420_v37  ;;  %3853 = vmatprep.subr.bf16.mxu1 %v5422_v38  ;;  %v456_v37 = vld [vmem:[#allocation8 + $0xf0] sm:$0xff]  ;;  %v453_v38 = vld [vmem:[#allocation8 + $0xd8] sm:$0xff] }
 0x208   :  { %v4960_v42 = vcombine.high %v452_v63, %v456_v37  ;;  %v496_v28 = vld [vmem:[#allocation8 + $0x230] sm:$0xff]  ;;  %v497_v30 = vld [vmem:[#allocation8 + $0x238] sm:$0xff] }
 0x20a   :  { %3690 = vmatpush1.bf16.msra.mxu0 %v5419_v43  ;;  %3854 = vmatpush1.bf16.msra.mxu1 %v5421_v50  ;;  %v4962_v43 = vcombine.high %v453_v38, %v457_v39  ;;  %v460_v50 = vld [vmem:[#allocation8 + $0x110] sm:$0xff] }
 0x20b   :  { %3691 = vmatprep.subr.bf16.mxu0 %v5428_v53  ;;  %3855 = vmatprep.subr.bf16.mxu1 %v5430_v54  ;;  %v4959_v53 = vcombine.low %v452_v63, %v456_v37  ;;  %v4961_v54 = vcombine.low %v453_v38, %v457_v39  ;;  %v4968_v55 = vcombine.high %v460_v50, %v464_v52  ;;  %v500_v63 = vld [vmem:[#allocation8 + $0x250] sm:$0xff]  ;;  %v501_v38 = vld [vmem:[#allocation8 + $0x258] sm:$0xff] }
 0x20c   :  { %v4967_v3 = vcombine.low %v460_v50, %v464_v52  ;;  %v504_v37 = vld [vmem:[#allocation8 + $0x270] sm:$0xff]  ;;  %v505_v39 = vld [vmem:[#allocation8 + $0x278] sm:$0xff] }
 0x20d   :  { %v508_v50 = vld [vmem:[#allocation8 + $0x290] sm:$0xff] }
 0x20e   :  { %3692 = vmatpush1.bf16.msra.mxu0 %v5427_v0  ;;  %3856 = vmatpush1.bf16.msra.mxu1 %v5429_v1  ;;  %v469_v0 = vld [vmem:[#allocation8 + $0x158] sm:$0xff]  ;;  %v512_v52 = vld [vmem:[#allocation8 + $0x2b0] sm:$0xff] }
 0x20f   :  { %3693 = vmatprep.subr.bf16.mxu0 %v5436_v4  ;;  %3857 = vmatprep.subr.bf16.mxu1 %v5438_v6  ;;  %v473_v1 = vld [vmem:[#allocation8 + $0x178] sm:$0xff]  ;;  %v4976_v6 = vcombine.high %v468_v58, %v472_v62 }
 0x210   :  { %v4978_v8 = vcombine.high %v469_v0, %v473_v1  ;;  %v4977_v18 = vcombine.low %v469_v0, %v473_v1  ;;  %v517_v0 = vld [vmem:[#allocation8 + $0x2d8] sm:$0xff] }
 0x211   :  { %v521_v1 = vld [vmem:[#allocation8 + $0x2f8] sm:$0xff] }
 0x212   :  { %3694 = vmatpush1.bf16.msra.mxu0 %v5435_v12  ;;  %3858 = vmatpush1.bf16.msra.mxu1 %v5437_v17  ;;  %v481_v12 = vld [vmem:[#allocation8 + $0x1b8] sm:$0xff]  ;;  %v4975_v17 = vcombine.low %v468_v58, %v472_v62  ;;  %v516_v58 = vld [vmem:[#allocation8 + $0x2d0] sm:$0xff] }
 0x213   :  { %3868 = vmatprep.subr.bf16.mxu0 %v4936_v19  ;;  %4032 = vmatprep.subr.bf16.mxu1 %v4938_v20  ;;  %v4984_v19 = vcombine.high %v476_v9, %v480_v10  ;;  %v4986_v20 = vcombine.high %v477_v11, %v481_v12  ;;  %v520_v62 = vld [vmem:[#allocation8 + $0x2f0] sm:$0xff] }
 0x215   :  { %3696 = vmatmul.mubr.bf16.vlgmr.msra.gmra.mrb[8].mxu0 %v6095_v25  ;;  %3860 = vmatmul.mubr.bf16.vlgmr.msra.gmra.mrb[8].mxu1 %v6095_v25 }
 0x216   :  { %3869 = vmatpush1.bf16.msra.mxu0 %v4935_v24  ;;  %3900 = vmatprep.mubr.bf16.mxu0 %v6035_v5  ;;  %v4983_v24 = vcombine.low %v476_v9, %v480_v10  ;;  %v524_v9 = vld [vmem:[#allocation8 + $0x310] sm:$0xff] }
 0x217   :  { %4033 = vmatpush1.bf16.msra.mxu1 %v4937_v26  ;;  %4064 = vmatprep.mubr.bf16.mxu1 %v6035_v5  ;;  %v461_v5 = vld [vmem:[#allocation8 + $0x118] sm:$0xff]  ;;  %v4985_v26 = vcombine.low %v477_v11, %v481_v12  ;;  %v528_v10 = vld [vmem:[#allocation8 + $0x330] sm:$0xff] }
 0x218   :  { %3870 = vmatprep.subr.bf16.mxu0 %v4944_v46  ;;  %4034 = vmatprep.subr.bf16.mxu1 %v4946_v27  ;;  %v4970_v56 = vcombine.high %v461_v5, %v465_v16  ;;  %v4969_v4 = vcombine.low %v461_v5, %v465_v16  ;;  %v4992_v46 = vcombine.high %v484_v21, %v488_v22  ;;  %v509_v5 = vld [vmem:[#allocation8 + $0x298] sm:$0xff] }
 0x219   :  { %v4994_v27 = vcombine.high %v485_v59, %v489_v23  ;;  %v513_v16 = vld [vmem:[#allocation8 + $0x2b8] sm:$0xff] }
 0x21a   :  { %3871 = vmatpush1.bf16.msra.mxu0 %v4943_v31  ;;  %v4991_v31 = vcombine.low %v484_v21, %v488_v22  ;;  %v525_v11 = vld [vmem:[#allocation8 + $0x318] sm:$0xff]  ;;  %v532_v21 = vld [vmem:[#allocation8 + $0x350] sm:$0xff] }
 0x21b   :  { %4035 = vmatpush1.bf16.msra.mxu1 %v4945_v32  ;;  %3872 = vmatprep.subr.bf16.mxu0 %v4952_v33  ;;  %v4993_v32 = vcombine.low %v485_v59, %v489_v23  ;;  %v5000_v33 = vcombine.high %v492_v15, %v496_v28  ;;  %v529_v12 = vld [vmem:[#allocation8 + $0x338] sm:$0xff]  ;;  %v536_v22 = vld [vmem:[#allocation8 + $0x370] sm:$0xff] }
 0x21c   :  { %4036 = vmatprep.subr.bf16.mxu1 %v4954_v35  ;;  %v5002_v35 = vcombine.high %v493_v29, %v497_v30  ;;  %v533_v59 = vld [vmem:[#allocation8 + $0x358] sm:$0xff] }
 0x21d   :  { %v537_v23 = vld [vmem:[#allocation8 + $0x378] sm:$0xff] }
 0x21e   :  { %3873 = vmatpush1.bf16.msra.mxu0 %v4951_v57  ;;  %v4999_v57 = vcombine.low %v492_v15, %v496_v28  ;;  %v540_v15 = vld [vmem:[#allocation8 + $0x390] sm:$0xff] }
 0x21f   :  { %4037 = vmatpush1.bf16.msra.mxu1 %v4953_v40  ;;  %3874 = vmatprep.subr.bf16.mxu0 %v4960_v42  ;;  %v5001_v40 = vcombine.low %v493_v29, %v497_v30  ;;  %v5008_v42 = vcombine.high %v500_v63, %v504_v37  ;;  %v544_v28 = vld [vmem:[#allocation8 + $0x3b0] sm:$0xff]  ;;  %v541_v29 = vld [vmem:[#allocation8 + $0x398] sm:$0xff] }
 0x220   :  { %4038 = vmatprep.subr.bf16.mxu1 %v4962_v43  ;;  %v5010_v43 = vcombine.high %v501_v38, %v505_v39  ;;  %v545_v30 = vld [vmem:[#allocation8 + $0x3b8] sm:$0xff] }
 0x222   :  { %3875 = vmatpush1.bf16.msra.mxu0 %v4959_v53  ;;  %v5007_v53 = vcombine.low %v500_v63, %v504_v37  ;;  %v548_v63 = vld [vmem:[#allocation8 + $0x3d0] sm:$0xff] }
 0x223   :  { %4039 = vmatpush1.bf16.msra.mxu1 %v4961_v54  ;;  %3876 = vmatprep.subr.bf16.mxu0 %v4968_v55  ;;  %v5009_v54 = vcombine.low %v501_v38, %v505_v39  ;;  %v5016_v55 = vcombine.high %v508_v50, %v512_v52  ;;  %v552_v37 = vld [vmem:[#allocation8 + $0x3f0] sm:$0xff]  ;;  %v549_v38 = vld [vmem:[#allocation8 + $0x3d8] sm:$0xff] }
 0x224   :  { %4040 = vmatprep.subr.bf16.mxu1 %v4970_v56  ;;  %v5018_v56 = vcombine.high %v509_v5, %v513_v16  ;;  %v553_v39 = vld [vmem:[#allocation8 + $0x3f8] sm:$0xff] }
 0x226   :  { %3877 = vmatpush1.bf16.msra.mxu0 %v4967_v3  ;;  %v5015_v3 = vcombine.low %v508_v50, %v512_v52  ;;  %v556_v50 = vld [vmem:[#allocation8 + $0x410] sm:$0xff] }
 0x227   :  { %4041 = vmatpush1.bf16.msra.mxu1 %v4969_v4  ;;  %3878 = vmatprep.subr.bf16.mxu0 %v4976_v6  ;;  %v5017_v4 = vcombine.low %v509_v5, %v513_v16  ;;  %v5024_v6 = vcombine.high %v516_v58, %v520_v62  ;;  %v560_v52 = vld [vmem:[#allocation8 + $0x430] sm:$0xff]  ;;  %v557_v5 = vld [vmem:[#allocation8 + $0x418] sm:$0xff] }
 0x228   :  { %4042 = vmatprep.subr.bf16.mxu1 %v4978_v8  ;;  %v5026_v8 = vcombine.high %v517_v0, %v521_v1  ;;  %v561_v16 = vld [vmem:[#allocation8 + $0x438] sm:$0xff] }
 0x22a   :  { %3879 = vmatpush1.bf16.msra.mxu0 %v4975_v17  ;;  %v5023_v17 = vcombine.low %v516_v58, %v520_v62  ;;  %v564_v58 = vld [vmem:[#allocation8 + $0x450] sm:$0xff] }
 0x22b   :  { %4043 = vmatpush1.bf16.msra.mxu1 %v4977_v18  ;;  %3880 = vmatprep.subr.bf16.mxu0 %v4984_v19  ;;  %v5025_v18 = vcombine.low %v517_v0, %v521_v1  ;;  %v5032_v19 = vcombine.high %v524_v9, %v528_v10  ;;  %v568_v62 = vld [vmem:[#allocation8 + $0x470] sm:$0xff]  ;;  %v5063_v0 = vcombine.low %v556_v50, %v560_v52  ;;  %v565_v1 = vld [vmem:[#allocation8 + $0x458] sm:$0xff] }
 0x22c   :  { %4044 = vmatprep.subr.bf16.mxu1 %v4986_v20  ;;  %v5034_v20 = vcombine.high %v525_v11, %v529_v12 }
 0x22e   :  { %3881 = vmatpush1.bf16.msra.mxu0 %v4983_v24  ;;  %v5031_v24 = vcombine.low %v524_v9, %v528_v10  ;;  %v576_v9 = vld [vmem:[#allocation8 + $0x4b0] sm:$0xff] }
 0x22f   :  { %4045 = vmatpush1.bf16.msra.mxu1 %v4985_v26  ;;  %3882 = vmatprep.subr.bf16.mxu0 %v4992_v46  ;;  %v5033_v26 = vcombine.low %v525_v11, %v529_v12  ;;  %v5040_v46 = vcombine.high %v532_v21, %v536_v22  ;;  %v573_v11 = vld [vmem:[#allocation8 + $0x498] sm:$0xff] }
 0x230   :  { %4046 = vmatprep.subr.bf16.mxu1 %v4994_v27  ;;  %v5042_v27 = vcombine.high %v533_v59, %v537_v23  ;;  %v577_v12 = vld [vmem:[#allocation8 + $0x4b8] sm:$0xff] }
 0x232   :  { %3883 = vmatpush1.bf16.msra.mxu0 %v4991_v31  ;;  %v5039_v31 = vcombine.low %v532_v21, %v536_v22  ;;  %v580_v21 = vld [vmem:[#allocation8 + $0x4d0] sm:$0xff] }
 0x233   :  { %4047 = vmatpush1.bf16.msra.mxu1 %v4993_v32  ;;  %3884 = vmatprep.subr.bf16.mxu0 %v5000_v33  ;;  %v5041_v32 = vcombine.low %v533_v59, %v537_v23  ;;  %v5048_v33 = vcombine.high %v540_v15, %v544_v28  ;;  %v584_v22 = vld [vmem:[#allocation8 + $0x4f0] sm:$0xff]  ;;  %v581_v59 = vld [vmem:[#allocation8 + $0x4d8] sm:$0xff] }
 0x234   :  { %4048 = vmatprep.subr.bf16.mxu1 %v5002_v35  ;;  %v5050_v35 = vcombine.high %v541_v29, %v545_v30  ;;  %v585_v23 = vld [vmem:[#allocation8 + $0x4f8] sm:$0xff] }
 0x236   :  { %3885 = vmatpush1.bf16.msra.mxu0 %v4999_v57  ;;  %v5047_v57 = vcombine.low %v540_v15, %v544_v28  ;;  %v592_v15 = vld [vmem:[#allocation8 + $0x530] sm:$0xff]  ;;  %v589_v28 = vld [vmem:[#allocation8 + $0x518] sm:$0xff] }
 0x237   :  { %4049 = vmatpush1.bf16.msra.mxu1 %v5001_v40  ;;  %3886 = vmatprep.subr.bf16.mxu0 %v5008_v42  ;;  %v5049_v40 = vcombine.low %v541_v29, %v545_v30  ;;  %v5056_v42 = vcombine.high %v548_v63, %v552_v37  ;;  %v593_v29 = vld [vmem:[#allocation8 + $0x538] sm:$0xff]  ;;  %v5089_v30 = vcombine.low %v581_v59, %v585_v23 }
 0x238   :  { %4050 = vmatprep.subr.bf16.mxu1 %v5010_v43  ;;  %v5058_v43 = vcombine.high %v549_v38, %v553_v39 }
 0x23a   :  { %3887 = vmatpush1.bf16.msra.mxu0 %v5007_v53  ;;  %v5055_v53 = vcombine.low %v548_v63, %v552_v37  ;;  %v597_v63 = vld [vmem:[#allocation8 + $0x558] sm:$0xff] }
 0x23b   :  { %4051 = vmatpush1.bf16.msra.mxu1 %v5009_v54  ;;  %3888 = vmatprep.subr.bf16.mxu0 %v5016_v55  ;;  %v5057_v54 = vcombine.low %v549_v38, %v553_v39  ;;  %v5064_v55 = vcombine.high %v556_v50, %v560_v52  ;;  %v601_v37 = vld [vmem:[#allocation8 + $0x578] sm:$0xff]  ;;  %v5097_v39 = vcombine.low %v589_v28, %v593_v29 }
 0x23c   :  { %4052 = vmatprep.subr.bf16.mxu1 %v5018_v56  ;;  %v5066_v56 = vcombine.high %v557_v5, %v561_v16  ;;  %v605_v50 = vld [vmem:[#allocation8 + $0x598] sm:$0xff] }
 0x23d   :  { %v609_v52 = vld [vmem:[#allocation8 + $0x5b8] sm:$0xff] }
 0x23e   :  { %3889 = vmatpush1.bf16.msra.mxu0 %v5015_v3  ;;  %v569_v3 = vld [vmem:[#allocation8 + $0x478] sm:$0xff] }
 0x23f   :  { %4053 = vmatpush1.bf16.msra.mxu1 %v5017_v4  ;;  %3890 = vmatprep.subr.bf16.mxu0 %v5024_v6  ;;  %v5065_v4 = vcombine.low %v557_v5, %v561_v16  ;;  %v5072_v6 = vcombine.high %v564_v58, %v568_v62  ;;  %v5074_v10 = vcombine.high %v565_v1, %v569_v3 }
 0x240   :  { %4054 = vmatprep.subr.bf16.mxu1 %v5026_v8  ;;  %v572_v8 = vld [vmem:[#allocation8 + $0x490] sm:$0xff]  ;;  %v5105_v16 = vcombine.low %v597_v63, %v601_v37 }
 0x242   :  { %3891 = vmatpush1.bf16.msra.mxu0 %v5023_v17  ;;  %v5071_v17 = vcombine.low %v564_v58, %v568_v62  ;;  %v613_v58 = vld [vmem:[#allocation8 + $0x5d8] sm:$0xff] }
 0x243   :  { %4055 = vmatpush1.bf16.msra.mxu1 %v5025_v18  ;;  %3892 = vmatprep.subr.bf16.mxu0 %v5032_v19  ;;  %v5073_v18 = vcombine.low %v565_v1, %v569_v3  ;;  %v5080_v19 = vcombine.high %v572_v8, %v576_v9  ;;  %v617_v62 = vld [vmem:[#allocation8 + $0x5f8] sm:$0xff]  ;;  %v5113_v1 = vcombine.low %v605_v50, %v609_v52 }
 0x244   :  { %4056 = vmatprep.subr.bf16.mxu1 %v5034_v20  ;;  %v5082_v20 = vcombine.high %v573_v11, %v577_v12 }
 0x246   :  { %3893 = vmatpush1.bf16.msra.mxu0 %v5031_v24  ;;  %v5079_v24 = vcombine.low %v572_v8, %v576_v9  ;;  %v624_v8 = vld [vmem:[#allocation8 + $0x630] sm:$0xff]  ;;  %v621_v9 = vld [vmem:[#allocation8 + $0x618] sm:$0xff] }
 0x247   :  { %4057 = vmatpush1.bf16.msra.mxu1 %v5033_v26  ;;  %3894 = vmatprep.subr.bf16.mxu0 %v5040_v46  ;;  %v5088_v26 = vcombine.high %v580_v21, %v584_v22  ;;  %v5090_v46 = vcombine.high %v581_v59, %v585_v23 }
 0x248   :  { %4058 = vmatprep.subr.bf16.mxu1 %v5042_v27  ;;  %v588_v27 = vld [vmem:[#allocation8 + $0x510] sm:$0xff] }
 0x249   :  { %v5095_v38 = vcombine.low %v588_v27, %v592_v15 }
 0x24a   :  { %3895 = vmatpush1.bf16.msra.mxu0 %v5039_v31  ;;  %v5096_v31 = vcombine.high %v588_v27, %v592_v15  ;;  %v637_v27 = vld [vmem:[#allocation8 + $0x698] sm:$0xff] }
 0x24b   :  { %4059 = vmatpush1.bf16.msra.mxu1 %v5041_v32  ;;  %3896 = vmatprep.subr.bf16.mxu0 %v5048_v33  ;;  %v5098_v32 = vcombine.high %v589_v28, %v593_v29  ;;  %v596_v33 = vld [vmem:[#allocation8 + $0x550] sm:$0xff]  ;;  %v641_v15 = vld [vmem:[#allocation8 + $0x6b8] sm:$0xff] }
 0x24c   :  { %4060 = vmatprep.subr.bf16.mxu1 %v5050_v35  ;;  %v600_v35 = vld [vmem:[#allocation8 + $0x570] sm:$0xff] }
 0x24d   :  { %v5103_v5 = vcombine.low %v596_v33, %v600_v35 }
 0x24e   :  { %3897 = vmatpush1.bf16.msra.mxu0 %v5047_v57  ;;  %v5104_v57 = vcombine.high %v596_v33, %v600_v35  ;;  %v645_v33 = vld [vmem:[#allocation8 + $0x6d8] sm:$0xff] }
 0x24f   :  { %4061 = vmatpush1.bf16.msra.mxu1 %v5049_v40  ;;  %3898 = vmatprep.subr.bf16.mxu0 %v5056_v42  ;;  %v5106_v40 = vcombine.high %v597_v63, %v601_v37  ;;  %v604_v42 = vld [vmem:[#allocation8 + $0x590] sm:$0xff]  ;;  %v649_v35 = vld [vmem:[#allocation8 + $0x6f8] sm:$0xff]  ;;  %v5145_v37 = vcombine.low %v637_v27, %v641_v15 }
 0x250   :  { %4062 = vmatprep.subr.bf16.mxu1 %v5058_v43  ;;  %v608_v43 = vld [vmem:[#allocation8 + $0x5b0] sm:$0xff] }
 0x252   :  { %3899 = vmatpush1.bf16.msra.mxu0 %v5055_v53  ;;  %v5112_v53 = vcombine.high %v604_v42, %v608_v43 }
 0x253   :  { %4063 = vmatpush1.bf16.msra.mxu1 %v5057_v54  ;;  %3909 = vmatprep.subr.bf16.mxu0 %v5064_v55  ;;  %v5114_v54 = vcombine.high %v605_v50, %v609_v52  ;;  %v612_v55 = vld [vmem:[#allocation8 + $0x5d0] sm:$0xff]  ;;  %v5153_v52 = vcombine.low %v645_v33, %v649_v35 }
 0x254   :  { %4073 = vmatprep.subr.bf16.mxu1 %v5066_v56  ;;  %v616_v56 = vld [vmem:[#allocation8 + $0x5f0] sm:$0xff] }
 0x255   :  { %3901 = vmatmul.mubr.bf16.vlgmr.msra.gmra.mrb[12].mxu0 %v6037_v7  ;;  %v5120_v3 = vcombine.high %v612_v55, %v616_v56 }
 0x256   :  { %4065 = vmatmul.mubr.bf16.vlgmr.msra.gmra.mrb[12].mxu1 %v6037_v7  ;;  %3910 = vmatpush1.bf16.msra.mxu0 %v5063_v0  ;;  %v5081_v7 = vcombine.low %v573_v11, %v577_v12  ;;  %v5111_v0 = vcombine.low %v604_v42, %v608_v43  ;;  %v5119_v11 = vcombine.low %v612_v55, %v616_v56  ;;  %v653_v42 = vld [vmem:[#allocation8 + $0x718] sm:$0xff] }
 0x257   :  { %3941 = vmatprep.mubr.bf16.mxu0 %v6041_v14  ;;  %4074 = vmatpush1.bf16.msra.mxu1 %v5065_v4  ;;  %v5122_v4 = vcombine.high %v613_v58, %v617_v62  ;;  %v5121_v12 = vcombine.low %v613_v58, %v617_v62  ;;  %v657_v43 = vld [vmem:[#allocation8 + $0x738] sm:$0xff] }
 0x258   :  { %4105 = vmatprep.mubr.bf16.mxu1 %v6041_v14  ;;  %3911 = vmatprep.subr.bf16.mxu0 %v5072_v6  ;;  %v5087_v14 = vcombine.low %v580_v21, %v584_v22  ;;  %v620_v6 = vld [vmem:[#allocation8 + $0x610] sm:$0xff]  ;;  %v629_v21 = vld [vmem:[#allocation8 + $0x658] sm:$0xff]  ;;  %v5161_v62 = vcombine.low %v653_v42, %v657_v43 }
 0x259   :  { %4075 = vmatprep.subr.bf16.mxu1 %v5074_v10  ;;  %v625_v10 = vld [vmem:[#allocation8 + $0x638] sm:$0xff]  ;;  %v5127_v59 = vcombine.low %v620_v6, %v624_v8 }
 0x25a   :  { %3912 = vmatpush1.bf16.msra.mxu0 %v5071_v17  ;;  %v5128_v17 = vcombine.high %v620_v6, %v624_v8  ;;  %v633_v22 = vld [vmem:[#allocation8 + $0x678] sm:$0xff]  ;;  %v5129_v23 = vcombine.low %v621_v9, %v625_v10 }
 0x25b   :  { %4076 = vmatpush1.bf16.msra.mxu1 %v5073_v18  ;;  %3913 = vmatprep.subr.bf16.mxu0 %v5080_v19  ;;  %v5130_v18 = vcombine.high %v621_v9, %v625_v10  ;;  %v628_v19 = vld [vmem:[#allocation8 + $0x650] sm:$0xff]  ;;  %v5137_v29 = vcombine.low %v629_v21, %v633_v22  ;;  %v661_v55 = vld [vmem:[#allocation8 + $0x758] sm:$0xff] }
 0x25c   :  { %4077 = vmatprep.subr.bf16.mxu1 %v5082_v20  ;;  %v632_v20 = vld [vmem:[#allocation8 + $0x670] sm:$0xff]  ;;  %v665_v56 = vld [vmem:[#allocation8 + $0x778] sm:$0xff] }
 0x25d   :  { %v5135_v28 = vcombine.low %v628_v19, %v632_v20  ;;  %v669_v6 = vld [vmem:[#allocation8 + $0x798] sm:$0xff]  ;;  %v5169_v10 = vcombine.low %v661_v55, %v665_v56 }
 0x25e   :  { %3914 = vmatpush1.bf16.msra.mxu0 %v5079_v24  ;;  %v5136_v24 = vcombine.high %v628_v19, %v632_v20  ;;  %v673_v8 = vld [vmem:[#allocation8 + $0x7b8] sm:$0xff] }
 0x25f   :  { %4078 = vmatpush1.bf16.msra.mxu1 %v5081_v7  ;;  %3915 = vmatprep.subr.bf16.mxu0 %v5088_v26  ;;  %v5138_v7 = vcombine.high %v629_v21, %v633_v22  ;;  %v636_v26 = vld [vmem:[#allocation8 + $0x690] sm:$0xff]  ;;  %v677_v19 = vld [vmem:[#allocation8 + $0x7d8] sm:$0xff]  ;;  %v5177_v22 = vcombine.low %v669_v6, %v673_v8 }
 0x260   :  { %4079 = vmatprep.subr.bf16.mxu1 %v5090_v46  ;;  %v640_v46 = vld [vmem:[#allocation8 + $0x6b0] sm:$0xff]  ;;  %v681_v20 = vld [vmem:[#allocation8 + $0x7f8] sm:$0xff] }
 0x261   :  { %v5143_v63 = vcombine.low %v636_v26, %v640_v46 }
 0x262   :  { %3916 = vmatpush1.bf16.msra.mxu0 %v5087_v14  ;;  %v5144_v14 = vcombine.high %v636_v26, %v640_v46  ;;  %v685_v26 = vld [vmem:[#allocation8 + $0x818] sm:$0xff] }
 0x263   :  { %4080 = vmatpush1.bf16.msra.mxu1 %v5089_v30  ;;  %3917 = vmatprep.subr.bf16.mxu0 %v5096_v31  ;;  %v5146_v30 = vcombine.high %v637_v27, %v641_v15  ;;  %v644_v31 = vld [vmem:[#allocation8 + $0x6d0] sm:$0xff]  ;;  %v689_v46 = vld [vmem:[#allocation8 + $0x838] sm:$0xff]  ;;  %v5185_v15 = vcombine.low %v677_v19, %v681_v20 }
 0x264   :  { %4081 = vmatprep.subr.bf16.mxu1 %v5098_v32  ;;  %v648_v32 = vld [vmem:[#allocation8 + $0x6f0] sm:$0xff] }
 0x265   :  { %v5151_v50 = vcombine.low %v644_v31, %v648_v32 }
 0x266   :  { %3918 = vmatpush1.bf16.msra.mxu0 %v5095_v38  ;;  %v5152_v38 = vcombine.high %v644_v31, %v648_v32  ;;  %v693_v32 = vld [vmem:[#allocation8 + $0x858] sm:$0xff] }
 0x267   :  { %4082 = vmatpush1.bf16.msra.mxu1 %v5097_v39  ;;  %3919 = vmatprep.subr.bf16.mxu0 %v5104_v57  ;;  %v5154_v39 = vcombine.high %v645_v33, %v649_v35  ;;  %v652_v57 = vld [vmem:[#allocation8 + $0x710] sm:$0xff]  ;;  %v697_v33 = vld [vmem:[#allocation8 + $0x878] sm:$0xff]  ;;  %v5193_v35 = vcombine.low %v685_v26, %v689_v46 }
 0x268   :  { %4083 = vmatprep.subr.bf16.mxu1 %v5106_v40  ;;  %v656_v40 = vld [vmem:[#allocation8 + $0x730] sm:$0xff] }
 0x269   :  { %v5159_v58 = vcombine.low %v652_v57, %v656_v40 }
 0x26a   :  { %3920 = vmatpush1.bf16.msra.mxu0 %v5103_v5  ;;  %v5160_v5 = vcombine.high %v652_v57, %v656_v40  ;;  %v701_v57 = vld [vmem:[#allocation8 + $0x898] sm:$0xff] }
 0x26b   :  { %4084 = vmatpush1.bf16.msra.mxu1 %v5105_v16  ;;  %3921 = vmatprep.subr.bf16.mxu0 %v5112_v53  ;;  %v5162_v16 = vcombine.high %v653_v42, %v657_v43  ;;  %v660_v53 = vld [vmem:[#allocation8 + $0x750] sm:$0xff]  ;;  %v705_v40 = vld [vmem:[#allocation8 + $0x8b8] sm:$0xff]  ;;  %v5201_v43 = vcombine.low %v693_v32, %v697_v33 }
 0x26c   :  { %4085 = vmatprep.subr.bf16.mxu1 %v5114_v54  ;;  %v664_v54 = vld [vmem:[#allocation8 + $0x770] sm:$0xff] }
 0x26d   :  { %v5167_v9 = vcombine.low %v660_v53, %v664_v54 }
 0x26e   :  { %3922 = vmatpush1.bf16.msra.mxu0 %v5111_v0  ;;  %v5168_v0 = vcombine.high %v660_v53, %v664_v54  ;;  %v709_v53 = vld [vmem:[#allocation8 + $0x8d8] sm:$0xff] }
 0x26f   :  { %4086 = vmatpush1.bf16.msra.mxu1 %v5113_v1  ;;  %3923 = vmatprep.subr.bf16.mxu0 %v5120_v3  ;;  %v5170_v1 = vcombine.high %v661_v55, %v665_v56  ;;  %v668_v3 = vld [vmem:[#allocation8 + $0x790] sm:$0xff]  ;;  %v713_v54 = vld [vmem:[#allocation8 + $0x8f8] sm:$0xff] }
 0x270   :  { %4087 = vmatprep.subr.bf16.mxu1 %v5122_v4  ;;  %v672_v4 = vld [vmem:[#allocation8 + $0x7b0] sm:$0xff] }
 0x271   :  { %v5175_v21 = vcombine.low %v668_v3, %v672_v4 }
 0x272   :  { %3924 = vmatpush1.bf16.msra.mxu0 %v5119_v11  ;;  %v5176_v11 = vcombine.high %v668_v3, %v672_v4  ;;  %v721_v3 = vld [vmem:[#allocation8 + $0x938] sm:$0xff]  ;;  %v5217_v4 = vcombine.low %v709_v53, %v713_v54 }
 0x273   :  { %4088 = vmatpush1.bf16.msra.mxu1 %v5121_v12  ;;  %3925 = vmatprep.subr.bf16.mxu0 %v5128_v17  ;;  %v5178_v12 = vcombine.high %v669_v6, %v673_v8  ;;  %v676_v17 = vld [vmem:[#allocation8 + $0x7d0] sm:$0xff] }
 0x274   :  { %4089 = vmatprep.subr.bf16.mxu1 %v5130_v18  ;;  %v680_v18 = vld [vmem:[#allocation8 + $0x7f0] sm:$0xff] }
 0x275   :  { %v5183_v27 = vcombine.low %v676_v17, %v680_v18 }
 0x276   :  { %3926 = vmatpush1.bf16.msra.mxu0 %v5127_v59  ;;  %v5184_v59 = vcombine.high %v676_v17, %v680_v18 }
 0x277   :  { %4090 = vmatpush1.bf16.msra.mxu1 %v5129_v23  ;;  %3927 = vmatprep.subr.bf16.mxu0 %v5136_v24  ;;  %v5186_v23 = vcombine.high %v677_v19, %v681_v20  ;;  %v684_v24 = vld [vmem:[#allocation8 + $0x810] sm:$0xff] }
 0x278   :  { %4091 = vmatprep.subr.bf16.mxu1 %v5138_v7  ;;  %v688_v7 = vld [vmem:[#allocation8 + $0x830] sm:$0xff] }
 0x279   :  { %v5191_v31 = vcombine.low %v684_v24, %v688_v7 }
 0x27a   :  { %3928 = vmatpush1.bf16.msra.mxu0 %v5135_v28  ;;  %v5192_v28 = vcombine.high %v684_v24, %v688_v7 }
 0x27b   :  { %4092 = vmatpush1.bf16.msra.mxu1 %v5137_v29  ;;  %3929 = vmatprep.subr.bf16.mxu0 %v5144_v14  ;;  %v5194_v29 = vcombine.high %v685_v26, %v689_v46  ;;  %v692_v14 = vld [vmem:[#allocation8 + $0x850] sm:$0xff] }
 0x27c   :  { %4093 = vmatprep.subr.bf16.mxu1 %v5146_v30  ;;  %v696_v30 = vld [vmem:[#allocation8 + $0x870] sm:$0xff] }
 0x27d   :  { %v5199_v42 = vcombine.low %v692_v14, %v696_v30 }
 0x27e   :  { %3930 = vmatpush1.bf16.msra.mxu0 %v5143_v63  ;;  %v5200_v63 = vcombine.high %v692_v14, %v696_v30 }
 0x27f   :  { %4094 = vmatpush1.bf16.msra.mxu1 %v5145_v37  ;;  %3931 = vmatprep.subr.bf16.mxu0 %v5152_v38  ;;  %v700_v37 = vld [vmem:[#allocation8 + $0x890] sm:$0xff] }
 0x280   :  { %4095 = vmatprep.subr.bf16.mxu1 %v5154_v39  ;;  %v704_v38 = vld [vmem:[#allocation8 + $0x8b0] sm:$0xff]  ;;  %v5202_v39 = vcombine.high %v693_v32, %v697_v33 }
 0x281   :  { %v5207_v55 = vcombine.low %v700_v37, %v704_v38  ;;  %v748_v33 = vld [vmem:[#allocation8 + $0xa10] sm:$0xff] }
 0x282   :  { %3932 = vmatpush1.bf16.msra.mxu0 %v5151_v50  ;;  %v5208_v50 = vcombine.high %v700_v37, %v704_v38  ;;  %v753_v37 = vld [vmem:[#allocation8 + $0xa38] sm:$0xff] }
 0x283   :  { %4096 = vmatpush1.bf16.msra.mxu1 %v5153_v52  ;;  %3933 = vmatprep.subr.bf16.mxu0 %v5160_v5  ;;  %v5210_v52 = vcombine.high %v701_v57, %v705_v40  ;;  %v708_v5 = vld [vmem:[#allocation8 + $0x8d0] sm:$0xff] }
 0x284   :  { %4097 = vmatprep.subr.bf16.mxu1 %v5162_v16  ;;  %v712_v16 = vld [vmem:[#allocation8 + $0x8f0] sm:$0xff] }
 0x285   :  { %v5216_v56 = vcombine.high %v708_v5, %v712_v16 }
 0x286   :  { %3934 = vmatpush1.bf16.msra.mxu0 %v5159_v58  ;;  %v5218_v58 = vcombine.high %v709_v53, %v713_v54 }
 0x287   :  { %4098 = vmatpush1.bf16.msra.mxu1 %v5161_v62  ;;  %3935 = vmatprep.subr.bf16.mxu0 %v5168_v0  ;;  %v716_v62 = vld [vmem:[#allocation8 + $0x910] sm:$0xff] }
 0x288   :  { %4099 = vmatprep.subr.bf16.mxu1 %v5170_v1  ;;  %v720_v0 = vld [vmem:[#allocation8 + $0x930] sm:$0xff]  ;;  %v717_v1 = vld [vmem:[#allocation8 + $0x918] sm:$0xff] }
 0x289   :  { %v5224_v6 = vcombine.high %v716_v62, %v720_v0  ;;  %v5226_v8 = vcombine.high %v717_v1, %v721_v3  ;;  %v5223_v17 = vcombine.low %v716_v62, %v720_v0  ;;  %v5225_v18 = vcombine.low %v717_v1, %v721_v3 }
 0x28a   :  { %3936 = vmatpush1.bf16.msra.mxu0 %v5167_v9  ;;  %v724_v9 = vld [vmem:[#allocation8 + $0x950] sm:$0xff] }
 0x28b   :  { %4100 = vmatpush1.bf16.msra.mxu1 %v5169_v10  ;;  %3937 = vmatprep.subr.bf16.mxu0 %v5176_v11  ;;  %v728_v10 = vld [vmem:[#allocation8 + $0x970] sm:$0xff]  ;;  %v725_v11 = vld [vmem:[#allocation8 + $0x958] sm:$0xff] }
 0x28c   :  { %4101 = vmatprep.subr.bf16.mxu1 %v5178_v12  ;;  %v729_v12 = vld [vmem:[#allocation8 + $0x978] sm:$0xff]  ;;  %v5232_v19 = vcombine.high %v724_v9, %v728_v10  ;;  %v5231_v24 = vcombine.low %v724_v9, %v728_v10 }
 0x28d   :  { %v5234_v20 = vcombine.high %v725_v11, %v729_v12  ;;  %v5233_v7 = vcombine.low %v725_v11, %v729_v12 }
 0x28e   :  { %3938 = vmatpush1.bf16.msra.mxu0 %v5175_v21  ;;  %v732_v21 = vld [vmem:[#allocation8 + $0x990] sm:$0xff] }
 0x28f   :  { %4102 = vmatpush1.bf16.msra.mxu1 %v5177_v22  ;;  %3939 = vmatprep.subr.bf16.mxu0 %v5184_v59  ;;  %v736_v22 = vld [vmem:[#allocation8 + $0x9b0] sm:$0xff]  ;;  %v733_v59 = vld [vmem:[#allocation8 + $0x998] sm:$0xff] }
 0x290   :  { %4103 = vmatprep.subr.bf16.mxu1 %v5186_v23  ;;  %v737_v23 = vld [vmem:[#allocation8 + $0x9b8] sm:$0xff]  ;;  %v5240_v26 = vcombine.high %v732_v21, %v736_v22  ;;  %v5239_v14 = vcombine.low %v732_v21, %v736_v22 }
 0x291   :  { %v5242_v46 = vcombine.high %v733_v59, %v737_v23  ;;  %v5241_v30 = vcombine.low %v733_v59, %v737_v23 }
 0x292   :  { %3940 = vmatpush1.bf16.msra.mxu0 %v5183_v27  ;;  %v740_v27 = vld [vmem:[#allocation8 + $0x9d0] sm:$0xff] }
 0x293   :  { %4104 = vmatpush1.bf16.msra.mxu1 %v5185_v15  ;;  %3950 = vmatprep.subr.bf16.mxu0 %v5192_v28  ;;  %v744_v15 = vld [vmem:[#allocation8 + $0x9f0] sm:$0xff]  ;;  %v741_v28 = vld [vmem:[#allocation8 + $0x9d8] sm:$0xff] }
 0x294   :  { %4114 = vmatprep.subr.bf16.mxu1 %v5194_v29  ;;  %v745_v29 = vld [vmem:[#allocation8 + $0x9f8] sm:$0xff]  ;;  %v5247_v38 = vcombine.low %v740_v27, %v744_v15 }
 0x295   :  { %3942 = vmatmul.mubr.bf16.vlgmr.msra.gmra.mrb[12].mxu0 %v6065_v51  ;;  %v5250_v32 = vcombine.high %v741_v28, %v745_v29 }
 0x296   :  { %4106 = vmatmul.mubr.bf16.vlgmr.msra.gmra.mrb[12].mxu1 %v6065_v51  ;;  %3951 = vmatpush1.bf16.msra.mxu0 %v5191_v31  ;;  %v5209_v51 = vcombine.low %v701_v57, %v705_v40  ;;  %v5248_v31 = vcombine.high %v740_v27, %v744_v15 }
 0x297   :  { %3982 = vmatprep.mubr.bf16.mxu0 %v6067_v61  ;;  %4115 = vmatpush1.bf16.msra.mxu1 %v5193_v35  ;;  %v752_v35 = vld [vmem:[#allocation8 + $0xa30] sm:$0xff] }
 0x298   :  { %4146 = vmatprep.mubr.bf16.mxu1 %v6067_v61  ;;  %3952 = vmatprep.subr.bf16.mxu0 %v5200_v63  ;;  %v5215_v61 = vcombine.low %v708_v5, %v712_v16  ;;  %v749_v63 = vld [vmem:[#allocation8 + $0xa18] sm:$0xff]  ;;  %v5256_v57 = vcombine.high %v748_v33, %v752_v35  ;;  %v5255_v5 = vcombine.low %v748_v33, %v752_v35 }
 0x299   :  { %4116 = vmatprep.subr.bf16.mxu1 %v5202_v39  ;;  %v5249_v39 = vcombine.low %v741_v28, %v745_v29  ;;  %v5258_v40 = vcombine.high %v749_v63, %v753_v37  ;;  %v5257_v16 = vcombine.low %v749_v63, %v753_v37 }
 0x29a   :  { %3953 = vmatpush1.bf16.msra.mxu0 %v5199_v42  ;;  %v756_v42 = vld [vmem:[#allocation8 + $0xa50] sm:$0xff] }
 0x29b   :  { %4117 = vmatpush1.bf16.msra.mxu1 %v5201_v43  ;;  %3954 = vmatprep.subr.bf16.mxu0 %v5208_v50  ;;  %v760_v43 = vld [vmem:[#allocation8 + $0xa70] sm:$0xff]  ;;  %v757_v50 = vld [vmem:[#allocation8 + $0xa58] sm:$0xff] }
 0x29c   :  { %4118 = vmatprep.subr.bf16.mxu1 %v5210_v52  ;;  %v761_v52 = vld [vmem:[#allocation8 + $0xa78] sm:$0xff]  ;;  %v5264_v53 = vcombine.high %v756_v42, %v760_v43  ;;  %v5263_v62 = vcombine.low %v756_v42, %v760_v43 }
 0x29d   :  { %v5266_v54 = vcombine.high %v757_v50, %v761_v52  ;;  %v5265_v0 = vcombine.low %v757_v50, %v761_v52 }
 0x29e   :  { %3955 = vmatpush1.bf16.msra.mxu0 %v5207_v55  ;;  %v764_v55 = vld [vmem:[#allocation8 + $0xa90] sm:$0xff] }
 0x29f   :  { %4119 = vmatpush1.bf16.msra.mxu1 %v5209_v51  ;;  %3956 = vmatprep.subr.bf16.mxu0 %v5216_v56  ;;  %v768_v51 = vld [vmem:[#allocation8 + $0xab0] sm:$0xff]  ;;  %v765_v56 = vld [vmem:[#allocation8 + $0xa98] sm:$0xff] }
 0x2a0   :  { %4120 = vmatprep.subr.bf16.mxu1 %v5218_v58  ;;  %v769_v58 = vld [vmem:[#allocation8 + $0xab8] sm:$0xff]  ;;  %v5272_v1 = vcombine.high %v764_v55, %v768_v51  ;;  %v5271_v9 = vcombine.low %v764_v55, %v768_v51 }
 0x2a1   :  { %v5274_v3 = vcombine.high %v765_v56, %v769_v58  ;;  %v5273_v10 = vcombine.low %v765_v56, %v769_v58 }
 0x2a2   :  { %3957 = vmatpush1.bf16.msra.mxu0 %v5215_v61  ;;  %v772_v61 = vld [vmem:[#allocation8 + $0xad0] sm:$0xff] }
 0x2a3   :  { %4121 = vmatpush1.bf16.msra.mxu1 %v5217_v4  ;;  %3958 = vmatprep.subr.bf16.mxu0 %v5224_v6  ;;  %v776_v4 = vld [vmem:[#allocation8 + $0xaf0] sm:$0xff]  ;;  %v773_v6 = vld [vmem:[#allocation8 + $0xad8] sm:$0xff] }
 0x2a4   :  { %4122 = vmatprep.subr.bf16.mxu1 %v5226_v8  ;;  %v777_v8 = vld [vmem:[#allocation8 + $0xaf8] sm:$0xff]  ;;  %v5280_v11 = vcombine.high %v772_v61, %v776_v4  ;;  %v5279_v21 = vcombine.low %v772_v61, %v776_v4 }
 0x2a5   :  { %v5282_v12 = vcombine.high %v773_v6, %v777_v8  ;;  %v5281_v22 = vcombine.low %v773_v6, %v777_v8  ;;  %v825_v61 = vld [vmem:[#allocation8 + $0xc78] sm:$0xff]  ;;  %v828_v8 = vld [vmem:[#allocation8 + $0xc90] sm:$0xff] }
 0x2a6   :  { %3959 = vmatpush1.bf16.msra.mxu0 %v5223_v17  ;;  %v780_v17 = vld [vmem:[#allocation8 + $0xb10] sm:$0xff] }
 0x2a7   :  { %4123 = vmatpush1.bf16.msra.mxu1 %v5225_v18  ;;  %3960 = vmatprep.subr.bf16.mxu0 %v5232_v19  ;;  %v784_v18 = vld [vmem:[#allocation8 + $0xb30] sm:$0xff]  ;;  %v781_v19 = vld [vmem:[#allocation8 + $0xb18] sm:$0xff] }
 0x2a8   :  { %4124 = vmatprep.subr.bf16.mxu1 %v5234_v20  ;;  %v785_v20 = vld [vmem:[#allocation8 + $0xb38] sm:$0xff]  ;;  %v5288_v59 = vcombine.high %v780_v17, %v784_v18  ;;  %v5287_v27 = vcombine.low %v780_v17, %v784_v18 }
 0x2a9   :  { %v5290_v23 = vcombine.high %v781_v19, %v785_v20  ;;  %v5289_v15 = vcombine.low %v781_v19, %v785_v20 }
 0x2aa   :  { %3961 = vmatpush1.bf16.msra.mxu0 %v5231_v24  ;;  %v788_v24 = vld [vmem:[#allocation8 + $0xb50] sm:$0xff] }
 0x2ab   :  { %4125 = vmatpush1.bf16.msra.mxu1 %v5233_v7  ;;  %3962 = vmatprep.subr.bf16.mxu0 %v5240_v26  ;;  %v792_v7 = vld [vmem:[#allocation8 + $0xb70] sm:$0xff]  ;;  %v789_v26 = vld [vmem:[#allocation8 + $0xb58] sm:$0xff] }
 0x2ac   :  { %4126 = vmatprep.subr.bf16.mxu1 %v5242_v46  ;;  %v793_v46 = vld [vmem:[#allocation8 + $0xb78] sm:$0xff]  ;;  %v5296_v28 = vcombine.high %v788_v24, %v792_v7  ;;  %v5295_v33 = vcombine.low %v788_v24, %v792_v7 }
 0x2ad   :  { %v5298_v29 = vcombine.high %v789_v26, %v793_v46  ;;  %v5297_v35 = vcombine.low %v789_v26, %v793_v46  ;;  %v844_v46 = vld [vmem:[#allocation8 + $0xd10] sm:$0xff] }
 0x2ae   :  { %3963 = vmatpush1.bf16.msra.mxu0 %v5239_v14  ;;  %v796_v14 = vld [vmem:[#allocation8 + $0xb90] sm:$0xff] }
 0x2af   :  { %4127 = vmatpush1.bf16.msra.mxu1 %v5241_v30  ;;  %3964 = vmatprep.subr.bf16.mxu0 %v5248_v31  ;;  %v800_v30 = vld [vmem:[#allocation8 + $0xbb0] sm:$0xff]  ;;  %v797_v31 = vld [vmem:[#allocation8 + $0xb98] sm:$0xff] }
 0x2b0   :  { %4128 = vmatprep.subr.bf16.mxu1 %v5250_v32  ;;  %v801_v32 = vld [vmem:[#allocation8 + $0xbb8] sm:$0xff]  ;;  %v5304_v63 = vcombine.high %v796_v14, %v800_v30  ;;  %v5303_v42 = vcombine.low %v796_v14, %v800_v30 }
 0x2b1   :  { %v5306_v37 = vcombine.high %v797_v31, %v801_v32  ;;  %v5305_v43 = vcombine.low %v797_v31, %v801_v32  ;;  %v852_v31 = vld [vmem:[#allocation8 + $0xd50] sm:$0xff] }
 0x2b2   :  { %3965 = vmatpush1.bf16.msra.mxu0 %v5247_v38  ;;  %v804_v38 = vld [vmem:[#allocation8 + $0xbd0] sm:$0xff] }
 0x2b3   :  { %4129 = vmatpush1.bf16.msra.mxu1 %v5249_v39  ;;  %3966 = vmatprep.subr.bf16.mxu0 %v5256_v57  ;;  %v808_v39 = vld [vmem:[#allocation8 + $0xbf0] sm:$0xff]  ;;  %v805_v57 = vld [vmem:[#allocation8 + $0xbd8] sm:$0xff] }
 0x2b4   :  { %4130 = vmatprep.subr.bf16.mxu1 %v5258_v40  ;;  %v809_v40 = vld [vmem:[#allocation8 + $0xbf8] sm:$0xff]  ;;  %v5312_v50 = vcombine.high %v804_v38, %v808_v39  ;;  %v5311_v55 = vcombine.low %v804_v38, %v808_v39  ;;  %v856_v32 = vld [vmem:[#allocation8 + $0xd70] sm:$0xff] }
 0x2b5   :  { %v5314_v52 = vcombine.high %v805_v57, %v809_v40  ;;  %v5313_v51 = vcombine.low %v805_v57, %v809_v40  ;;  %v5360_v38 = vcombine.high %v852_v31, %v856_v32  ;;  %v860_v57 = vld [vmem:[#allocation8 + $0xd90] sm:$0xff] }
 0x2b6   :  { %3967 = vmatpush1.bf16.msra.mxu0 %v5255_v5  ;;  %v812_v5 = vld [vmem:[#allocation8 + $0xc10] sm:$0xff] }
 0x2b7   :  { %4131 = vmatpush1.bf16.msra.mxu1 %v5257_v16  ;;  %3968 = vmatprep.subr.bf16.mxu0 %v5264_v53  ;;  %v816_v16 = vld [vmem:[#allocation8 + $0xc30] sm:$0xff]  ;;  %v813_v53 = vld [vmem:[#allocation8 + $0xc18] sm:$0xff] }
 0x2b8   :  { %4132 = vmatprep.subr.bf16.mxu1 %v5266_v54  ;;  %v817_v54 = vld [vmem:[#allocation8 + $0xc38] sm:$0xff]  ;;  %v5320_v56 = vcombine.high %v812_v5, %v816_v16  ;;  %v864_v40 = vld [vmem:[#allocation8 + $0xdb0] sm:$0xff] }
 0x2b9   :  { %v5322_v58 = vcombine.high %v813_v53, %v817_v54  ;;  %v5321_v4 = vcombine.low %v813_v53, %v817_v54 }
 0x2ba   :  { %3969 = vmatpush1.bf16.msra.mxu0 %v5263_v62  ;;  %v820_v62 = vld [vmem:[#allocation8 + $0xc50] sm:$0xff] }
 0x2bb   :  { %4133 = vmatpush1.bf16.msra.mxu1 %v5265_v0  ;;  %3970 = vmatprep.subr.bf16.mxu0 %v5272_v1  ;;  %v824_v0 = vld [vmem:[#allocation8 + $0xc70] sm:$0xff]  ;;  %v5319_v1 = vcombine.low %v812_v5, %v816_v16  ;;  %v5368_v5 = vcombine.high %v860_v57, %v864_v40 }
 0x2bc   :  { %4134 = vmatprep.subr.bf16.mxu1 %v5274_v3  ;;  %v821_v3 = vld [vmem:[#allocation8 + $0xc58] sm:$0xff]  ;;  %v5328_v6 = vcombine.high %v820_v62, %v824_v0  ;;  %v5327_v17 = vcombine.low %v820_v62, %v824_v0 }
 0x2bd   :  { %v5329_v18 = vcombine.low %v821_v3, %v825_v61  ;;  %v869_v62 = vld [vmem:[#allocation8 + $0xdd8] sm:$0xff] }
 0x2be   :  { %3971 = vmatpush1.bf16.msra.mxu0 %v5271_v9  ;;  %v832_v9 = vld [vmem:[#allocation8 + $0xcb0] sm:$0xff]  ;;  %v873_v0 = vld [vmem:[#allocation8 + $0xdf8] sm:$0xff] }
 0x2bf   :  { %4135 = vmatpush1.bf16.msra.mxu1 %v5273_v10  ;;  %3972 = vmatprep.subr.bf16.mxu0 %v5280_v11  ;;  %v5330_v10 = vcombine.high %v821_v3, %v825_v61  ;;  %v829_v11 = vld [vmem:[#allocation8 + $0xc98] sm:$0xff]  ;;  %v5336_v19 = vcombine.high %v828_v8, %v832_v9  ;;  %v5335_v24 = vcombine.low %v828_v8, %v832_v9 }
 0x2c0   :  { %4136 = vmatprep.subr.bf16.mxu1 %v5282_v12  ;;  %v833_v12 = vld [vmem:[#allocation8 + $0xcb8] sm:$0xff]  ;;  %v5367_v61 = vcombine.low %v860_v57, %v864_v40 }
 0x2c1   :  { %v5338_v20 = vcombine.high %v829_v11, %v833_v12 }
 0x2c2   :  { %3973 = vmatpush1.bf16.msra.mxu0 %v5279_v21  ;;  %v836_v21 = vld [vmem:[#allocation8 + $0xcd0] sm:$0xff] }
 0x2c3   :  { %4137 = vmatpush1.bf16.msra.mxu1 %v5281_v22  ;;  %3974 = vmatprep.subr.bf16.mxu0 %v5288_v59  ;;  %v840_v22 = vld [vmem:[#allocation8 + $0xcf0] sm:$0xff]  ;;  %v837_v59 = vld [vmem:[#allocation8 + $0xcd8] sm:$0xff] }
 0x2c4   :  { %4138 = vmatprep.subr.bf16.mxu1 %v5290_v23  ;;  %v841_v23 = vld [vmem:[#allocation8 + $0xcf8] sm:$0xff]  ;;  %v5344_v7 = vcombine.high %v836_v21, %v840_v22 }
 0x2c5   :  { %v5346_v26 = vcombine.high %v837_v59, %v841_v23 }
 0x2c6   :  { %3975 = vmatpush1.bf16.msra.mxu0 %v5287_v27  ;;  %v848_v27 = vld [vmem:[#allocation8 + $0xd30] sm:$0xff] }
 0x2c7   :  { %4139 = vmatpush1.bf16.msra.mxu1 %v5289_v15  ;;  %3976 = vmatprep.subr.bf16.mxu0 %v5296_v28  ;;  %v845_v15 = vld [vmem:[#allocation8 + $0xd18] sm:$0xff]  ;;  %v5352_v14 = vcombine.high %v844_v46, %v848_v27 }
 0x2c8   :  { %4140 = vmatprep.subr.bf16.mxu1 %v5298_v29  ;;  %v849_v28 = vld [vmem:[#allocation8 + $0xd38] sm:$0xff]  ;;  %v5345_v29 = vcombine.low %v837_v59, %v841_v23  ;;  %v884_v59 = vld [vmem:[#allocation8 + $0xe50] sm:$0xff] }
 0x2c9   :  { %v5354_v30 = vcombine.high %v845_v15, %v849_v28  ;;  %v888_v23 = vld [vmem:[#allocation8 + $0xe70] sm:$0xff] }
 0x2ca   :  { %3977 = vmatpush1.bf16.msra.mxu0 %v5295_v33  ;;  %v853_v33 = vld [vmem:[#allocation8 + $0xd58] sm:$0xff] }
 0x2cb   :  { %4141 = vmatpush1.bf16.msra.mxu1 %v5297_v35  ;;  %3978 = vmatprep.subr.bf16.mxu0 %v5304_v63  ;;  %v857_v35 = vld [vmem:[#allocation8 + $0xd78] sm:$0xff]  ;;  %v5351_v63 = vcombine.low %v844_v46, %v848_v27  ;;  %v5392_v46 = vcombine.high %v884_v59, %v888_v23 }
 0x2cc   :  { %4142 = vmatprep.subr.bf16.mxu1 %v5306_v37  ;;  %v5353_v37 = vcombine.low %v845_v15, %v849_v28  ;;  %v5362_v39 = vcombine.high %v853_v33, %v857_v35  ;;  %v892_v15 = vld [vmem:[#allocation8 + $0xe90] sm:$0xff] }
 0x2cd   :  { %v896_v28 = vld [vmem:[#allocation8 + $0xeb0] sm:$0xff] }
 0x2ce   :  { %3979 = vmatpush1.bf16.msra.mxu0 %v5303_v42  ;;  %v861_v42 = vld [vmem:[#allocation8 + $0xd98] sm:$0xff] }
 0x2cf   :  { %4143 = vmatpush1.bf16.msra.mxu1 %v5305_v43  ;;  %3980 = vmatprep.subr.bf16.mxu0 %v5312_v50  ;;  %v865_v43 = vld [vmem:[#allocation8 + $0xdb8] sm:$0xff]  ;;  %v5359_v50 = vcombine.low %v852_v31, %v856_v32  ;;  %v5400_v31 = vcombine.high %v892_v15, %v896_v28 }
 0x2d0   :  { %4144 = vmatprep.subr.bf16.mxu1 %v5314_v52  ;;  %v5361_v52 = vcombine.low %v853_v33, %v857_v35  ;;  %v5370_v54 = vcombine.high %v861_v42, %v865_v43  ;;  %v5369_v8 = vcombine.low %v861_v42, %v865_v43  ;;  %v900_v33 = vld [vmem:[#allocation8 + $0xed0] sm:$0xff] }
 0x2d1   :  { %v904_v35 = vld [vmem:[#allocation8 + $0xef0] sm:$0xff] }
 0x2d2   :  { %3981 = vmatpush1.bf16.msra.mxu0 %v5311_v55  ;;  %v868_v55 = vld [vmem:[#allocation8 + $0xdd0] sm:$0xff]  ;;  %v5408_v57 = vcombine.high %v900_v33, %v904_v35 }
 0x2d3   :  { %4145 = vmatpush1.bf16.msra.mxu1 %v5313_v51  ;;  %3991 = vmatprep.subr.bf16.mxu0 %v5320_v56  ;;  %v872_v51 = vld [vmem:[#allocation8 + $0xdf0] sm:$0xff] }
 0x2d4   :  { %4155 = vmatprep.subr.bf16.mxu1 %v5322_v58  ;;  %v5376_v9 = vcombine.high %v868_v55, %v872_v51  ;;  %v908_v42 = vld [vmem:[#allocation8 + $0xf10] sm:$0xff] }
 0x2d5   :  { %3983 = vmatmul.mubr.bf16.vlgmr.msra.gmra.mrb[12].mxu0 %v6083_v34  ;;  %v912_v43 = vld [vmem:[#allocation8 + $0xf30] sm:$0xff] }
 0x2d6   :  { %4147 = vmatmul.mubr.bf16.vlgmr.msra.gmra.mrb[12].mxu1 %v6083_v34  ;;  %3992 = vmatpush1.bf16.msra.mxu0 %v5319_v1  ;;  %v5337_v34 = vcombine.low %v829_v11, %v833_v12  ;;  %v876_v11 = vld [vmem:[#allocation8 + $0xe10] sm:$0xff] }
 0x2d7   :  { %4023 = vmatprep.mubr.bf16.mxu0 %v6085_v41  ;;  %4156 = vmatpush1.bf16.msra.mxu1 %v5321_v4  ;;  %v880_v12 = vld [vmem:[#allocation8 + $0xe30] sm:$0xff] }
 0x2d8   :  { %4187 = vmatprep.mubr.bf16.mxu1 %v6085_v41  ;;  %3993 = vmatprep.subr.bf16.mxu0 %v5328_v6  ;;  %v5343_v41 = vcombine.low %v836_v21, %v840_v22  ;;  %v5384_v21 = vcombine.high %v876_v11, %v880_v12 }
 0x2d9   :  { %4157 = vmatprep.subr.bf16.mxu1 %v5330_v10  ;;  %v5378_v10 = vcombine.high %v869_v62, %v873_v0 }
 0x2da   :  { %3994 = vmatpush1.bf16.msra.mxu0 %v5327_v17  ;;  %v877_v17 = vld [vmem:[#allocation8 + $0xe18] sm:$0xff] }
 0x2db   :  { %4158 = vmatpush1.bf16.msra.mxu1 %v5329_v18  ;;  %3995 = vmatprep.subr.bf16.mxu0 %v5336_v19  ;;  %v881_v18 = vld [vmem:[#allocation8 + $0xe38] sm:$0xff]  ;;  %v5375_v19 = vcombine.low %v868_v55, %v872_v51  ;;  %v5416_v55 = vcombine.high %v908_v42, %v912_v43 }
 0x2dc   :  { %4159 = vmatprep.subr.bf16.mxu1 %v5338_v20  ;;  %v5377_v20 = vcombine.low %v869_v62, %v873_v0  ;;  %v5386_v22 = vcombine.high %v877_v17, %v881_v18  ;;  %v916_v62 = vld [vmem:[#allocation8 + $0xf50] sm:$0xff] }
 0x2dd   :  { %v920_v0 = vld [vmem:[#allocation8 + $0xf70] sm:$0xff] }
 0x2de   :  { %3996 = vmatpush1.bf16.msra.mxu0 %v5335_v24  ;;  %v885_v24 = vld [vmem:[#allocation8 + $0xe58] sm:$0xff] }
 0x2df   :  { %4160 = vmatpush1.bf16.msra.mxu1 %v5337_v34  ;;  %3997 = vmatprep.subr.bf16.mxu0 %v5344_v7  ;;  %v889_v34 = vld [vmem:[#allocation8 + $0xe78] sm:$0xff]  ;;  %v5383_v7 = vcombine.low %v876_v11, %v880_v12 }
 0x2e0   :  { %4161 = vmatprep.subr.bf16.mxu1 %v5346_v26  ;;  %v5385_v26 = vcombine.low %v877_v17, %v881_v18  ;;  %v5394_v27 = vcombine.high %v885_v24, %v889_v34  ;;  %v925_v11 = vld [vmem:[#allocation8 + $0xf98] sm:$0xff]  ;;  %v6121_v17 = vld [vmem:[#allocation10] sm:$0xff]  ;;  %v5423_v18 = vcombine.low %v916_v62, %v920_v0 }
 0x2e1   :  { %v929_v12 = vld [vmem:[#allocation8 + $0xfb8] sm:$0xff] }
 0x2e2   :  { %3998 = vmatpush1.bf16.msra.mxu0 %v5343_v41  ;;  %v893_v41 = vld [vmem:[#allocation8 + $0xe98] sm:$0xff] }
 0x2e3   :  { %4162 = vmatpush1.bf16.msra.mxu1 %v5345_v29  ;;  %3999 = vmatprep.subr.bf16.mxu0 %v5352_v14  ;;  %v897_v29 = vld [vmem:[#allocation8 + $0xeb8] sm:$0xff]  ;;  %v5391_v14 = vcombine.low %v884_v59, %v888_v23  ;;  %v936_v59 = vld [vmem:[#allocation8 + $0xff0] sm:$0xff]  ;;  %v947_v23 = vrot.slane %v6121_v17, %v128_v47 }
 0x2e4   :  { %4163 = vmatprep.subr.bf16.mxu1 %v5354_v30  ;;  %v5393_v30 = vcombine.low %v885_v24, %v889_v34  ;;  %v5402_v32 = vcombine.high %v893_v41, %v897_v29  ;;  %v933_v24 = vld [vmem:[#allocation8 + $0xfd8] sm:$0xff] }
 0x2e5   :  { %v937_v34 = vld [vmem:[#allocation8 + $0xff8] sm:$0xff] }
 0x2e6   :  { %4000 = vmatpush1.bf16.msra.mxu0 %v5351_v63  ;;  %v901_v63 = vld [vmem:[#allocation8 + $0xed8] sm:$0xff] }
 0x2e7   :  { %4164 = vmatpush1.bf16.msra.mxu1 %v5353_v37  ;;  %4001 = vmatprep.subr.bf16.mxu0 %v5360_v38  ;;  %v905_v37 = vld [vmem:[#allocation8 + $0xef8] sm:$0xff]  ;;  %v5399_v38 = vcombine.low %v892_v15, %v896_v28  ;;  %v5442_v15 = vcombine.high %v933_v24, %v937_v34 }
 0x2e8   :  { %v6113_v16 = vpop.f32.mrb[8].mxu0  ;;  %v6115_v53 = vpop.f32.mrb[8].mxu1  ;;  %4165 = vmatprep.subr.bf16.mxu1 %v5362_v39  ;;  %v5401_v39 = vcombine.low %v893_v41, %v897_v29  ;;  %v5410_v40 = vcombine.high %v901_v63, %v905_v37  ;;  %v5441_v29 = vcombine.low %v933_v24, %v937_v34  ;;  %v5698_v24 = vld [vmem:[%s6362_s5 + $0x148] sm:$0xff]  }
 0x2e9   :  { %v6117_v56 = vpop.f32.mrb[9].mxu0  ;;  %v6119_v58 = vpop.f32.mrb[9].mxu1 }
 0x2ea   :  { %v3701_v1 = vpop.f32.mrb[10].mxu0  ;;  %v3865_v3 = vpop.f32.mrb[10].mxu1  ;;  %4002 = vmatpush1.bf16.msra.mxu0 %v5359_v50  ;;  %v909_v50 = vld [vmem:[#allocation8 + $0xf18] sm:$0xff]  ;;  %v5597_v28 = vadd.f32 %v6117_v56, %v947_v23  ;;  %v5664_v56 = vld [vmem:[%s6362_s5] sm:$0xff]  }
 0x2eb   :  { %4166 = vmatpush1.bf16.msra.mxu1 %v5361_v52  ;;  %v3702_v4 = vpop.f32.mrb[11].mxu0  ;;  %v3866_v6 = vpop.f32.mrb[11].mxu1  ;;  %4003 = vmatprep.subr.bf16.mxu0 %v5368_v5  ;;  %v913_v52 = vld [vmem:[#allocation8 + $0xf38] sm:$0xff]  ;;  %v5407_v5 = vcombine.low %v900_v33, %v904_v35  ;;  %v5697_v23 = vld [vmem:[%s6362_s5 + $0x180] sm:$0xff]  }
 0x2ec   :  { %4167 = vmatprep.subr.bf16.mxu1 %v5370_v54  ;;  %v5409_v54 = vcombine.low %v901_v63, %v905_v37  ;;  %v5418_v51 = vcombine.high %v909_v50, %v913_v52  ;;  %v917_v1 = vld [vmem:[#allocation8 + $0xf58] sm:$0xff]  ;;  %v5417_v4 = vcombine.low %v909_v50, %v913_v52  ;;  %v5424_v6 = vcombine.high %v916_v62, %v920_v0  ;;  %v5676_v50 = vld [vmem:[%s6362_s5 + $0x18] sm:$0xff]  }
 0x2ed   :  { %v921_v3 = vld [vmem:[#allocation8 + $0xf78] sm:$0xff]  ;;  %v5677_v52 = vld [vmem:[%s6362_s5 + $0x98] sm:$0xff]  }
 0x2ee   :  { %4004 = vmatpush1.bf16.msra.mxu0 %v5367_v61  ;;  %v5415_v61 = vcombine.low %v908_v42, %v912_v43  ;;  %v5667_v35 = vld [vmem:[%s6362_s5 + $0xc8] sm:$0xff]   ;;  %v5674_v42 = vld [vmem:[%s6362_s5 + $0x58] sm:$0xff]  }
 0x2ef   :  { %4168 = vmatpush1.bf16.msra.mxu1 %v5369_v8  ;;  %4005 = vmatprep.subr.bf16.mxu0 %v5376_v9  ;;  %v5426_v8 = vcombine.high %v917_v1, %v921_v3  ;;  %v924_v9 = vld [vmem:[#allocation8 + $0xf90] sm:$0xff]  ;;  %v5668_v37 = vld [vmem:[%s6362_s5 + $0x8] sm:$0xff]   ;;  %v5675_v43 = vld [vmem:[%s6362_s5 + $0xd8] sm:$0xff]  }
 0x2f0   :  { %4169 = vmatprep.subr.bf16.mxu1 %v5378_v10  ;;  %v928_v10 = vld [vmem:[#allocation8 + $0xfb0] sm:$0xff]  ;;  %v5682_v62 = vld [vmem:[%s6362_s5 + $0x68] sm:$0xff]  }
 0x2f1   :  { %v5683_v0 = vld [vmem:[%s6362_s5 + $0xe8] sm:$0xff]  }
 0x2f2   :  { %4006 = vmatpush1.bf16.msra.mxu0 %v5375_v19  ;;  %v5425_v19 = vcombine.low %v917_v1, %v921_v3  ;;  %v5684_v1 = vld [vmem:[%s6362_s5 + $0x28] sm:$0xff]   ;;  %v943_v3 = vrot.slane %v6121_v17, %v124_v45  ;;  %v5688_v45 = vld [vmem:[%s6362_s5 + $0x30] sm:$0xff]  }
 0x2f3   :  { %4170 = vmatpush1.bf16.msra.mxu1 %v5377_v20  ;;  %4007 = vmatprep.subr.bf16.mxu0 %v5384_v21  ;;  %v5432_v20 = vcombine.high %v924_v9, %v928_v10  ;;  %v5434_v21 = vcombine.high %v925_v11, %v929_v12 }
 0x2f4   :  { %4171 = vmatprep.subr.bf16.mxu1 %v5386_v22  ;;  %v932_v22 = vld [vmem:[#allocation8 + $0xfd0] sm:$0xff] }
 0x2f5   :  { %v5439_v47 = vcombine.low %v932_v22, %v936_v59 }
 0x2f6   :  { %4008 = vmatpush1.bf16.msra.mxu0 %v5383_v7  ;;  %v955_v7 = vrot.slane %v6121_v17, %v136_v48  ;;  %v5662_v48 = vld [vmem:[%s6362_s5 + $0x40] sm:$0xff]  }
 0x2f7   :  { %4172 = vmatpush1.bf16.msra.mxu1 %v5385_v26  ;;  %4009 = vmatprep.subr.bf16.mxu0 %v5392_v46  ;;  %v5431_v26 = vcombine.low %v924_v9, %v928_v10  ;;  %v5433_v46 = vcombine.low %v925_v11, %v929_v12  ;;  %v5596_v9 = vadd.f32 %v6113_v16, %v943_v3  ;;  %v5689_v10 = vld [vmem:[%s6362_s5 + $0xb0] sm:$0xff]   ;;  %v5691_v12 = vld [vmem:[%s6362_s5 + $0xf8] sm:$0xff]  }
 0x2f8   :  { %4173 = vmatprep.subr.bf16.mxu1 %v5394_v27  ;;  %v5440_v27 = vcombine.high %v932_v22, %v936_v59  ;;  %v5599_v41 = vadd.f32 %v6119_v58, %v955_v7  ;;  %v5665_v58 = vld [vmem:[%s6362_s5 + $0x80] sm:$0xff]   ;;  %v5692_v16 = vld [vmem:[%s6362_s5 + $0x38] sm:$0xff]   ;;  %v5699_v7 = vld [vmem:[%s6362_s5 + $0x1c8] sm:$0xff]  }
 0x2f9   :  { %v5696_v22 = vld [vmem:[%s6362_s5 + $0x100] sm:$0xff]  }
 0x2fa   :  { %4010 = vmatpush1.bf16.msra.mxu0 %v5391_v14  ;;  %v5663_v14 = vld [vmem:[%s6362_s5 + $0xc0] sm:$0xff]  }
 0x2fb   :  { %4174 = vmatpush1.bf16.msra.mxu1 %v5393_v30  ;;  %4011 = vmatprep.subr.bf16.mxu0 %v5400_v31  ;;  %v4197_v30 = vmax.f32 %v5597_v28, 0.0  ;;  %v4199_v31 = vmax.f32 %v5599_v41, 0.0  ;;  %v5704_v28 = vld [vmem:[%s6362_s5 + $0x110] sm:$0xff]  }
 0x2fc   :  { %4175 = vmatprep.subr.bf16.mxu1 %v5402_v32  ;;  %v5666_v32 = vld [vmem:[%s6362_s5 + $0x48] sm:$0xff]   ;;  %v5705_v41 = vld [vmem:[%s6362_s5 + $0x190] sm:$0xff]  }
 0x2fd   :  { %v4205_v33 = vpack.c.bf16 %v4197_v30, %v4197_v30  ;;  %v4207_v63 = vpack.c.bf16 %v4199_v31, %v4199_v31  ;;  %v5710_v30 = vld [vmem:[%s6362_s5 + $0x160] sm:$0xff]  }
 0x2fe   :  { %4012 = vmatpush1.bf16.msra.mxu0 %v5399_v38  ;;  %v5669_v38 = vld [vmem:[%s6362_s5 + $0x88] sm:$0xff]   ;;  %v5711_v31 = vld [vmem:[%s6362_s5 + $0x1e0] sm:$0xff]  }
 0x2ff   :  { %4176 = vmatpush1.bf16.msra.mxu1 %v5401_v39  ;;  %4013 = vmatprep.subr.bf16.mxu0 %v5408_v57  ;;  %v5670_v39 = vld [vmem:[%s6362_s5 + $0x50] sm:$0xff]  }
 0x300   :  { %4177 = vmatprep.subr.bf16.mxu1 %v5410_v40  ;;  %v5672_v57 = vld [vmem:[%s6362_s5 + $0x10] sm:$0xff]  }
 0x301   :  { %v5673_v40 = vld [vmem:[%s6362_s5 + $0x90] sm:$0xff]  }
 0x302   :  { %4014 = vmatpush1.bf16.msra.mxu0 %v5407_v5  ;;  %v5678_v5 = vld [vmem:[%s6362_s5 + $0x60] sm:$0xff]  }
 0x303   :  { %4178 = vmatpush1.bf16.msra.mxu1 %v5409_v54  ;;  %4015 = vmatprep.subr.bf16.mxu0 %v5416_v55  ;;  %v5679_v54 = vld [vmem:[%s6362_s5 + $0xe0] sm:$0xff]  }
 0x304   :  { %4179 = vmatprep.subr.bf16.mxu1 %v5418_v51  ;;  %v5680_v55 = vld [vmem:[%s6362_s5 + $0x20] sm:$0xff]  }
 0x305   :  { %v5681_v51 = vld [vmem:[%s6362_s5 + $0xa0] sm:$0xff]  }
 0x306   :  { %4016 = vmatpush1.bf16.msra.mxu0 %v5415_v61  ;;  %v5685_v61 = vld [vmem:[%s6362_s5 + $0xa8] sm:$0xff]  }
 0x307   :  { %4180 = vmatpush1.bf16.msra.mxu1 %v5417_v4  ;;  %4017 = vmatprep.subr.bf16.mxu0 %v5424_v6  ;;  %v5686_v4 = vld [vmem:[%s6362_s5 + $0x70] sm:$0xff]   ;;  %v951_v6 = vrot.slane %v6121_v17, %v132_v2  ;;  %v5690_v2 = vld [vmem:[%s6362_s5 + $0x78] sm:$0xff]  }
 0x308   :  { %4181 = vmatprep.subr.bf16.mxu1 %v5426_v8  ;;  %v5687_v8 = vld [vmem:[%s6362_s5 + $0xf0] sm:$0xff]  }
 0x309   :  { %v5598_v11 = vadd.f32 %v6115_v53, %v951_v6  ;;  %v5694_v53 = vld [vmem:[%s6362_s5 + $0x140] sm:$0xff]  }
 0x30a   :  { %4018 = vmatpush1.bf16.msra.mxu0 %v5423_v18  ;;  %v4196_v18 = vmax.f32 %v5596_v9, 0.0 }
 0x30b   :  { %4182 = vmatpush1.bf16.msra.mxu1 %v5425_v19  ;;  %4019 = vmatprep.subr.bf16.mxu0 %v5432_v20  ;;  %v5693_v19 = vld [vmem:[%s6362_s5 + $0xb8] sm:$0xff]   ;;  %v4198_v20 = vmax.f32 %v5598_v11, 0.0 }
 0x30c   :  { %4183 = vmatprep.subr.bf16.mxu1 %v5434_v21  ;;  %v5695_v21 = vld [vmem:[%s6362_s5 + $0x1c0] sm:$0xff]   ;;  %v4204_v59 = vpack.c.bf16 %v4196_v18, %v4196_v18 }
 0x30d   :  { %v4206_v34 = vpack.c.bf16 %v4198_v20, %v4198_v20 }
 0x30e   :  { %4020 = vmatpush1.bf16.msra.mxu0 %v5431_v26  ;;  %v5700_v26 = vld [vmem:[%s6362_s5 + $0x108] sm:$0xff]  }
 0x30f   :  { %4184 = vmatpush1.bf16.msra.mxu1 %v5433_v46  ;;  %4021 = vmatprep.subr.bf16.mxu0 %v5440_v27  ;;  %v5701_v46 = vld [vmem:[%s6362_s5 + $0x188] sm:$0xff]   ;;  %v5702_v27 = vld [vmem:[%s6362_s5 + $0x150] sm:$0xff]  }
 0x310   :  { %4185 = vmatprep.subr.bf16.mxu1 %v5442_v15  ;;  %v5703_v15 = vld [vmem:[%s6362_s5 + $0x1d0] sm:$0xff]  }
 0x312   :  { %4022 = vmatpush1.bf16.msra.mxu0 %v5439_v47  ;;  %v5706_v47 = vld [vmem:[%s6362_s5 + $0x158] sm:$0xff]  }
 0x313   :  { %4186 = vmatpush1.bf16.msra.mxu1 %v5441_v29  ;;  %5508 = vmatprep.subr.bf16.mxu0 %v5662_v48  ;;  %v5707_v29 = vld [vmem:[%s6362_s5 + $0x1d8] sm:$0xff]  }
 0x314   :  { %5530 = vmatprep.subr.bf16.mxu1 %v5663_v14  ;;  %v5708_v48 = vld [vmem:[%s6362_s5 + $0x118] sm:$0xff]  }
 0x315   :  { %4024 = vmatmul.mubr.bf16.vlgmr.msra.gmra.mrb[12].mxu0 %v6095_v25  ;;  %v5709_v14 = vld [vmem:[%s6362_s5 + $0x198] sm:$0xff]  }
 0x316   :  { %4188 = vmatmul.mubr.bf16.vlgmr.msra.gmra.mrb[12].mxu1 %v6095_v25  ;;  %5509 = vmatpush3.bf16.msra.mxu0 %v5664_v56  ;;  %v5671_v25 = vld [vmem:[%s6362_s5 + $0xd0] sm:$0xff]   ;;  %v5712_v56 = vld [vmem:[%s6362_s5 + $0x120] sm:$0xff]  }
 0x317   :  { %4763 = vmatprep.mubr.bf16.mxu0 %v4205_v33  ;;  %5531 = vmatpush3.bf16.msra.mxu1 %v5665_v58  ;;  %v5713_v58 = vld [vmem:[%s6362_s5 + $0x1a0] sm:$0xff]   ;;  %v5715_v33 = vld [vmem:[%s6362_s5 + $0x1e8] sm:$0xff]  }
 0x318   :  { %4803 = vmatprep.mubr.bf16.mxu1 %v4207_v63  ;;  %5510 = vmatprep.subr.bf16.mxu0 %v5666_v32  ;;  %v5714_v32 = vld [vmem:[%s6362_s5 + $0x168] sm:$0xff]  }
 0x319   :  { %5532 = vmatprep.subr.bf16.mxu1 %v5667_v35  ;;  %v5716_v35 = vld [vmem:[%s6362_s5 + $0x128] sm:$0xff]  }
 0x31a   :  { %5511 = vmatpush3.bf16.msra.mxu0 %v5668_v37  ;;  %v5717_v63 = vld [vmem:[%s6362_s5 + $0x1a8] sm:$0xff]   ;;  %v5718_v37 = vld [vmem:[%s6362_s5 + $0x170] sm:$0xff]  }
 0x31b   :  { %5533 = vmatpush3.bf16.msra.mxu1 %v5669_v38  ;;  %5512 = vmatprep.subr.bf16.mxu0 %v5670_v39  ;;  %v5719_v38 = vld [vmem:[%s6362_s5 + $0x1f0] sm:$0xff]  }
 0x31c   :  { %5534 = vmatprep.subr.bf16.mxu1 %v5671_v25  ;;  %v5720_v39 = vld [vmem:[%s6362_s5 + $0x130] sm:$0xff]  }
 0x31d   :  { %v5721_v25 = vld [vmem:[%s6362_s5 + $0x1b0] sm:$0xff]  }
 0x31e   :  { %5513 = vmatpush3.bf16.msra.mxu0 %v5672_v57  ;;  %v5722_v57 = vld [vmem:[%s6362_s5 + $0x178] sm:$0xff]  }
 0x31f   :  { %5535 = vmatpush3.bf16.msra.mxu1 %v5673_v40  ;;  %5514 = vmatprep.subr.bf16.mxu0 %v5674_v42  ;;  %v5723_v40 = vld [vmem:[%s6362_s5 + $0x1f8] sm:$0xff]  }
 0x320   :  { %5536 = vmatprep.subr.bf16.mxu1 %v5675_v43  ;;  %v5724_v42 = vld [vmem:[%s6362_s5 + $0x138] sm:$0xff]  }
 0x321   :  { %v5725_v43 = vld [vmem:[%s6362_s5 + $0x1b8] sm:$0xff]   ;;  %s5900_s5 = smov [#allocation13]  }
 0x322   :  { %5515 = vmatpush3.bf16.msra.mxu0 %v5676_v50  ;;  %v959_v50 = vrot.slane %v6121_v17, %v140_v49  ;;  %s4899_s9 = sshll.u32 %s5900_s5, 4  ;;  %s4900_s9 = int_to_ptr.vmem [resolvable:$true] %s4899_s9 }
 0x323   :  { %5537 = vmatpush3.bf16.msra.mxu1 %v5677_v52  ;;  %5516 = vmatprep.subr.bf16.mxu0 %v5678_v5  ;;  %v967_v52 = vrot.slane %v6121_v17, %v148_v36  ;;  %v963_v5 = vrot.slane %v6121_v17, %v144_v13  ;;  %s5859_s10 = scalar_lea.vmem %s4900_s9, 128  ;;  %p5864_p7 = scmp.lt.s32.totalorder %s4900_s9, %s4900_s9 }
 0x324   :  { %5538 = vmatprep.subr.bf16.mxu1 %v5679_v54  ;;  %v971_v54 = vrot.slane %v6121_v17, %v152_v60  ;;  %p5860_p6 = scmp.ne.s32.totalorder %s4900_s9, %s5859_s10  ;;  %p5865_p8 = scmp.lt.s32.totalorder %s5859_s10, %s5859_s10 }
 0x326   :  { %5517 = vmatpush3.bf16.msra.mxu0 %v5680_v55  ;;  %p5866_p9 = por %p5865_p8, %p5864_p7 }
 0x327   :  { %5539 = vmatpush3.bf16.msra.mxu1 %v5681_v51  ;;  %5518 = vmatprep.subr.bf16.mxu0 %v5682_v62 }
 0x328   :  { %5540 = vmatprep.subr.bf16.mxu1 %v5683_v0  ;;  %p5867_p10 = pnand %p5866_p9, %p5860_p6 }
 0x32a   :  { %5519 = vmatpush3.bf16.msra.mxu0 %v5684_v1 }
 0x32b   :  { %5541 = vmatpush3.bf16.msra.mxu1 %v5685_v61  ;;  %5520 = vmatprep.subr.bf16.mxu0 %v5686_v4 }
 0x32c   :  { %5542 = vmatprep.subr.bf16.mxu1 %v5687_v8 }
 0x32e   :  { %5521 = vmatpush3.bf16.msra.mxu0 %v5688_v45 }
 0x32f   :  { %5543 = vmatpush3.bf16.msra.mxu1 %v5689_v10  ;;  %5522 = vmatprep.subr.bf16.mxu0 %v5690_v2 }
 0x330   :  { %5544 = vmatprep.subr.bf16.mxu1 %v5691_v12 }
 0x332   :  { %5523 = vmatpush3.bf16.msra.mxu0 %v5692_v16  ;;  %v5443_v16 = vld [vmem:[#allocation11] ss:$0 sm:$0xff] }
 0x333   :  { %5545 = vmatpush3.bf16.msra.mxu1 %v5693_v19  ;;  %5552 = vmatprep.subr.bf16.mxu0 %v5694_v53 }
 0x334   :  { %5574 = vmatprep.subr.bf16.mxu1 %v5695_v21 }
 0x335   :  { %4764 = vmatmul.mubr.bf16.vlgmr.msra.gmra.mrb[16].mxu0 %v4204_v59 }
 0x336   :  { %4804 = vmatmul.mubr.bf16.vlgmr.msra.gmra.mrb[16].mxu1 %v4206_v34  ;;  %5553 = vmatpush3.bf16.msra.mxu0 %v5696_v22 }
 0x337   :  { %5575 = vmatpush3.bf16.msra.mxu1 %v5697_v23  ;;  %5554 = vmatprep.subr.bf16.mxu0 %v5698_v24 }
 0x338   :  { %5576 = vmatprep.subr.bf16.mxu1 %v5699_v7 }
 0x33a   :  { %5555 = vmatpush3.bf16.msra.mxu0 %v5700_v26 }
 0x33b   :  { %5577 = vmatpush3.bf16.msra.mxu1 %v5701_v46  ;;  %5556 = vmatprep.subr.bf16.mxu0 %v5702_v27 }
 0x33c   :  { %5578 = vmatprep.subr.bf16.mxu1 %v5703_v15 }
 0x33e   :  { %5557 = vmatpush3.bf16.msra.mxu0 %v5704_v28 }
 0x33f   :  { %5579 = vmatpush3.bf16.msra.mxu1 %v5705_v41  ;;  %5558 = vmatprep.subr.bf16.mxu0 %v5706_v47 }
 0x340   :  { %5580 = vmatprep.subr.bf16.mxu1 %v5707_v29 }
 0x342   :  { %5559 = vmatpush3.bf16.msra.mxu0 %v5708_v48 }
 0x343   :  { %5581 = vmatpush3.bf16.msra.mxu1 %v5709_v14  ;;  %5560 = vmatprep.subr.bf16.mxu0 %v5710_v30 }
 0x344   :  { %5582 = vmatprep.subr.bf16.mxu1 %v5711_v31 }
 0x346   :  { %5561 = vmatpush3.bf16.msra.mxu0 %v5712_v56 }
 0x347   :  { %5583 = vmatpush3.bf16.msra.mxu1 %v5713_v58  ;;  %5562 = vmatprep.subr.bf16.mxu0 %v5714_v32 }
 0x348   :  { %5584 = vmatprep.subr.bf16.mxu1 %v5715_v33 }
 0x34a   :  { %5563 = vmatpush3.bf16.msra.mxu0 %v5716_v35 }
 0x34b   :  { %5585 = vmatpush3.bf16.msra.mxu1 %v5717_v63  ;;  %5564 = vmatprep.subr.bf16.mxu0 %v5718_v37 }
 0x34c   :  { %5586 = vmatprep.subr.bf16.mxu1 %v5719_v38 }
 0x34e   :  { %5565 = vmatpush3.bf16.msra.mxu0 %v5720_v39 }
 0x34f   :  { %5587 = vmatpush3.bf16.msra.mxu1 %v5721_v25  ;;  %5566 = vmatprep.subr.bf16.mxu0 %v5722_v57 }
 0x350   :  { %5588 = vmatprep.subr.bf16.mxu1 %v5723_v40 }
 0x352   :  { %5567 = vmatpush3.bf16.msra.mxu0 %v5724_v42 }
 0x353   :  { %5589 = vmatpush3.bf16.msra.mxu1 %v5725_v43 }
 0x3e8   :  { %v4025_v55 = vpop.f32.mrb[12].mxu0 }
 0x3e9   :  { %v5600_v51 = vadd.f32 %v4025_v55, %v959_v50  ;;  %v4189_v62 = vpop.f32.mrb[12].mxu1  ;;  %v4027_v0 = vpop.f32.mrb[13].mxu0 }
 0x3ea   :  { %v5602_v1 = vadd.f32 %v4189_v62, %v967_v52  ;;  %v5601_v3 = vadd.f32 %v4027_v0, %v963_v5  ;;  %v4191_v61 = vpop.f32.mrb[13].mxu1  ;;  %v4029_v49 = vpop.f32.mrb[14].mxu0 }
 0x3eb   :  { %v4200_v4 = vmax.f32 %v5600_v51, 0.0  ;;  %v5603_v6 = vadd.f32 %v4191_v61, %v971_v54  ;;  %v4193_v8 = vpop.f32.mrb[14].mxu1  ;;  %v4030_v36 = vpop.f32.mrb[15].mxu0 }
 0x3ec   :  { %v4202_v45 = vmax.f32 %v5602_v1, 0.0  ;;  %v4201_v9 = vmax.f32 %v5601_v3, 0.0  ;;  %v4194_v10 = vpop.f32.mrb[15].mxu1 }
 0x3ed   :  { %v4203_v13 = vmax.f32 %v5603_v6, 0.0  ;;  %v4208_v44 = vpack.c.bf16 %v4200_v4, %v4200_v4 }
 0x3ee   :  { %v4209_v2 = vpack.c.bf16 %v4201_v9, %v4201_v9  ;;  %v4210_v60 = vpack.c.bf16 %v4202_v45, %v4202_v45 }
 0x3ef   :  { %v4211_v11 = vpack.c.bf16 %v4203_v13, %v4203_v13 }
 0x3f0   :  { %4843 = vmatprep.mubr.bf16.mxu0 %v4209_v2 }
 0x3f1   :  { %4883 = vmatprep.mubr.bf16.mxu1 %v4211_v11  ;;  %4844 = vmatmul.mubr.bf16.vlgmr.msra.gmra.mrb[20].mxu0 %v4208_v44 }
 0x3f2   :  { %4884 = vmatmul.mubr.bf16.vlgmr.msra.gmra.mrb[20].mxu1 %v4210_v60 }
 0x408   :  { %v5524_v17 = vpop.f32.mrb[16].mxu0 }
 0x409   :  { %v5546_v12 = vpop.f32.mrb[16].mxu1  ;;  %v5525_v18 = vpop.f32.mrb[17].mxu0 }
 0x40a   :  { %v5526_v19 = vadd.f32 %v5525_v18, %v5524_v17  ;;  %v5547_v53 = vpop.f32.mrb[17].mxu1  ;;  %v5527_v20 = vpop.f32.mrb[18].mxu0 }
 0x40b   :  { %v5548_v21 = vadd.f32 %v5547_v53, %v5546_v12  ;;  %v5549_v22 = vpop.f32.mrb[18].mxu1  ;;  %v5528_v59 = vpop.f32.mrb[19].mxu0 }
 0x40c   :  { %v4766_v23 = vadd.f32 %v5526_v19, %v5443_v16  ;;  %v5550_v24 = vpop.f32.mrb[19].mxu1 }
 0x40e   :  { %v4806_v34 = vadd.f32 %v5548_v21, %v4766_v23 }
 0x4c4   :  { %v5568_v7 = vpop.f32.mrb[20].mxu0 }
 0x4c5   :  { %v5590_v26 = vpop.f32.mrb[20].mxu1  ;;  %v5569_v46 = vpop.f32.mrb[21].mxu0 }
 0x4c6   :  { %v5570_v27 = vadd.f32 %v5569_v46, %v5568_v7  ;;  %v5591_v15 = vpop.f32.mrb[21].mxu1  ;;  %v5571_v28 = vpop.f32.mrb[22].mxu0 }
 0x4c7   :  { %v5592_v41 = vadd.f32 %v5591_v15, %v5590_v26  ;;  %v5593_v47 = vpop.f32.mrb[22].mxu1  ;;  %v5572_v29 = vpop.f32.mrb[23].mxu0 }
 0x4c8   :  { %v4846_v48 = vadd.f32 %v5570_v27, %v4806_v34  ;;  %v5594_v14 = vpop.f32.mrb[23].mxu1 }
 0x4ca   :  { %v4886_v30 = vadd.f32 %v5592_v41, %v4846_v48 }
 0x4cc   :  { %4892 = vst.msk [vmem:[#allocation13] sm:$0xff] %vm4891_vm1, %v4886_v30 }
 0x4cd   :  { %5870 = shalt.err (!%p5867_p10)
}
 0x4ce   :  { %s5871_s14 = scalar_lea.hbm %s6364_s7, 128 }
 0x4cf   :  { %p5872_p11 = scmp.ne.s32.totalorder %s6364_s7, %s5871_s14  ;;  %p5875_p12 = scmp.lt.u32.totalorder %s5871_s14, %s6364_s7 }
 0x4d1   :  { %p5877_p13 = pnand %p5875_p12, %p5872_p11 }
 0x4d3   :  { %5880 = shalt.err (!%p5877_p13)
}
 0x4d4   :  { %4902 = dma.vmem_to_hbm [thread:$0]  %s4900_s9, 128, %s6364_s7, [#allocation4]  }
 0x4d5   :  { %5889 = dma.done.wait [#allocation4], 128  }
 0x4d6   :  { %5890 = vsyncadd [#allocation4], 4294967168 }
 0x4d7   :  { %4906 = vsyncpa [#allocation3], 1 }
 0x4d8   :  { %4907 = vsyncpa [#allocation6], 1 }
 0x4d9   :  { %4908 = vsyncpa [#allocation9], 1 }
 0x4da   :  { %4909 = vsyncpa [#allocation12], 1 }
 0x4db   :  { %4910 = vsyncpa [#allocation4], 1 }

</bundles_post_ra>
